<compile_context>
chip_gen: v6e
topology: v6e:2x2x1
jax: 0.10.0
libtpu: 0.0.40
codegen_flags: <defaults>
</compile_context>

<pallas_src>
import numpy as np
import jax
import jax.numpy as jnp
from jax.experimental import pallas as pl
from jax.experimental.pallas import tpu as pltpu


def _relu(x):
    return jnp.maximum(x, 0.0)


def _linear(x, w_ref, b_ref):
    return jnp.dot(x, w_ref[...], preferred_element_type=jnp.float32) + b_ref[...]


def causal_vae_kernel(
    # data (batch tile)
    x_ref, p_ref, p1h_ref, eps_ref,
    # fused encoder weights (block-diagonal z-encoder + ptb-encoder)
    w_enc1, b_enc1, w_enc2, b_enc2, w_enc3, b_enc3,
    # fused (mu | logvar) head
    w_head, b_head,
    # structural params
    s_row, scale_ref,
    # decoder weights
    wd1, bd1, wd2, bd2, wdo, bdo,
    # single packed, lane-dense output: [y | X_pred | mu | sigma | z | pad]
    out_ref,
):
    x = x_ref[...]
    bt = x.shape[0]
    z_dim = eps_ref.shape[-1]
    h3_dim = w_head.shape[0]

    # ---- fused encoder: [x | p] through block-diagonal layers ----
    xp = jnp.concatenate([x, p_ref[...]], axis=-1)
    h = _relu(_linear(xp, w_enc1, b_enc1))            # (bt, 2*h1)
    h = _relu(_linear(h, w_enc2, b_enc2))             # (bt, 2*h2)
    h3o = _linear(h, w_enc3, b_enc3)                  # (bt, h3 + z_dim)
    he = _relu(h3o[:, :h3_dim])                       # z-encoder layer-3 (ReLU)
    ptb_enc = h3o[:, h3_dim:]                         # ptb-encoder output (no ReLU)

    # ---- fused (mu | logvar) head; reparameterize z = mu + sigma*eps ----
    head = _linear(he, w_head, b_head)                # (bt, 2*z_dim)
    mu = head[:, :z_dim]
    logvar = head[:, z_dim:]
    sigma = jnp.exp(0.5 * logvar)
    z = mu + sigma * eps_ref[...]

    # ---- c = p1h[:, :-1] @ s  -> VPU reduction (keeps the MXU free) ----
    c = jnp.sum(p1h_ref[...] * s_row[...], axis=-1, keepdims=True)

    # ---- reconstruct (mode == 'causal'), fused over both decoder passes ----
    # shift = z + c*ptb_enc ; u = shift @ scale ; u0 = z @ scale
    shift = z + c * ptb_enc
    v = jnp.concatenate([shift, z], axis=0)                      # (2*bt, z_dim)
    u_both = jnp.dot(v, scale_ref[...], preferred_element_type=jnp.float32)

    # ---- Decoder_Gaussian MLP, single pass at 2x M ----
    hd = _relu(_linear(u_both, wd1, bd1))
    hd = _relu(_linear(hd, wd2, bd2))
    dec_both = _linear(hd, wdo, bdo)                             # (2*bt, exp_dim)

    y = dec_both[:bt]          # decoder(u)   -> 'y'
    x_pred = dec_both[bt:]     # decoder(u0)  -> 'X_pred'

    # ---- pack all outputs into one lane-dense slab, single store ----
    raw_w = 2 * y.shape[-1] + 3 * z_dim
    pad_w = out_ref.shape[-1] - raw_w
    pieces = [y, x_pred, mu, sigma, z]
    if pad_w > 0:
        pieces.append(jnp.zeros((bt, pad_w), jnp.float32))
    out_ref[...] = jnp.concatenate(pieces, axis=-1)


_FUSED_KEYS = (
    "w_enc1", "b_enc1", "w_enc2", "b_enc2", "w_enc3", "b_enc3",
    "w_head", "b_head",
    "s_row", "scale",
    "wd1", "bd1", "wd2", "bd2", "wdo", "bdo",
)


def _block_diag(a, b):
    top = jnp.concatenate([a, jnp.zeros((a.shape[0], b.shape[1]), a.dtype)], axis=1)
    bot = jnp.concatenate([jnp.zeros((b.shape[0], a.shape[1]), b.dtype), b], axis=1)
    return jnp.concatenate([top, bot], axis=0)


def pack_params(p):
    """Pack the logical (per-module) params into the fused kernel layout."""
    fused = {
        # encoder layer 1/2: block-diag(z_encoder, ptb_encoder)
        "w_enc1": _block_diag(p["we1"], p["wp1"]),
        "b_enc1": jnp.concatenate([p["be1"], p["bp1"]], axis=1),
        "w_enc2": _block_diag(p["we2"], p["wp2"]),
        "b_enc2": jnp.concatenate([p["be2"], p["bp2"]], axis=1),
        # encoder layer 3 (z-enc hidden 3) fused with ptb output layer
        "w_enc3": _block_diag(p["we3"], p["wpo"]),
        "b_enc3": jnp.concatenate([p["be3"], p["bpo"]], axis=1),
        # fused (mu | logvar) head
        "w_head": jnp.concatenate([p["wmu"], p["wlv"]], axis=1),
        "b_head": jnp.concatenate([p["bmu"], p["blv"]], axis=1),
        "s_row": p["s_row"],
        "scale": p["scale"],
        "wd1": p["wd1"], "bd1": p["bd1"],
        "wd2": p["wd2"], "bd2": p["bd2"],
        "wdo": p["wdo"], "bdo": p["bdo"],
    }
    return fused


def _pick_batch_tile(batch):
    """grid=(1,) on single-TC chips; >=2 parallel steps on dual-TC v7x."""
    try:
        kind = jax.devices()[0].device_kind.lower()
    except Exception:
        kind = ""
    dual_tc = ("v7" in kind) or ("tpu7" in kind) or ("7x" in kind)
    if dual_tc and batch % 2 == 0 and batch >= 16:
        return batch // 2
    return batch


def causal_vae_forward(x_sample, p, p1h_trim, eps, fused_params, *, batch_tile=None):
    """Runs the fused forward kernel.

    Returns a dict mirroring the PyTorch forward(): qz (mu, sigma),
    pz (zeros, ones), z, y, X_pred, X_gt.
    """
    B, exp_dim = x_sample.shape
    z_dim = eps.shape[1]
    ptb_dim = p.shape[1]

    if batch_tile is None:
        batch_tile = _pick_batch_tile(B)
    bt = min(batch_tile, B)
    assert B % bt == 0, f"batch {B} must be divisible by batch tile {bt}"
    grid = (B // bt,)

    # Lane-dense packed output width (multiple of 128).
    raw_w = 2 * exp_dim + 3 * z_dim
    out_w = ((raw_w + 127) // 128) * 128

    weights = [fused_params[k] for k in _FUSED_KEYS]

    data_specs = [
        pl.BlockSpec((bt, exp_dim), lambda i: (i, 0)),   # x
        pl.BlockSpec((bt, ptb_dim), lambda i: (i, 0)),   # p
        pl.BlockSpec((bt, z_dim), lambda i: (i, 0)),     # p1h (trimmed)
        pl.BlockSpec((bt, z_dim), lambda i: (i, 0)),     # eps
    ]
    # Weights: full-array blocks, constant block index -> VMEM-resident across
    # grid steps, single buffer (never re-DMA'd).
    weight_specs = [
        pl.BlockSpec(w.shape, lambda i: (0, 0), pipeline_mode=pl.Buffered(1))
        for w in weights
    ]

    out_spec = pl.BlockSpec((bt, out_w), lambda i: (i, 0))
    out_shape = jax.ShapeDtypeStruct((B, out_w), jnp.float32)

    # Explicit VMEM budget (matters on v7x: 64 MiB phys / 32 MiB scoped default).
    weight_bytes = sum(int(w.size) * w.dtype.itemsize for w in weights)
    data_bytes = 4 * bt * (exp_dim + ptb_dim + 2 * z_dim)
    out_bytes = 4 * bt * out_w
    vmem_budget = 2 * (weight_bytes + 2 * data_bytes + 2 * out_bytes) + (8 << 20)
    vmem_limit = int(min(vmem_budget, 96 << 20))

    # Advisory cost estimate for the XLA scheduler (block-diag / 2x-M fused dims).
    h1x2 = fused_params["w_enc1"].shape[1]
    h2x2 = fused_params["w_enc2"].shape[1]
    h3pz = fused_params["w_enc3"].shape[1]
    d1 = fused_params["wd1"].shape[1]
    d2 = fused_params["wd2"].shape[1]
    flops = 2 * B * (
        (exp_dim + ptb_dim) * h1x2 + h1x2 * h2x2 + h2x2 * h3pz      # fused encoder
        + (h3pz - z_dim) * 2 * z_dim                                # fused mu/logvar head
        + 2 * z_dim * z_dim                                         # scale matmul (2x M)
        + 2 * (z_dim * d1 + d1 * d2 + d2 * exp_dim)                 # decoder (2x M)
    )
    bytes_accessed = 4 * (
        int(x_sample.size) + int(p.size) + int(p1h_trim.size) + int(eps.size)
        + sum(int(w.size) for w in weights)
        + B * out_w
    )
    cost = pl.CostEstimate(
        flops=int(flops),
        transcendentals=int(B * z_dim),
        bytes_accessed=int(bytes_accessed),
    )

    packed = pl.pallas_call(
        causal_vae_kernel,
        out_shape=out_shape,
        grid_spec=pltpu.PrefetchScalarGridSpec(
            num_scalar_prefetch=0,
            grid=grid,
            in_specs=data_specs + weight_specs,
            out_specs=out_spec,
        ),
        compiler_params=pltpu.CompilerParams(
            dimension_semantics=("parallel",),
            vmem_limit_bytes=vmem_limit,
        ),
        cost_estimate=cost,
    )(x_sample, p, p1h_trim, eps, *weights)

    # Un-pack (cheap slices, fused by XLA).
    y = packed[:, :exp_dim]
    x_pred = packed[:, exp_dim:2 * exp_dim]
    mu = packed[:, 2 * exp_dim:2 * exp_dim + z_dim]
    sigma = packed[:, 2 * exp_dim + z_dim:2 * exp_dim + 2 * z_dim]
    z = packed[:, 2 * exp_dim + 2 * z_dim:2 * exp_dim + 3 * z_dim]

    return {
        "qz": (mu, sigma),
        "pz": (jnp.zeros_like(z), jnp.ones_like(z)),
        "z": z,
        "y": y,
        "X_pred": x_pred,
        "X_gt": x_sample,
    }


def init_params(key, exp_dim, ptb_dim, z_dim, enc_hidden, dec_hidden):
    """Deterministic synthetic parameter init (module __init__ shapes)."""
    keys = jax.random.split(key, 32)
    ki = iter(keys)

    def lin(k, din, dout, scale=0.1):
        kw, kb = jax.random.split(k)
        w = scale * jax.random.normal(kw, (din, dout), dtype=jnp.float32)
        b = scale * jax.random.normal(kb, (1, dout), dtype=jnp.float32)
        return w, b

    p = {}
    # z_encoder: exp_dim -> enc_hidden[0] -> [1] -> [2] -> (mu, logvar) heads
    h1, h2, h3 = enc_hidden
    p["we1"], p["be1"] = lin(next(ki), exp_dim, h1)
    p["we2"], p["be2"] = lin(next(ki), h1, h2)
    p["we3"], p["be3"] = lin(next(ki), h2, h3)
    p["wmu"], p["bmu"] = lin(next(ki), h3, z_dim)
    p["wlv"], p["blv"] = lin(next(ki), h3, z_dim)
    # perturbation encoder: ptb_dim -> enc_hidden[0] -> enc_hidden[1] -> z_dim
    p["wp1"], p["bp1"] = lin(next(ki), ptb_dim, h1)
    p["wp2"], p["bp2"] = lin(next(ki), h1, h2)
    p["wpo"], p["bpo"] = lin(next(ki), h2, z_dim)
    # decoder (Decoder_Gaussian): z_dim -> dec_hidden[0] -> dec_hidden[1] -> exp_dim
    d1, d2 = dec_hidden
    p["wd1"], p["bd1"] = lin(next(ki), z_dim, d1)
    p["wd2"], p["bd2"] = lin(next(ki), d1, d2)
    p["wdo"], p["bdo"] = lin(next(ki), d2, exp_dim)

    # structural params: B ~ N(0, 0.1), s = ones(z_dim), B_mask strict upper-tri.
    Bmat = 0.1 * jax.random.normal(next(ki), (z_dim, z_dim), dtype=jnp.float32)
    mask_bits = (jax.random.uniform(next(ki), (z_dim, z_dim)) < 0.3).astype(jnp.float32)
    B_mask = jnp.triu(mask_bits, k=1)
    s = jnp.ones((z_dim,), dtype=jnp.float32)
    p["s_row"] = s.reshape(1, z_dim)            # used as a VPU row, not a matmul col

    # scale = inv(I - B * B_mask): tiny, parameter-only; done in f64 on host to
    # match the torch.float64 reference as closely as possible, then cast.
    Bm_np = np.asarray(Bmat, dtype=np.float64) * np.asarray(B_mask, dtype=np.float64)
    scale_f64 = np.linalg.inv(np.eye(z_dim, dtype=np.float64) - Bm_np)
    p["scale"] = jnp.asarray(scale_f64, dtype=jnp.float32)
    return p


def reference_forward(x, p_in, p1h, eps, pr):
    """Pure-JAX reference of the (un-fused) forward, for validation."""
    hi = jax.lax.Precision.HIGHEST
    dot = lambda a, b: jnp.dot(a, b, precision=hi)
    relu = lambda v: jnp.maximum(v, 0.0)
    h = relu(dot(x, pr["we1"]) + pr["be1"])
    h = relu(dot(h, pr["we2"]) + pr["be2"])
    h = relu(dot(h, pr["we3"]) + pr["be3"])
    mu = dot(h, pr["wmu"]) + pr["bmu"]
    logvar = dot(h, pr["wlv"]) + pr["blv"]
    sigma = jnp.exp(0.5 * logvar)
    z = mu + sigma * eps
    hp = relu(dot(p_in, pr["wp1"]) + pr["bp1"])
    hp = relu(dot(hp, pr["wp2"]) + pr["bp2"])
    ptb_enc = dot(hp, pr["wpo"]) + pr["bpo"]
    c = jnp.sum(p1h * pr["s_row"], axis=-1, keepdims=True)
    shift = z + c * ptb_enc
    u = dot(shift, pr["scale"])
    u0 = dot(z, pr["scale"])

    def dec(v):
        hd = relu(dot(v, pr["wd1"]) + pr["bd1"])
        hd = relu(dot(hd, pr["wd2"]) + pr["bd2"])
        return dot(hd, pr["wdo"]) + pr["bdo"]

    return {"y": dec(u), "X_pred": dec(u0), "mu": mu, "sigma": sigma, "z": z}


if __name__ == "__main__":
    # Small shapes consistent with the module's forward.
    batch = 256
    exp_dim = 32
    ptb_dim = 16
    z_dim = 8
    enc_hidden = [64, 32, 16]
    dec_hidden = [16, 32]
    n_nontargeting = 100

    root = jax.random.PRNGKey(0)
    k_param, k_xs, k_idx, k_p, k_p1h, k_eps = jax.random.split(root, 6)

    params = init_params(k_param, exp_dim, ptb_dim, z_dim, enc_hidden, dec_hidden)
    fused_params = jax.tree_util.tree_map(jnp.asarray, pack_params(params))

    # Synthetic "non-targeting" log-normalized expression matrix Xs, and the
    # row-sampling that forward() does with np.random.choice.
    Xs = jnp.log1p(jnp.abs(jax.random.normal(k_xs, (n_nontargeting, exp_dim),
                                             dtype=jnp.float32)))
    idx = jax.random.randint(k_idx, (batch,), 0, n_nontargeting)
    X_sample = Xs[idx]                                             # (batch, exp_dim)

    # Inputs: perturbation features p, one-hot p1h (z_dim + 1 columns; last col
    # dropped inside compute_latents), reparameterization noise eps.
    p_in = jax.random.normal(k_p, (batch, ptb_dim), dtype=jnp.float32)
    p1h_full = jax.nn.one_hot(
        jax.random.randint(k_p1h, (batch,), 0, z_dim + 1), z_dim + 1,
        dtype=jnp.float32)
    p1h_trim = p1h_full[:, :-1]                                    # (batch, z_dim)
    eps = jax.random.normal(k_eps, (batch, z_dim), dtype=jnp.float32)

    fwd = jax.jit(lambda x, pp, p1h, e: causal_vae_forward(
        x, pp, p1h, e, fused_params))
    outs = fwd(X_sample, p_in, p1h_trim, eps)
    jax.block_until_ready(outs)

    # Shape / sanity checks.
    assert outs["y"].shape == (batch, exp_dim)
    assert outs["X_pred"].shape == (batch, exp_dim)
    assert outs["qz"][0].shape == (batch, z_dim)
    assert outs["qz"][1].shape == (batch, z_dim)
    assert outs["z"].shape == (batch, z_dim)
    assert bool(jnp.all(jnp.isfinite(outs["y"])))
    assert bool(jnp.all(jnp.isfinite(outs["X_pred"])))
    assert bool(jnp.all(outs["qz"][1] > 0.0))

    # Numerical check vs a pure-JAX reference of the un-fused forward
    # (block-diag / 2x-M fusions are mathematically exact; tolerance covers
    # MXU accumulation-order differences in f32).
    ref = reference_forward(X_sample, p_in, p1h_trim, eps, params)
    checks = {
        "y": outs["y"], "X_pred": outs["X_pred"],
        "mu": outs["qz"][0], "sigma": outs["qz"][1], "z": outs["z"],
    }
    for name, got in checks.items():
        err = float(jnp.max(jnp.abs(got - ref[name])))
        assert err < 5e-3, f"{name} mismatch vs reference: max abs err {err}"

    print("KERNEL_OK")
</pallas_src>

<mosaic_0001>
module attributes {stable_mosaic.version = 11 : i64} {
  func.func @causal_vae_kernel(%arg0: i32, %arg1: memref<256x32xf32, #tpu.memory_space<vmem>>, %arg2: memref<256x16xf32, #tpu.memory_space<vmem>>, %arg3: memref<256x8xf32, #tpu.memory_space<vmem>>, %arg4: memref<256x8xf32, #tpu.memory_space<vmem>>, %arg5: memref<48x128xf32, #tpu.memory_space<vmem>>, %arg6: memref<1x128xf32, #tpu.memory_space<vmem>>, %arg7: memref<128x64xf32, #tpu.memory_space<vmem>>, %arg8: memref<1x64xf32, #tpu.memory_space<vmem>>, %arg9: memref<64x24xf32, #tpu.memory_space<vmem>>, %arg10: memref<1x24xf32, #tpu.memory_space<vmem>>, %arg11: memref<16x16xf32, #tpu.memory_space<vmem>>, %arg12: memref<1x16xf32, #tpu.memory_space<vmem>>, %arg13: memref<1x8xf32, #tpu.memory_space<vmem>>, %arg14: memref<8x8xf32, #tpu.memory_space<vmem>>, %arg15: memref<8x16xf32, #tpu.memory_space<vmem>>, %arg16: memref<1x16xf32, #tpu.memory_space<vmem>>, %arg17: memref<16x32xf32, #tpu.memory_space<vmem>>, %arg18: memref<1x32xf32, #tpu.memory_space<vmem>>, %arg19: memref<32x32xf32, #tpu.memory_space<vmem>>, %arg20: memref<1x32xf32, #tpu.memory_space<vmem>>, %arg21: memref<256x128xf32, #tpu.memory_space<vmem>>) attributes {dimension_semantics = [#tpu.dimension_semantics<parallel>], iteration_bounds = array<i64: 1>, scalar_prefetch = 0 : i64, scratch_operands = 0 : i64, tpu.core_type = #tpu.core_type<tc>, window_params = [{transform_indices = @transform_0, window_bounds = array<i64: 256, 32>}, {transform_indices = @transform_1, window_bounds = array<i64: 256, 16>}, {transform_indices = @transform_2, window_bounds = array<i64: 256, 8>}, {transform_indices = @transform_3, window_bounds = array<i64: 256, 8>}, {pipeline_mode = #tpu.pipeline_mode<synchronous>, transform_indices = @transform_4, window_bounds = array<i64: 48, 128>}, {pipeline_mode = #tpu.pipeline_mode<synchronous>, transform_indices = @transform_5, window_bounds = array<i64: 1, 128>}, {pipeline_mode = #tpu.pipeline_mode<synchronous>, transform_indices = @transform_6, window_bounds = array<i64: 128, 64>}, {pipeline_mode = #tpu.pipeline_mode<synchronous>, transform_indices = @transform_7, window_bounds = array<i64: 1, 64>}, {pipeline_mode = #tpu.pipeline_mode<synchronous>, transform_indices = @transform_8, window_bounds = array<i64: 64, 24>}, {pipeline_mode = #tpu.pipeline_mode<synchronous>, transform_indices = @transform_9, window_bounds = array<i64: 1, 24>}, {pipeline_mode = #tpu.pipeline_mode<synchronous>, transform_indices = @transform_10, window_bounds = array<i64: 16, 16>}, {pipeline_mode = #tpu.pipeline_mode<synchronous>, transform_indices = @transform_11, window_bounds = array<i64: 1, 16>}, {pipeline_mode = #tpu.pipeline_mode<synchronous>, transform_indices = @transform_12, window_bounds = array<i64: 1, 8>}, {pipeline_mode = #tpu.pipeline_mode<synchronous>, transform_indices = @transform_13, window_bounds = array<i64: 8, 8>}, {pipeline_mode = #tpu.pipeline_mode<synchronous>, transform_indices = @transform_14, window_bounds = array<i64: 8, 16>}, {pipeline_mode = #tpu.pipeline_mode<synchronous>, transform_indices = @transform_15, window_bounds = array<i64: 1, 16>}, {pipeline_mode = #tpu.pipeline_mode<synchronous>, transform_indices = @transform_16, window_bounds = array<i64: 16, 32>}, {pipeline_mode = #tpu.pipeline_mode<synchronous>, transform_indices = @transform_17, window_bounds = array<i64: 1, 32>}, {pipeline_mode = #tpu.pipeline_mode<synchronous>, transform_indices = @transform_18, window_bounds = array<i64: 32, 32>}, {pipeline_mode = #tpu.pipeline_mode<synchronous>, transform_indices = @transform_19, window_bounds = array<i64: 1, 32>}, {transform_indices = @transform_20, window_bounds = array<i64: 256, 128>}]} {
    %c0 = arith.constant 0 : index
    %c0_0 = arith.constant 0 : index
    %0 = vector.load %arg1[%c0, %c0_0] : memref<256x32xf32, #tpu.memory_space<vmem>>, vector<256x32xf32>
    %c0_1 = arith.constant 0 : index
    %c0_2 = arith.constant 0 : index
    %1 = vector.load %arg2[%c0_1, %c0_2] : memref<256x16xf32, #tpu.memory_space<vmem>>, vector<256x16xf32>
    %2 = tpu.concatenate %0, %1 in 1 : vector<256x32xf32>, vector<256x16xf32> -> vector<256x48xf32>
    %c0_3 = arith.constant 0 : index
    %c0_4 = arith.constant 0 : index
    %3 = vector.load %arg5[%c0_3, %c0_4] : memref<48x128xf32, #tpu.memory_space<vmem>>, vector<48x128xf32>
    %cst = arith.constant dense<0.000000e+00> : vector<256x128xf32>
    %4 = tpu.matmul %2, %3, %cst {dimension_numbers = #tpu.dot_dimension_numbers<[1], [0], [0], [1], [0, 0, 1, 1], [], []>} : vector<256x48xf32>, vector<48x128xf32>, vector<256x128xf32> -> vector<256x128xf32>
    %c0_5 = arith.constant 0 : index
    %c0_6 = arith.constant 0 : index
    %5 = vector.load %arg6[%c0_5, %c0_6] : memref<1x128xf32, #tpu.memory_space<vmem>>, vector<1x128xf32>
    %6 = vector.broadcast %5 : vector<1x128xf32> to vector<256x128xf32>
    %7 = arith.addf %4, %6 : vector<256x128xf32>
    %cst_7 = arith.constant 0.000000e+00 : f32
    %8 = vector.broadcast %cst_7 : f32 to vector<256x128xf32>
    %9 = arith.maximumf %7, %8 : vector<256x128xf32>
    %c0_8 = arith.constant 0 : index
    %c0_9 = arith.constant 0 : index
    %10 = vector.load %arg7[%c0_8, %c0_9] : memref<128x64xf32, #tpu.memory_space<vmem>>, vector<128x64xf32>
    %cst_10 = arith.constant dense<0.000000e+00> : vector<256x64xf32>
    %11 = tpu.matmul %9, %10, %cst_10 {dimension_numbers = #tpu.dot_dimension_numbers<[1], [0], [0], [1], [0, 0, 1, 1], [], []>} : vector<256x128xf32>, vector<128x64xf32>, vector<256x64xf32> -> vector<256x64xf32>
    %c0_11 = arith.constant 0 : index
    %c0_12 = arith.constant 0 : index
    %12 = vector.load %arg8[%c0_11, %c0_12] : memref<1x64xf32, #tpu.memory_space<vmem>>, vector<1x64xf32>
    %13 = vector.broadcast %12 : vector<1x64xf32> to vector<256x64xf32>
    %14 = arith.addf %11, %13 : vector<256x64xf32>
    %cst_13 = arith.constant 0.000000e+00 : f32
    %15 = vector.broadcast %cst_13 : f32 to vector<256x64xf32>
    %16 = arith.maximumf %14, %15 : vector<256x64xf32>
    %c0_14 = arith.constant 0 : index
    %c0_15 = arith.constant 0 : index
    %17 = vector.load %arg9[%c0_14, %c0_15] : memref<64x24xf32, #tpu.memory_space<vmem>>, vector<64x24xf32>
    %cst_16 = arith.constant dense<0.000000e+00> : vector<256x24xf32>
    %18 = tpu.matmul %16, %17, %cst_16 {dimension_numbers = #tpu.dot_dimension_numbers<[1], [0], [0], [1], [0, 0, 1, 1], [], []>} : vector<256x64xf32>, vector<64x24xf32>, vector<256x24xf32> -> vector<256x24xf32>
    %c0_17 = arith.constant 0 : index
    %c0_18 = arith.constant 0 : index
    %19 = vector.load %arg10[%c0_17, %c0_18] : memref<1x24xf32, #tpu.memory_space<vmem>>, vector<1x24xf32>
    %20 = vector.broadcast %19 : vector<1x24xf32> to vector<256x24xf32>
    %21 = arith.addf %18, %20 : vector<256x24xf32>
    %22 = vector.extract_strided_slice %21 {offsets = [0, 0], sizes = [256, 16], strides = [1, 1]} : vector<256x24xf32> to vector<256x16xf32>
    %cst_19 = arith.constant 0.000000e+00 : f32
    %23 = vector.broadcast %cst_19 : f32 to vector<256x16xf32>
    %24 = arith.maximumf %22, %23 : vector<256x16xf32>
    %25 = vector.extract_strided_slice %21 {offsets = [0, 16], sizes = [256, 8], strides = [1, 1]} : vector<256x24xf32> to vector<256x8xf32>
    %c0_20 = arith.constant 0 : index
    %c0_21 = arith.constant 0 : index
    %26 = vector.load %arg11[%c0_20, %c0_21] : memref<16x16xf32, #tpu.memory_space<vmem>>, vector<16x16xf32>
    %cst_22 = arith.constant dense<0.000000e+00> : vector<256x16xf32>
    %27 = tpu.matmul %24, %26, %cst_22 {dimension_numbers = #tpu.dot_dimension_numbers<[1], [0], [0], [1], [0, 0, 1, 1], [], []>} : vector<256x16xf32>, vector<16x16xf32>, vector<256x16xf32> -> vector<256x16xf32>
    %c0_23 = arith.constant 0 : index
    %c0_24 = arith.constant 0 : index
    %28 = vector.load %arg12[%c0_23, %c0_24] : memref<1x16xf32, #tpu.memory_space<vmem>>, vector<1x16xf32>
    %29 = vector.broadcast %28 : vector<1x16xf32> to vector<256x16xf32>
    %30 = arith.addf %27, %29 : vector<256x16xf32>
    %31 = vector.extract_strided_slice %30 {offsets = [0, 0], sizes = [256, 8], strides = [1, 1]} : vector<256x16xf32> to vector<256x8xf32>
    %32 = vector.extract_strided_slice %30 {offsets = [0, 8], sizes = [256, 8], strides = [1, 1]} : vector<256x16xf32> to vector<256x8xf32>
    %cst_25 = arith.constant 5.000000e-01 : f32
    %33 = vector.broadcast %cst_25 : f32 to vector<256x8xf32>
    %34 = arith.mulf %33, %32 : vector<256x8xf32>
    %35 = math.exp %34 : vector<256x8xf32>
    %c0_26 = arith.constant 0 : index
    %c0_27 = arith.constant 0 : index
    %36 = vector.load %arg4[%c0_26, %c0_27] : memref<256x8xf32, #tpu.memory_space<vmem>>, vector<256x8xf32>
    %37 = arith.mulf %35, %36 : vector<256x8xf32>
    %38 = arith.addf %31, %37 : vector<256x8xf32>
    %c0_28 = arith.constant 0 : index
    %c0_29 = arith.constant 0 : index
    %39 = vector.load %arg3[%c0_28, %c0_29] : memref<256x8xf32, #tpu.memory_space<vmem>>, vector<256x8xf32>
    %c0_30 = arith.constant 0 : index
    %c0_31 = arith.constant 0 : index
    %40 = vector.load %arg13[%c0_30, %c0_31] : memref<1x8xf32, #tpu.memory_space<vmem>>, vector<1x8xf32>
    %41 = vector.broadcast %40 : vector<1x8xf32> to vector<256x8xf32>
    %42 = arith.mulf %39, %41 : vector<256x8xf32>
    %cst_32 = arith.constant dense<0.000000e+00> : vector<256xf32>
    %43 = vector.multi_reduction <add>, %42, %cst_32 [1] : vector<256x8xf32> to vector<256xf32>
    %44 = vector.shape_cast %43 : vector<256xf32> to vector<256x1xf32>
    %45 = vector.broadcast %44 : vector<256x1xf32> to vector<256x8xf32>
    %46 = arith.mulf %45, %25 : vector<256x8xf32>
    %47 = arith.addf %38, %46 : vector<256x8xf32>
    %48 = tpu.concatenate %47, %38 in 0 : vector<256x8xf32>, vector<256x8xf32> -> vector<512x8xf32>
    %c0_33 = arith.constant 0 : index
    %c0_34 = arith.constant 0 : index
    %49 = vector.load %arg14[%c0_33, %c0_34] : memref<8x8xf32, #tpu.memory_space<vmem>>, vector<8x8xf32>
    %cst_35 = arith.constant dense<0.000000e+00> : vector<512x8xf32>
    %50 = tpu.matmul %48, %49, %cst_35 {dimension_numbers = #tpu.dot_dimension_numbers<[1], [0], [0], [1], [0, 0, 1, 1], [], []>} : vector<512x8xf32>, vector<8x8xf32>, vector<512x8xf32> -> vector<512x8xf32>
    %c0_36 = arith.constant 0 : index
    %c0_37 = arith.constant 0 : index
    %51 = vector.load %arg15[%c0_36, %c0_37] : memref<8x16xf32, #tpu.memory_space<vmem>>, vector<8x16xf32>
    %cst_38 = arith.constant dense<0.000000e+00> : vector<512x16xf32>
    %52 = tpu.matmul %50, %51, %cst_38 {dimension_numbers = #tpu.dot_dimension_numbers<[1], [0], [0], [1], [0, 0, 1, 1], [], []>} : vector<512x8xf32>, vector<8x16xf32>, vector<512x16xf32> -> vector<512x16xf32>
    %c0_39 = arith.constant 0 : index
    %c0_40 = arith.constant 0 : index
    %53 = vector.load %arg16[%c0_39, %c0_40] : memref<1x16xf32, #tpu.memory_space<vmem>>, vector<1x16xf32>
    %54 = vector.broadcast %53 : vector<1x16xf32> to vector<512x16xf32>
    %55 = arith.addf %52, %54 : vector<512x16xf32>
    %cst_41 = arith.constant 0.000000e+00 : f32
    %56 = vector.broadcast %cst_41 : f32 to vector<512x16xf32>
    %57 = arith.maximumf %55, %56 : vector<512x16xf32>
    %c0_42 = arith.constant 0 : index
    %c0_43 = arith.constant 0 : index
    %58 = vector.load %arg17[%c0_42, %c0_43] : memref<16x32xf32, #tpu.memory_space<vmem>>, vector<16x32xf32>
    %cst_44 = arith.constant dense<0.000000e+00> : vector<512x32xf32>
    %59 = tpu.matmul %57, %58, %cst_44 {dimension_numbers = #tpu.dot_dimension_numbers<[1], [0], [0], [1], [0, 0, 1, 1], [], []>} : vector<512x16xf32>, vector<16x32xf32>, vector<512x32xf32> -> vector<512x32xf32>
    %c0_45 = arith.constant 0 : index
    %c0_46 = arith.constant 0 : index
    %60 = vector.load %arg18[%c0_45, %c0_46] : memref<1x32xf32, #tpu.memory_space<vmem>>, vector<1x32xf32>
    %61 = vector.broadcast %60 : vector<1x32xf32> to vector<512x32xf32>
    %62 = arith.addf %59, %61 : vector<512x32xf32>
    %cst_47 = arith.constant 0.000000e+00 : f32
    %63 = vector.broadcast %cst_47 : f32 to vector<512x32xf32>
    %64 = arith.maximumf %62, %63 : vector<512x32xf32>
    %c0_48 = arith.constant 0 : index
    %c0_49 = arith.constant 0 : index
    %65 = vector.load %arg19[%c0_48, %c0_49] : memref<32x32xf32, #tpu.memory_space<vmem>>, vector<32x32xf32>
    %cst_50 = arith.constant dense<0.000000e+00> : vector<512x32xf32>
    %66 = tpu.matmul %64, %65, %cst_50 {dimension_numbers = #tpu.dot_dimension_numbers<[1], [0], [0], [1], [0, 0, 1, 1], [], []>} : vector<512x32xf32>, vector<32x32xf32>, vector<512x32xf32> -> vector<512x32xf32>
    %c0_51 = arith.constant 0 : index
    %c0_52 = arith.constant 0 : index
    %67 = vector.load %arg20[%c0_51, %c0_52] : memref<1x32xf32, #tpu.memory_space<vmem>>, vector<1x32xf32>
    %68 = vector.broadcast %67 : vector<1x32xf32> to vector<512x32xf32>
    %69 = arith.addf %66, %68 : vector<512x32xf32>
    %70 = vector.extract_strided_slice %69 {offsets = [0, 0], sizes = [256, 32], strides = [1, 1]} : vector<512x32xf32> to vector<256x32xf32>
    %71 = vector.extract_strided_slice %69 {offsets = [256, 0], sizes = [256, 32], strides = [1, 1]} : vector<512x32xf32> to vector<256x32xf32>
    %cst_53 = arith.constant 0.000000e+00 : f32
    %72 = vector.broadcast %cst_53 : f32 to vector<256x40xf32>
    %73 = tpu.concatenate %70, %71, %31, %35, %38, %72 in 1 : vector<256x32xf32>, vector<256x32xf32>, vector<256x8xf32>, vector<256x8xf32>, vector<256x8xf32>, vector<256x40xf32> -> vector<256x128xf32>
    %c0_54 = arith.constant 0 : index
    %c0_55 = arith.constant 0 : index
    %74 = vector.load %arg21[%c0_54, %c0_55] : memref<256x128xf32, #tpu.memory_space<vmem>>, vector<256x128xf32>
    tpu.vector_store %arg21[%c0_54, %c0_55], %73 {strides = array<i32>} : memref<256x128xf32, #tpu.memory_space<vmem>>, vector<256x128xf32>,
    return
  }
  func.func @transform_0(%arg0: i32) -> (i32, i32) {
    %c0_i32 = arith.constant 0 : i32
    %c0_i32_0 = arith.constant 0 : i32
    return %arg0, %c0_i32 : i32, i32
  }
  func.func @transform_1(%arg0: i32) -> (i32, i32) {
    %c0_i32 = arith.constant 0 : i32
    %c0_i32_0 = arith.constant 0 : i32
    return %arg0, %c0_i32 : i32, i32
  }
  func.func @transform_2(%arg0: i32) -> (i32, i32) {
    %c0_i32 = arith.constant 0 : i32
    %c0_i32_0 = arith.constant 0 : i32
    return %arg0, %c0_i32 : i32, i32
  }
  func.func @transform_3(%arg0: i32) -> (i32, i32) {
    %c0_i32 = arith.constant 0 : i32
    %c0_i32_0 = arith.constant 0 : i32
    return %arg0, %c0_i32 : i32, i32
  }
  func.func @transform_4(%arg0: i32) -> (i32, i32) {
    %c0_i32 = arith.constant 0 : i32
    %c0_i32_0 = arith.constant 0 : i32
    %c0_i32_1 = arith.constant 0 : i32
    return %c0_i32, %c0_i32_0 : i32, i32
  }
  func.func @transform_5(%arg0: i32) -> (i32, i32) {
    %c0_i32 = arith.constant 0 : i32
    %c0_i32_0 = arith.constant 0 : i32
    %c0_i32_1 = arith.constant 0 : i32
    return %c0_i32, %c0_i32_0 : i32, i32
  }
  func.func @transform_6(%arg0: i32) -> (i32, i32) {
    %c0_i32 = arith.constant 0 : i32
    %c0_i32_0 = arith.constant 0 : i32
    %c0_i32_1 = arith.constant 0 : i32
    return %c0_i32, %c0_i32_0 : i32, i32
  }
  func.func @transform_7(%arg0: i32) -> (i32, i32) {
    %c0_i32 = arith.constant 0 : i32
    %c0_i32_0 = arith.constant 0 : i32
    %c0_i32_1 = arith.constant 0 : i32
    return %c0_i32, %c0_i32_0 : i32, i32
  }
  func.func @transform_8(%arg0: i32) -> (i32, i32) {
    %c0_i32 = arith.constant 0 : i32
    %c0_i32_0 = arith.constant 0 : i32
    %c0_i32_1 = arith.constant 0 : i32
    return %c0_i32, %c0_i32_0 : i32, i32
  }
  func.func @transform_9(%arg0: i32) -> (i32, i32) {
    %c0_i32 = arith.constant 0 : i32
    %c0_i32_0 = arith.constant 0 : i32
    %c0_i32_1 = arith.constant 0 : i32
    return %c0_i32, %c0_i32_0 : i32, i32
  }
  func.func @transform_10(%arg0: i32) -> (i32, i32) {
    %c0_i32 = arith.constant 0 : i32
    %c0_i32_0 = arith.constant 0 : i32
    %c0_i32_1 = arith.constant 0 : i32
    return %c0_i32, %c0_i32_0 : i32, i32
  }
  func.func @transform_11(%arg0: i32) -> (i32, i32) {
    %c0_i32 = arith.constant 0 : i32
    %c0_i32_0 = arith.constant 0 : i32
    %c0_i32_1 = arith.constant 0 : i32
    return %c0_i32, %c0_i32_0 : i32, i32
  }
  func.func @transform_12(%arg0: i32) -> (i32, i32) {
    %c0_i32 = arith.constant 0 : i32
    %c0_i32_0 = arith.constant 0 : i32
    %c0_i32_1 = arith.constant 0 : i32
    return %c0_i32, %c0_i32_0 : i32, i32
  }
  func.func @transform_13(%arg0: i32) -> (i32, i32) {
    %c0_i32 = arith.constant 0 : i32
    %c0_i32_0 = arith.constant 0 : i32
    %c0_i32_1 = arith.constant 0 : i32
    return %c0_i32, %c0_i32_0 : i32, i32
  }
  func.func @transform_14(%arg0: i32) -> (i32, i32) {
    %c0_i32 = arith.constant 0 : i32
    %c0_i32_0 = arith.constant 0 : i32
    %c0_i32_1 = arith.constant 0 : i32
    return %c0_i32, %c0_i32_0 : i32, i32
  }
  func.func @transform_15(%arg0: i32) -> (i32, i32) {
    %c0_i32 = arith.constant 0 : i32
    %c0_i32_0 = arith.constant 0 : i32
    %c0_i32_1 = arith.constant 0 : i32
    return %c0_i32, %c0_i32_0 : i32, i32
  }
  func.func @transform_16(%arg0: i32) -> (i32, i32) {
    %c0_i32 = arith.constant 0 : i32
    %c0_i32_0 = arith.constant 0 : i32
    %c0_i32_1 = arith.constant 0 : i32
    return %c0_i32, %c0_i32_0 : i32, i32
  }
  func.func @transform_17(%arg0: i32) -> (i32, i32) {
    %c0_i32 = arith.constant 0 : i32
    %c0_i32_0 = arith.constant 0 : i32
    %c0_i32_1 = arith.constant 0 : i32
    return %c0_i32, %c0_i32_0 : i32, i32
  }
  func.func @transform_18(%arg0: i32) -> (i32, i32) {
    %c0_i32 = arith.constant 0 : i32
    %c0_i32_0 = arith.constant 0 : i32
    %c0_i32_1 = arith.constant 0 : i32
    return %c0_i32, %c0_i32_0 : i32, i32
  }
  func.func @transform_19(%arg0: i32) -> (i32, i32) {
    %c0_i32 = arith.constant 0 : i32
    %c0_i32_0 = arith.constant 0 : i32
    %c0_i32_1 = arith.constant 0 : i32
    return %c0_i32, %c0_i32_0 : i32, i32
  }
  func.func @transform_20(%arg0: i32) -> (i32, i32) {
    %c0_i32 = arith.constant 0 : i32
    %c0_i32_0 = arith.constant 0 : i32
    return %arg0, %c0_i32 : i32, i32
  }
}

</mosaic_0001>

<bundles_post_ra>
// kernel: _lambda_.1
= control target key start
LH: loop header
LB: loop body
LE: loop exit
PB: predicated region body
PF: predicated region fallthrough
CT: control target
= control target key end

     0   :  { %s7104_s25 = smov 32   ;;  %vm2156_vm0 = vcmask 64512   ;;  %vm257_vm1 = vcmask 261120   ;;  %vm303_vm2 = vcmask 392192   ;;  %s7105_s21 = smov 8   ;;  %vm952_vm3 = vcmask 523264   ;;  %s10220_s1 = inlined_call_operand.vmem [shape: f32[256,16], index: 1, kind: input, shape index: {}]   ;;  %s10221_s4 = inlined_call_operand.vmem [shape: f32[48,128], index: 4, kind: input, shape index: {}]   ;;  %s10222_s2 = inlined_call_operand.vmem [shape: f32[256,8], index: 2, kind: input, shape index: {}]   ;;  %s10223_s12 = inlined_call_operand.vmem [shape: f32[1,8], index: 12, kind: input, shape index: {}]   ;;  %s10224_s0 = inlined_call_operand.vmem [shape: f32[256,32], index: 0, kind: input, shape index: {}]   ;;  %s10225_s3 = inlined_call_operand.vmem [shape: f32[256,8], index: 3, kind: input, shape index: {}]   ;;  %s10226_s6 = inlined_call_operand.vmem [shape: f32[128,64], index: 6, kind: input, shape index: {}]   ;;  %s10227_s5 = inlined_call_operand.vmem [shape: f32[1,128], index: 5, kind: input, shape index: {}]   ;;  %s10228_s8 = inlined_call_operand.vmem [shape: f32[64,24], index: 8, kind: input, shape index: {}]   ;;  %s10229_s7 = inlined_call_operand.vmem [shape: f32[1,64], index: 7, kind: input, shape index: {}]   ;;  %s10230_s10 = inlined_call_operand.vmem [shape: f32[16,16], index: 10, kind: input, shape index: {}]   ;;  %s10231_s9 = inlined_call_operand.vmem [shape: f32[1,24], index: 9, kind: input, shape index: {}]   ;;  %s10232_s11 = inlined_call_operand.vmem [shape: f32[1,16], index: 11, kind: input, shape index: {}]   ;;  %s10233_s13 = inlined_call_operand.vmem [shape: f32[8,8], index: 13, kind: input, shape index: {}]   ;;  %s10234_s14 = inlined_call_operand.vmem [shape: f32[8,16], index: 14, kind: input, shape index: {}]   ;;  %s10235_s16 = inlined_call_operand.vmem [shape: f32[16,32], index: 16, kind: input, shape index: {}]   ;;  %s10236_s18 = inlined_call_operand.vmem [shape: f32[32,32], index: 18, kind: input, shape index: {}]   ;;  %s10237_s15 = inlined_call_operand.vmem [shape: f32[1,16], index: 15, kind: input, shape index: {}]   ;;  %s10238_s17 = inlined_call_operand.vmem [shape: f32[1,32], index: 17, kind: input, shape index: {}]   ;;  %s10239_s19 = inlined_call_operand.vmem [shape: f32[1,32], index: 19, kind: input, shape index: {}]   ;;  %s10240_s20 = inlined_call_operand.vmem [shape: f32[256,128], index: 20, kind: output, shape index: {}]  }
   0x1   :  { %10280 = sst [smem:[#allocation74_spill]] %s10220_s1  ;;  %v1733_v59 = vld [vmem:[%s10225_s3] sm:$0xff]  ;;  %vm1315_vm4 = vcmask 130048   ;;  %vm5454_vm5 = vcmask 588800   ;;  %vm5487_vm6 = vcmask 654336   ;;  %vm5520_vm7 = vcmask 719872  }
   0x2   :  { %10281 = sst [smem:[#allocation75_spill]] %s10221_s4 }
   0x3   :  { %10282 = sst [smem:[#allocation76_spill]] %s10222_s2 }
   0x4   :  { %10283 = sst [smem:[#allocation77_spill]] %s10223_s12 }
   0x5   :  { %10284 = sst [smem:[#allocation78_spill]] %s10224_s0 }
   0x6   :  { %s10285_s23 = sld [smem:[#allocation74_spill]] }
   0x7   :  { %s10286_s29 = sld [smem:[#allocation75_spill]] }
   0x8   :  { %s10287_s24 = sld [smem:[#allocation76_spill]] }
   0x9   :  { %s10288_s26 = sld [smem:[#allocation77_spill]] }
   0xa   :  { %s10289_s27 = sld [smem:[#allocation78_spill]] }
   0xc   :  { %v99_v0 = vld [vmem:[%s10285_s23 + $0x10] sm:$0xff]  ;;  %v97_v1 = vld [vmem:[%s10285_s23] sm:$0xff]  ;;  %v100_v2 = vld [vmem:[%s10285_s23 + $0x18] sm:$0xff] }
   0xd   :  { %165 = vrot.lane.b32.xlu1 %v99_v0, %s7104_s25  ;;  %161 = vrot.lane.b32.xlu0 %v97_v1, %s7104_s25  ;;  %v98_v3 = vld [vmem:[%s10285_s23 + $0x8] sm:$0xff]  ;;  %v101_v5 = vld [vmem:[%s10285_s23 + $0x20] sm:$0xff] }
   0xe   :  { %v102_v4 = vld [vmem:[%s10285_s23 + $0x28] sm:$0xff]  ;;  %v104_v6 = vld [vmem:[%s10285_s23 + $0x38] sm:$0xff]  ;;  %v103_v7 = vld [vmem:[%s10285_s23 + $0x30] sm:$0xff] }
   0xf   :  { %v106_v8 = vld [vmem:[%s10285_s23 + $0x48] sm:$0xff]  ;;  %v105_v9 = vld [vmem:[%s10285_s23 + $0x40] sm:$0xff]  ;;  %v293_v12 = vld [vmem:[%s10286_s29 + $0x18] sm:$0xff] }
  0x10   :  { %v295_v10 = vld [vmem:[%s10286_s29 + $0x28] sm:$0xff]  ;;  %v294_v11 = vld [vmem:[%s10286_s29 + $0x20] sm:$0xff]  ;;  %v108_v13 = vld [vmem:[%s10285_s23 + $0x58] sm:$0xff] }
  0x11   :  { %167 = vrot.lane.b32.xlu1 %v100_v2, %s7104_s25  ;;  %163 = vrot.lane.b32.xlu0 %v98_v3, %s7104_s25  ;;  %v107_v14 = vld [vmem:[%s10285_s23 + $0x50] sm:$0xff]  ;;  %v110_v16 = vld [vmem:[%s10285_s23 + $0x68] sm:$0xff] }
  0x12   :  { %6373 = vmatprep.subr.mxu0 %v295_v10  ;;  %v292_v15 = vld [vmem:[%s10286_s29 + $0x10] sm:$0xff]  ;;  %v109_v17 = vld [vmem:[%s10285_s23 + $0x60] sm:$0xff]  ;;  %v291_v18 = vld [vmem:[%s10286_s29 + $0x8] sm:$0xff] }
  0x13   :  { %6374 = vmatpush3.msra.mxu0 %v295_v10  ;;  %v290_v19 = vld [vmem:[%s10286_s29] sm:$0xff]  ;;  %v112_v20 = vld [vmem:[%s10285_s23 + $0x78] sm:$0xff]  ;;  %v111_v21 = vld [vmem:[%s10285_s23 + $0x70] sm:$0xff] }
  0x14   :  { %6375 = vmatprep.subr.mxu0 %v294_v11  ;;  %v114_v22 = vld [vmem:[%s10285_s23 + $0x88] sm:$0xff]  ;;  %v113_v23 = vld [vmem:[%s10285_s23 + $0x80] sm:$0xff]  ;;  %v116_v24 = vld [vmem:[%s10285_s23 + $0x98] sm:$0xff] }
  0x15   :  { %171 = vrot.lane.b32.xlu1 %v102_v4, %s7104_s25  ;;  %169 = vrot.lane.b32.xlu0 %v101_v5, %s7104_s25  ;;  %v115_v25 = vld [vmem:[%s10285_s23 + $0x90] sm:$0xff]  ;;  %v118_v26 = vld [vmem:[%s10285_s23 + $0xa8] sm:$0xff] }
  0x16   :  { %6376 = vmatpush3.msra.mxu0 %v294_v11  ;;  %v117_v27 = vld [vmem:[%s10285_s23 + $0xa0] sm:$0xff]  ;;  %v120_v28 = vld [vmem:[%s10285_s23 + $0xb8] sm:$0xff]  ;;  %v119_v29 = vld [vmem:[%s10285_s23 + $0xb0] sm:$0xff] }
  0x17   :  { %6377 = vmatprep.subr.mxu0 %v293_v12  ;;  %v122_v30 = vld [vmem:[%s10285_s23 + $0xc8] sm:$0xff]  ;;  %v121_v31 = vld [vmem:[%s10285_s23 + $0xc0] sm:$0xff]  ;;  %v124_v32 = vld [vmem:[%s10285_s23 + $0xd8] sm:$0xff] }
  0x18   :  { %6378 = vmatpush3.msra.mxu0 %v293_v12  ;;  %v123_v33 = vld [vmem:[%s10285_s23 + $0xd0] sm:$0xff]  ;;  %v126_v34 = vld [vmem:[%s10285_s23 + $0xe8] sm:$0xff]  ;;  %v125_v35 = vld [vmem:[%s10285_s23 + $0xe0] sm:$0xff] }
  0x19   :  { %175 = vrot.lane.b32.xlu1 %v104_v6, %s7104_s25  ;;  %173 = vrot.lane.b32.xlu0 %v103_v7, %s7104_s25  ;;  %v128_v36 = vld [vmem:[%s10285_s23 + $0xf8] sm:$0xff]  ;;  %v127_v37 = vld [vmem:[%s10285_s23 + $0xf0] sm:$0xff]  ;;  %s7106_s23 = smov 112  }
  0x1a   :  { %6379 = vmatprep.subr.mxu0 %v292_v15  ;;  %v2085_v38 = vld [vmem:[%s10287_s24] sm:$0xff]  ;;  %v2087_v41 = vld [vmem:[%s10287_s24 + $0x10] sm:$0xff]  ;;  %v2086_v42 = vld [vmem:[%s10287_s24 + $0x8] sm:$0xff] }
  0x1b   :  { %6380 = vmatpush3.msra.mxu0 %v292_v15  ;;  %v7367_v39 = vld [vmem:[%s10288_s26] ss:$0 sm:$0xff]  ;;  %v2088_v46 = vld [vmem:[%s10287_s24 + $0x18] sm:$0xff]  ;;  %v2090_v52 = vld [vmem:[%s10287_s24 + $0x28] sm:$0xff] }
  0x1c   :  { %6381 = vmatprep.subr.mxu0 %v291_v18  ;;  %v2124_v40 = vmul.f32 %v7367_v39, %v2085_v38  ;;  %v2126_v44 = vmul.f32 %v7367_v39, %v2087_v41  ;;  %v2125_v45 = vmul.f32 %v7367_v39, %v2086_v42  ;;  %v2089_v47 = vld [vmem:[%s10287_s24 + $0x20] sm:$0xff]  ;;  %v2127_v49 = vmul.f32 %v7367_v39, %v2088_v46  ;;  %v67_v62 = vld [vmem:[%s10289_s27 + $0x10] sm:$0xff]  ;;  %v66_v63 = vld [vmem:[%s10289_s27 + $0x8] sm:$0xff] }
  0x1d   :  { %179 = vrot.lane.b32.xlu1 %v106_v8, %s7104_s25  ;;  %177 = vrot.lane.b32.xlu0 %v105_v9, %s7104_s25  ;;  %v2128_v51 = vmul.f32 %v7367_v39, %v2089_v47  ;;  %v2129_v54 = vmul.f32 %v7367_v39, %v2090_v52  ;;  %v65_v57 = vld [vmem:[%s10289_s27] sm:$0xff]  ;;  %v68_v3 = vld [vmem:[%s10289_s27 + $0x18] sm:$0xff] }
  0x1e   :  { %6382 = vmatpush3.msra.mxu0 %v291_v18  ;;  %v2157_v43 = vsel %vm2156_vm0, %v2124_v40, 0.0  ;;  %v2163_v48 = vsel %vm2156_vm0, %v2126_v44, 0.0  ;;  %v2160_v50 = vsel %vm2156_vm0, %v2125_v45, 0.0  ;;  %v2166_v53 = vsel %vm2156_vm0, %v2127_v49, 0.0  ;;  %v69_v5 = vld [vmem:[%s10289_s27 + $0x20] sm:$0xff]  ;;  %v1734_v7 = vld [vmem:[%s10225_s3 + $0x8] sm:$0xff] }
  0x1f   :  { %6383 = vmatprep.subr.mxu0 %v290_v19  ;;  %v2169_v55 = vsel %vm2156_vm0, %v2128_v51, 0.0  ;;  %v2172_v56 = vsel %vm2156_vm0, %v2129_v54, 0.0  ;;  %v70_v10 = vld [vmem:[%s10289_s27 + $0x28] sm:$0xff]  ;;  %v71_v12 = vld [vmem:[%s10289_s27 + $0x30] sm:$0xff]  ;;  %v73_v18 = vld [vmem:[%s10289_s27 + $0x40] sm:$0xff] }
  0x20   :  { %6384 = vmatpush3.msra.mxu0 %v290_v19  ;;  %v80_v41 = vld [vmem:[%s10289_s27 + $0x78] sm:$0xff]  ;;  %v81_v44 = vld [vmem:[%s10289_s27 + $0x80] sm:$0xff]  ;;  %v83_v52 = vld [vmem:[%s10289_s27 + $0x90] sm:$0xff] }
  0x21   :  { %183 = vrot.lane.b32.xlu1 %v108_v13, %s7104_s25  ;;  %181 = vrot.lane.b32.xlu0 %v107_v14, %s7104_s25 }
  0x25   :  { %187 = vrot.lane.b32.xlu1 %v110_v16, %s7104_s25  ;;  %185 = vrot.lane.b32.xlu0 %v109_v17, %s7104_s25  ;;  %v72_v16 = vld [vmem:[%s10289_s27 + $0x38] sm:$0xff] }
  0x29   :  { %191 = vrot.lane.b32.xlu1 %v112_v20, %s7104_s25  ;;  %189 = vrot.lane.b32.xlu0 %v111_v21, %s7104_s25 }
  0x2d   :  { %195 = vrot.lane.b32.xlu1 %v114_v22, %s7104_s25  ;;  %193 = vrot.lane.b32.xlu0 %v113_v23, %s7104_s25  ;;  %v74_v22 = vld [vmem:[%s10289_s27 + $0x48] sm:$0xff] }
  0x31   :  { %199 = vrot.lane.b32.xlu1 %v116_v24, %s7104_s25  ;;  %197 = vrot.lane.b32.xlu0 %v115_v25, %s7104_s25  ;;  %v75_v24 = vld [vmem:[%s10289_s27 + $0x50] sm:$0xff] }
  0x35   :  { %203 = vrot.lane.b32.xlu1 %v118_v26, %s7104_s25  ;;  %201 = vrot.lane.b32.xlu0 %v117_v27, %s7104_s25 }
  0x39   :  { %207 = vrot.lane.b32.xlu1 %v120_v28, %s7104_s25  ;;  %205 = vrot.lane.b32.xlu0 %v119_v29, %s7104_s25  ;;  %v76_v28 = vld [vmem:[%s10289_s27 + $0x58] sm:$0xff] }
  0x3d   :  { %211 = vrot.lane.b32.xlu1 %v122_v30, %s7104_s25  ;;  %209 = vrot.lane.b32.xlu0 %v121_v31, %s7104_s25  ;;  %v77_v30 = vld [vmem:[%s10289_s27 + $0x60] sm:$0xff] }
  0x41   :  { %215 = vrot.lane.b32.xlu1 %v124_v32, %s7104_s25  ;;  %213 = vrot.lane.b32.xlu0 %v123_v33, %s7104_s25 }
  0x45   :  { %219 = vrot.lane.b32.xlu1 %v126_v34, %s7104_s25  ;;  %217 = vrot.lane.b32.xlu0 %v125_v35, %s7104_s25  ;;  %v78_v34 = vld [vmem:[%s10289_s27 + $0x68] sm:$0xff] }
  0x49   :  { %223 = vrot.lane.b32.xlu1 %v128_v36, %s7104_s25  ;;  %221 = vrot.lane.b32.xlu0 %v127_v37, %s7104_s25  ;;  %v79_v36 = vld [vmem:[%s10289_s27 + $0x70] sm:$0xff] }
  0x68   :  { %2158 = vadd.xlane.f32.xlu0 %v2157_v43  ;;  %v2091_v43 = vld [vmem:[%s10287_s24 + $0x30] sm:$0xff] }
  0x69   :  { %v2130_v49 = vmul.f32 %v7367_v39, %v2091_v43  ;;  %v96_v43 = vld [vmem:[%s10289_s27 + $0xf8] sm:$0xff] }
  0x6c   :  { %2164 = vadd.xlane.f32.xlu0 %v2163_v48  ;;  %v82_v48 = vld [vmem:[%s10289_s27 + $0x88] sm:$0xff] }
  0x6d   :  { %2161 = vadd.xlane.f32.xlu1 %v2160_v50  ;;  %v2092_v50 = vld [vmem:[%s10287_s24 + $0x38] sm:$0xff] }
  0x6e   :  { %v2131_v54 = vmul.f32 %v7367_v39, %v2092_v50  ;;  %v659_v50 = vld [vmem:[%s10226_s6 + $0x10] sm:$0xff] }
  0x70   :  { %2167 = vadd.xlane.f32.xlu0 %v2166_v53 }
  0x71   :  { %2170 = vadd.xlane.f32.xlu1 %v2169_v55  ;;  %v2175_v55 = vsel %vm2156_vm0, %v2130_v49, 0.0  ;;  %v660_v49 = vld [vmem:[%s10226_s6 + $0x18] sm:$0xff] }
  0x74   :  { %2173 = vadd.xlane.f32.xlu0 %v2172_v56 }
  0x7f   :  { %v162_v58 = vpop.permute.xlu0 %161  ;;  %v166_v60 = vpop.permute.xlu1 %165 }
  0x80   :  { %v258_v61 = vsel %vm257_vm1, %v65_v57, %v162_v58  ;;  %v260_v0 = vsel %vm257_vm1, %v67_v62, %v166_v60  ;;  %v84_v58 = vld [vmem:[%s10289_s27 + $0x98] sm:$0xff]  ;;  %v85_v60 = vld [vmem:[%s10289_s27 + $0xa0] sm:$0xff]  ;;  %v2178_v62 = vsel %vm2156_vm0, %v2131_v54, 0.0 }
  0x81   :  { %6385 = vmatprep.mubr.msk.f32.mxu0 %vm303_vm2, %v258_v61 }
  0x82   :  { %1797 = vrot.lane.b32.xlu1 %v1733_v59, %s7105_s21 }
  0x83   :  { %v164_v1 = vpop.permute.xlu0 %163  ;;  %v168_v2 = vpop.permute.xlu1 %167 }
  0x84   :  { %v259_v4 = vsel %vm257_vm1, %v66_v63, %v164_v1  ;;  %v261_v6 = vsel %vm257_vm1, %v68_v3, %v168_v2  ;;  %v86_v1 = vld [vmem:[%s10289_s27 + $0xa8] sm:$0xff]  ;;  %v87_v3 = vld [vmem:[%s10289_s27 + $0xb0] sm:$0xff] }
  0x85   :  { %6386 = vmatmul.mubr.msk.f32.vlgmr.msra.gmra.mxu0 %vm303_vm2, %v259_v4 }
  0x86   :  { %6388 = vmatprep.mubr.msk.f32.mxu0 %vm303_vm2, %v260_v0 }
  0x87   :  { %v170_v8 = vpop.permute.xlu0 %169  ;;  %v172_v9 = vpop.permute.xlu1 %171 }
  0x88   :  { %v262_v11 = vsel %vm257_vm1, %v69_v5, %v170_v8  ;;  %v263_v13 = vsel %vm257_vm1, %v70_v10, %v172_v9  ;;  %v672_v5 = vld [vmem:[%s10226_s6 + $0x78] sm:$0xff] }
  0x89   :  { %6389 = vmatmul.mubr.msk.f32.gmra.mxu0 %vm303_vm2, %v261_v6  ;;  %v671_v6 = vld [vmem:[%s10226_s6 + $0x70] sm:$0xff]  ;;  %v88_v9 = vld [vmem:[%s10289_s27 + $0xb8] sm:$0xff]  ;;  %6433 = vmatprep.subr.mxu1 %v672_v5 }
  0x8a   :  { %1799 = vrot.lane.b32.xlu0 %v1734_v7, %s7105_s21  ;;  %6391 = vmatprep.mubr.msk.f32.mxu0 %vm303_vm2, %v262_v11  ;;  %v670_v11 = vld [vmem:[%s10226_s6 + $0x68] sm:$0xff] }
  0x8b   :  { %v174_v14 = vpop.permute.xlu0 %173  ;;  %v176_v15 = vpop.permute.xlu1 %175  ;;  %6434 = vmatpush3.msra.mxu1 %v672_v5  ;;  %v2097_v5 = vld [vmem:[%s10287_s24 + $0x60] sm:$0xff] }
  0x8c   :  { %v264_v17 = vsel %vm257_vm1, %v71_v12, %v174_v14  ;;  %v265_v19 = vsel %vm257_vm1, %v72_v16, %v176_v15  ;;  %v89_v12 = vld [vmem:[%s10289_s27 + $0xc0] sm:$0xff]  ;;  %6435 = vmatprep.subr.mxu1 %v671_v6 }
  0x8d   :  { %6392 = vmatmul.mubr.msk.f32.gmra.mxu0 %vm303_vm2, %v263_v13  ;;  %6436 = vmatpush3.msra.mxu1 %v671_v6  ;;  %v669_v14 = vld [vmem:[%s10226_s6 + $0x60] sm:$0xff]  ;;  %v2136_v6 = vmul.f32 %v7367_v39, %v2097_v5 }
  0x8e   :  { %6394 = vmatprep.mubr.msk.f32.mxu0 %vm303_vm2, %v264_v17  ;;  %v90_v17 = vld [vmem:[%s10289_s27 + $0xc8] sm:$0xff]  ;;  %6437 = vmatprep.subr.mxu1 %v670_v11  ;;  %v941_v5 = vld [vmem:[%s10228_s8 + $0x20] sm:$0xff] }
  0x8f   :  { %v178_v20 = vpop.permute.xlu0 %177  ;;  %v180_v21 = vpop.permute.xlu1 %179  ;;  %6438 = vmatpush3.msra.mxu1 %v670_v11 }
  0x90   :  { %v266_v23 = vsel %vm257_vm1, %v73_v18, %v178_v20  ;;  %v267_v25 = vsel %vm257_vm1, %v74_v22, %v180_v21  ;;  %v91_v20 = vld [vmem:[%s10289_s27 + $0xd0] sm:$0xff]  ;;  %6439 = vmatprep.subr.mxu1 %v669_v14 }
  0x91   :  { %6395 = vmatmul.mubr.msk.f32.gmra.mxu0 %vm303_vm2, %v265_v19  ;;  %v668_v19 = vld [vmem:[%s10226_s6 + $0x58] sm:$0xff]  ;;  %6440 = vmatpush3.msra.mxu1 %v669_v14  ;;  %v667_v22 = vld [vmem:[%s10226_s6 + $0x50] sm:$0xff] }
  0x92   :  { %6397 = vmatprep.mubr.msk.f32.mxu0 %vm303_vm2, %v266_v23  ;;  %6441 = vmatprep.subr.mxu1 %v668_v19 }
  0x93   :  { %v182_v26 = vpop.permute.xlu0 %181  ;;  %v184_v27 = vpop.permute.xlu1 %183  ;;  %6442 = vmatpush3.msra.mxu1 %v668_v19 }
  0x94   :  { %v268_v29 = vsel %vm257_vm1, %v75_v24, %v182_v26  ;;  %v269_v31 = vsel %vm257_vm1, %v76_v28, %v184_v27  ;;  %v1735_v27 = vld [vmem:[%s10225_s3 + $0x10] sm:$0xff]  ;;  %v666_v28 = vld [vmem:[%s10226_s6 + $0x48] sm:$0xff]  ;;  %6443 = vmatprep.subr.mxu1 %v667_v22 }
  0x95   :  { %6398 = vmatmul.mubr.msk.f32.gmra.mxu0 %vm303_vm2, %v267_v25  ;;  %v92_v25 = vld [vmem:[%s10289_s27 + $0xd8] sm:$0xff]  ;;  %6444 = vmatpush3.msra.mxu1 %v667_v22 }
  0x96   :  { %6400 = vmatprep.mubr.msk.f32.mxu0 %vm303_vm2, %v268_v29  ;;  %v93_v29 = vld [vmem:[%s10289_s27 + $0xe0] sm:$0xff]  ;;  %6445 = vmatprep.subr.mxu1 %v666_v28 }
  0x97   :  { %v186_v32 = vpop.permute.xlu0 %185  ;;  %v188_v33 = vpop.permute.xlu1 %187  ;;  %6446 = vmatpush3.msra.mxu1 %v666_v28 }
  0x98   :  { %v270_v35 = vsel %vm257_vm1, %v77_v30, %v186_v32  ;;  %v271_v37 = vsel %vm257_vm1, %v78_v34, %v188_v33  ;;  %v94_v34 = vld [vmem:[%s10289_s27 + $0xe8] sm:$0xff] }
  0x99   :  { %6401 = vmatmul.mubr.msk.f32.gmra.mxu0 %vm303_vm2, %v269_v31  ;;  %v665_v31 = vld [vmem:[%s10226_s6 + $0x40] sm:$0xff] }
  0x9a   :  { %6403 = vmatprep.mubr.msk.f32.mxu0 %vm303_vm2, %v270_v35  ;;  %6447 = vmatprep.subr.mxu1 %v665_v31 }
  0x9b   :  { %v190_v38 = vpop.permute.xlu0 %189  ;;  %v192_v40 = vpop.permute.xlu1 %191  ;;  %6448 = vmatpush3.msra.mxu1 %v665_v31 }
  0x9c   :  { %v272_v42 = vsel %vm257_vm1, %v79_v36, %v190_v38  ;;  %v273_v45 = vsel %vm257_vm1, %v80_v41, %v192_v40  ;;  %v664_v36 = vld [vmem:[%s10226_s6 + $0x38] sm:$0xff]  ;;  %v663_v40 = vld [vmem:[%s10226_s6 + $0x30] sm:$0xff] }
  0x9d   :  { %6404 = vmatmul.mubr.msk.f32.gmra.mxu0 %vm303_vm2, %v271_v37  ;;  %v95_v37 = vld [vmem:[%s10289_s27 + $0xf0] sm:$0xff]  ;;  %6449 = vmatprep.subr.mxu1 %v664_v36 }
  0x9e   :  { %6406 = vmatprep.mubr.msk.f32.mxu0 %vm303_vm2, %v272_v42  ;;  %6450 = vmatpush3.msra.mxu1 %v664_v36 }
  0x9f   :  { %v194_v46 = vpop.permute.xlu0 %193  ;;  %v196_v47 = vpop.permute.xlu1 %195  ;;  %6451 = vmatprep.subr.mxu1 %v663_v40 }
  0xa0   :  { %v274_v51 = vsel %vm257_vm1, %v81_v44, %v194_v46  ;;  %v275_v53 = vsel %vm257_vm1, %v82_v48, %v196_v47  ;;  %v662_v46 = vld [vmem:[%s10226_s6 + $0x28] sm:$0xff]  ;;  %6452 = vmatpush3.msra.mxu1 %v663_v40  ;;  %v661_v48 = vld [vmem:[%s10226_s6 + $0x20] sm:$0xff] }
  0xa1   :  { %6407 = vmatmul.mubr.msk.f32.gmra.mxu0 %vm303_vm2, %v273_v45  ;;  %v1736_v45 = vld [vmem:[%s10225_s3 + $0x18] sm:$0xff]  ;;  %6453 = vmatprep.subr.mxu1 %v662_v46 }
  0xa2   :  { %6409 = vmatprep.mubr.msk.f32.mxu0 %vm303_vm2, %v274_v51  ;;  %6454 = vmatpush3.msra.mxu1 %v662_v46  ;;  %v658_v51 = vld [vmem:[%s10226_s6 + $0x8] sm:$0xff] }
  0xa3   :  { %v198_v56 = vpop.permute.xlu0 %197  ;;  %v200_v57 = vpop.permute.xlu1 %199  ;;  %6455 = vmatprep.subr.mxu1 %v661_v48 }
  0xa4   :  { %v276_v59 = vsel %vm257_vm1, %v83_v52, %v198_v56  ;;  %v277_v61 = vsel %vm257_vm1, %v84_v58, %v200_v57  ;;  %6456 = vmatpush3.msra.mxu1 %v661_v48  ;;  %v657_v52 = vld [vmem:[%s10226_s6] sm:$0xff] }
  0xa5   :  { %6410 = vmatmul.mubr.msk.f32.gmra.mxu0 %vm303_vm2, %v275_v53  ;;  %6457 = vmatprep.subr.mxu1 %v660_v49  ;;  %v2093_v53 = vld [vmem:[%s10287_s24 + $0x40] sm:$0xff] }
  0xa6   :  { %2176 = vadd.xlane.f32.xlu1 %v2175_v55  ;;  %6412 = vmatprep.mubr.msk.f32.mxu0 %vm303_vm2, %v276_v59  ;;  %v2132_v54 = vmul.f32 %v7367_v39, %v2093_v53  ;;  %v2094_v55 = vld [vmem:[%s10287_s24 + $0x48] sm:$0xff]  ;;  %v1737_v59 = vld [vmem:[%s10225_s3 + $0x20] sm:$0xff] }
  0xa7   :  { %v202_v63 = vpop.permute.xlu0 %201  ;;  %v204_v0 = vpop.permute.xlu1 %203  ;;  %6458 = vmatpush3.msra.mxu1 %v660_v49  ;;  %v2133_v56 = vmul.f32 %v7367_v39, %v2094_v55  ;;  %v1742_v49 = vld [vmem:[%s10225_s3 + $0x48] sm:$0xff] }
  0xa8   :  { %v278_v2 = vsel %vm257_vm1, %v85_v60, %v202_v63  ;;  %v279_v4 = vsel %vm257_vm1, %v86_v1, %v204_v0  ;;  %6459 = vmatprep.subr.mxu1 %v659_v50  ;;  %v2181_v57 = vsel %vm2156_vm0, %v2132_v54, 0.0  ;;  %v1738_v60 = vld [vmem:[%s10225_s3 + $0x28] sm:$0xff]  ;;  %v2096_v63 = vld [vmem:[%s10287_s24 + $0x58] sm:$0xff] }
  0xa9   :  { %2179 = vadd.xlane.f32.xlu0 %v2178_v62  ;;  %6413 = vmatmul.mubr.msk.f32.gmra.mxu0 %vm303_vm2, %v277_v61  ;;  %v2184_v58 = vsel %vm2156_vm0, %v2133_v56, 0.0  ;;  %v2095_v61 = vld [vmem:[%s10287_s24 + $0x50] sm:$0xff]  ;;  %v2135_v0 = vmul.f32 %v7367_v39, %v2096_v63  ;;  %v942_v63 = vld [vmem:[%s10228_s8 + $0x28] sm:$0xff] }
  0xaa   :  { %6415 = vmatprep.mubr.msk.f32.mxu0 %vm303_vm2, %v278_v2  ;;  %6460 = vmatpush3.msra.mxu1 %v659_v50  ;;  %v2134_v62 = vmul.f32 %v7367_v39, %v2095_v61 }
  0xab   :  { %v206_v7 = vpop.permute.xlu0 %205  ;;  %v208_v8 = vpop.permute.xlu1 %207  ;;  %6461 = vmatprep.subr.mxu1 %v658_v51  ;;  %v2190_v2 = vsel %vm2156_vm0, %v2135_v0, 0.0 }
  0xac   :  { %v280_v10 = vsel %vm257_vm1, %v87_v3, %v206_v7  ;;  %v281_v13 = vsel %vm257_vm1, %v88_v9, %v208_v8  ;;  %6462 = vmatpush3.msra.mxu1 %v658_v51  ;;  %v2187_v1 = vsel %vm2156_vm0, %v2134_v62, 0.0  ;;  %v1739_v3 = vld [vmem:[%s10225_s3 + $0x30] sm:$0xff]  ;;  %v2098_v7 = vld [vmem:[%s10287_s24 + $0x68] sm:$0xff]  ;;  %v2193_v9 = vsel %vm2156_vm0, %v2136_v6, 0.0  ;;  %v940_v6 = vld [vmem:[%s10228_s8 + $0x18] sm:$0xff] }
  0xad   :  { %6416 = vmatmul.mubr.msk.f32.gmra.mxu0 %vm303_vm2, %v279_v4  ;;  %6463 = vmatprep.subr.mxu1 %v657_v52  ;;  %v1740_v4 = vld [vmem:[%s10225_s3 + $0x38] sm:$0xff]  ;;  %v2137_v8 = vmul.f32 %v7367_v39, %v2098_v7 }
  0xae   :  { %6418 = vmatprep.mubr.msk.f32.mxu0 %vm303_vm2, %v280_v10  ;;  %6464 = vmatpush3.msra.mxu1 %v657_v52  ;;  %v7678_v10 = vld [vmem:[%s10227_s5] ss:$0 sm:$0xff] }
  0xaf   :  { %v210_v15 = vpop.permute.xlu0 %209  ;;  %v212_v16 = vpop.permute.xlu1 %211 }
  0xb0   :  { %v282_v18 = vsel %vm257_vm1, %v89_v12, %v210_v15  ;;  %v283_v21 = vsel %vm257_vm1, %v90_v17, %v212_v16  ;;  %v2196_v12 = vsel %vm2156_vm0, %v2137_v8, 0.0  ;;  %v944_v17 = vld [vmem:[%s10228_s8 + $0x38] sm:$0xff] }
  0xb1   :  { %6419 = vmatmul.mubr.msk.f32.gmra.mxu0 %vm303_vm2, %v281_v13  ;;  %6513 = vmatprep.subr.mxu0 %v944_v17 }
  0xb2   :  { %6421 = vmatprep.mubr.msk.f32.mxu0 %vm303_vm2, %v282_v18  ;;  %v943_v18 = vld [vmem:[%s10228_s8 + $0x30] sm:$0xff]  ;;  %6514 = vmatpush3.msra.mxu0 %v944_v17 }
  0xb3   :  { %v214_v23 = vpop.permute.xlu0 %213  ;;  %v216_v24 = vpop.permute.xlu1 %215  ;;  %6515 = vmatprep.subr.mxu0 %v943_v18 }
  0xb4   :  { %v284_v26 = vsel %vm257_vm1, %v91_v20, %v214_v23  ;;  %v285_v30 = vsel %vm257_vm1, %v92_v25, %v216_v24  ;;  %6516 = vmatpush3.msra.mxu0 %v943_v18 }
  0xb5   :  { %6422 = vmatmul.mubr.msk.f32.gmra.mxu0 %vm303_vm2, %v283_v21  ;;  %6517 = vmatprep.subr.mxu0 %v942_v63 }
  0xb6   :  { %6424 = vmatprep.mubr.msk.f32.mxu0 %vm303_vm2, %v284_v26  ;;  %6518 = vmatpush3.msra.mxu0 %v942_v63  ;;  %v1743_v63 = vld [vmem:[%s10225_s3 + $0x50] sm:$0xff] }
  0xb7   :  { %1801 = vrot.lane.b32.xlu1 %v1735_v27, %s7105_s21  ;;  %v218_v32 = vpop.permute.xlu0 %217  ;;  %v220_v33 = vpop.permute.xlu1 %219  ;;  %6519 = vmatprep.subr.mxu0 %v941_v5 }
  0xb8   :  { %v286_v35 = vsel %vm257_vm1, %v93_v29, %v218_v32  ;;  %v287_v38 = vsel %vm257_vm1, %v94_v34, %v220_v33  ;;  %6520 = vmatpush3.msra.mxu0 %v941_v5 }
  0xb9   :  { %6425 = vmatmul.mubr.msk.f32.gmra.mxu0 %vm303_vm2, %v285_v30  ;;  %6521 = vmatprep.subr.mxu0 %v940_v6 }
  0xba   :  { %6427 = vmatprep.mubr.msk.f32.mxu0 %vm303_vm2, %v286_v35  ;;  %v1741_v35 = vld [vmem:[%s10225_s3 + $0x40] sm:$0xff]  ;;  %6522 = vmatpush3.msra.mxu0 %v940_v6 }
  0xbb   :  { %v222_v41 = vpop.permute.xlu0 %221  ;;  %v224_v42 = vpop.permute.xlu1 %223  ;;  %v1745_v6 = vld [vmem:[%s10225_s3 + $0x60] sm:$0xff] }
  0xbc   :  { %v288_v44 = vsel %vm257_vm1, %v95_v37, %v222_v41  ;;  %v289_v47 = vsel %vm257_vm1, %v96_v43, %v224_v42 }
  0xbd   :  { %6428 = vmatmul.mubr.msk.f32.gmra.mxu0 %vm303_vm2, %v287_v38 }
  0xbe   :  { %6430 = vmatprep.mubr.msk.f32.mxu0 %vm303_vm2, %v288_v44 }
  0xbf   :  { %1803 = vrot.lane.b32.xlu0 %v1736_v45, %s7105_s21 }
  0xc1   :  { %6431 = vmatmul.mubr.msk.f32.gmra.mxu0 %vm303_vm2, %v289_v47 }
  0xdb   :  { %2182 = vadd.xlane.f32.xlu1 %v2181_v57 }
  0xde   :  { %2185 = vadd.xlane.f32.xlu0 %v2184_v58 }
  0xec   :  { %1805 = vrot.lane.b32.xlu1 %v1737_v59, %s7105_s21 }
  0xf4   :  { %1807 = vrot.lane.b32.xlu0 %v1738_v60, %s7105_s21 }
 0x110   :  { %2188 = vadd.xlane.f32.xlu1 %v2187_v1 }
 0x113   :  { %2191 = vadd.xlane.f32.xlu0 %v2190_v2 }
 0x121   :  { %1809 = vrot.lane.b32.xlu1 %v1739_v3, %s7105_s21 }
 0x129   :  { %1811 = vrot.lane.b32.xlu0 %v1740_v4, %s7105_s21 }
 0x145   :  { %2194 = vadd.xlane.f32.xlu1 %v2193_v9  ;;  %v6387_v11 = vpop.f32.mrf.mxu0 }
 0x146   :  { %v472_v13 = vadd.f32 %v6387_v11, %v7678_v10 }
 0x147   :  { %v466_v14 = vpop.f32.mrf.mxu0 }
 0x148   :  { %2197 = vadd.xlane.f32.xlu0 %v2196_v12  ;;  %v467_v15 = vadd.f32 %v7678_v10, %v466_v14  ;;  %v626_v20 = vmax.f32 %v472_v13, 0.0 }
 0x149   :  { %v6390_v16 = vpop.f32.mrf.mxu0 }
 0x14a   :  { %v625_v19 = vmax.f32 %v467_v15, 0.0  ;;  %v482_v21 = vadd.f32 %v6390_v16, %v7678_v10 }
 0x14b   :  { %v476_v22 = vpop.f32.mrf.mxu0 }
 0x14c   :  { %v477_v23 = vadd.f32 %v7678_v10, %v476_v22  ;;  %6465 = vmatprep.mubr.f32.mxu1 %v625_v19  ;;  %v628_v26 = vmax.f32 %v482_v21, 0.0  ;;  %v2099_v21 = vld [vmem:[%s10287_s24 + $0x70] sm:$0xff] }
 0x14d   :  { %v6393_v24 = vpop.f32.mrf.mxu0  ;;  %6466 = vmatmul.mubr.f32.vlgmr.msra.gmra.mxu1 %v626_v20 }
 0x14e   :  { %v627_v25 = vmax.f32 %v477_v23, 0.0  ;;  %v492_v27 = vadd.f32 %v6393_v24, %v7678_v10 }
 0x14f   :  { %v486_v28 = vpop.f32.mrf.mxu0 }
 0x150   :  { %v487_v29 = vadd.f32 %v7678_v10, %v486_v28  ;;  %6468 = vmatprep.mubr.f32.mxu1 %v627_v25  ;;  %v630_v32 = vmax.f32 %v492_v27, 0.0  ;;  %v2138_v27 = vmul.f32 %v7367_v39, %v2099_v21  ;;  %v2100_v28 = vld [vmem:[%s10287_s24 + $0x78] sm:$0xff]  ;;  %v2105_v21 = vld [vmem:[%s10287_s24 + $0xa0] sm:$0xff] }
 0x151   :  { %v6396_v30 = vpop.f32.mrf.mxu0  ;;  %6469 = vmatmul.mubr.f32.gmra.mxu1 %v628_v26 }
 0x152   :  { %v629_v31 = vmax.f32 %v487_v29, 0.0  ;;  %v502_v33 = vadd.f32 %v6396_v30, %v7678_v10 }
 0x153   :  { %v496_v34 = vpop.f32.mrf.mxu0 }
 0x154   :  { %v497_v36 = vadd.f32 %v7678_v10, %v496_v34  ;;  %6471 = vmatprep.mubr.f32.mxu1 %v629_v31  ;;  %v632_v40 = vmax.f32 %v502_v33, 0.0  ;;  %v939_v31 = vld [vmem:[%s10228_s8 + $0x10] sm:$0xff]  ;;  %v2139_v33 = vmul.f32 %v7367_v39, %v2100_v28 }
 0x155   :  { %v6399_v37 = vpop.f32.mrf.mxu0  ;;  %6472 = vmatmul.mubr.f32.gmra.mxu1 %v630_v32  ;;  %6523 = vmatprep.subr.mxu0 %v939_v31 }
 0x156   :  { %v631_v38 = vmax.f32 %v497_v36, 0.0  ;;  %1813 = vrot.lane.b32.xlu1 %v1741_v35, %s7105_s21  ;;  %v512_v41 = vadd.f32 %v6399_v37, %v7678_v10  ;;  %v2199_v37 = vsel %vm2156_vm0, %v2138_v27, 0.0  ;;  %6524 = vmatpush3.msra.mxu0 %v939_v31 }
 0x157   :  { %v506_v42 = vpop.f32.mrf.mxu0 }
 0x158   :  { %v507_v43 = vadd.f32 %v7678_v10, %v506_v42  ;;  %6474 = vmatprep.mubr.f32.mxu1 %v631_v38  ;;  %v634_v46 = vmax.f32 %v512_v41, 0.0  ;;  %v2202_v42 = vsel %vm2156_vm0, %v2139_v33, 0.0 }
 0x159   :  { %v6402_v44 = vpop.f32.mrf.mxu0  ;;  %6475 = vmatmul.mubr.f32.gmra.mxu1 %v632_v40 }
 0x15a   :  { %v633_v45 = vmax.f32 %v507_v43, 0.0  ;;  %v522_v47 = vadd.f32 %v6402_v44, %v7678_v10 }
 0x15b   :  { %v516_v48 = vpop.f32.mrf.mxu0 }
 0x15c   :  { %v517_v50 = vadd.f32 %v7678_v10, %v516_v48  ;;  %6477 = vmatprep.mubr.f32.mxu1 %v633_v45  ;;  %v636_v53 = vmax.f32 %v522_v47, 0.0  ;;  %v938_v48 = vld [vmem:[%s10228_s8 + $0x8] sm:$0xff] }
 0x15d   :  { %v6405_v51 = vpop.f32.mrf.mxu0  ;;  %6478 = vmatmul.mubr.f32.gmra.mxu1 %v634_v46  ;;  %6525 = vmatprep.subr.mxu0 %v938_v48 }
 0x15e   :  { %v635_v52 = vmax.f32 %v517_v50, 0.0  ;;  %1815 = vrot.lane.b32.xlu0 %v1742_v49, %s7105_s21  ;;  %v532_v54 = vadd.f32 %v6405_v51, %v7678_v10  ;;  %v937_v49 = vld [vmem:[%s10228_s8] sm:$0xff]  ;;  %6526 = vmatpush3.msra.mxu0 %v938_v48 }
 0x15f   :  { %v526_v55 = vpop.f32.mrf.mxu0  ;;  %6527 = vmatprep.subr.mxu0 %v937_v49 }
 0x160   :  { %v527_v56 = vadd.f32 %v7678_v10, %v526_v55  ;;  %6480 = vmatprep.mubr.f32.mxu1 %v635_v52  ;;  %v638_v59 = vmax.f32 %v532_v54, 0.0  ;;  %6528 = vmatpush3.msra.mxu0 %v937_v49 }
 0x161   :  { %v6408_v57 = vpop.f32.mrf.mxu0  ;;  %6481 = vmatmul.mubr.f32.gmra.mxu1 %v636_v53 }
 0x162   :  { %v637_v58 = vmax.f32 %v527_v56, 0.0  ;;  %v542_v60 = vadd.f32 %v6408_v57, %v7678_v10 }
 0x163   :  { %v536_v61 = vpop.f32.mrf.mxu0 }
 0x164   :  { %v537_v62 = vadd.f32 %v7678_v10, %v536_v61  ;;  %6483 = vmatprep.mubr.f32.mxu1 %v637_v58  ;;  %v640_v2 = vmax.f32 %v542_v60, 0.0 }
 0x165   :  { %v6411_v0 = vpop.f32.mrf.mxu0  ;;  %6484 = vmatmul.mubr.f32.gmra.mxu1 %v638_v59 }
 0x166   :  { %v639_v1 = vmax.f32 %v537_v62, 0.0  ;;  %v552_v3 = vadd.f32 %v6411_v0, %v7678_v10  ;;  %v1744_v0 = vld [vmem:[%s10225_s3 + $0x58] sm:$0xff] }
 0x167   :  { %v546_v4 = vpop.f32.mrf.mxu0 }
 0x168   :  { %v547_v7 = vadd.f32 %v7678_v10, %v546_v4  ;;  %6486 = vmatprep.mubr.f32.mxu1 %v639_v1  ;;  %v642_v11 = vmax.f32 %v552_v3, 0.0 }
 0x169   :  { %v6414_v8 = vpop.f32.mrf.mxu0  ;;  %6487 = vmatmul.mubr.f32.gmra.mxu1 %v640_v2  ;;  %v2102_v2 = vld [vmem:[%s10287_s24 + $0x88] sm:$0xff] }
 0x16a   :  { %v641_v9 = vmax.f32 %v547_v7, 0.0  ;;  %v562_v12 = vadd.f32 %v6414_v8, %v7678_v10  ;;  %v2141_v3 = vmul.f32 %v7367_v39, %v2102_v2  ;;  %v1746_v7 = vld [vmem:[%s10225_s3 + $0x68] sm:$0xff]  ;;  %v2103_v8 = vld [vmem:[%s10287_s24 + $0x90] sm:$0xff] }
 0x16b   :  { %v556_v13 = vpop.f32.mrf.mxu0 }
 0x16c   :  { %v557_v14 = vadd.f32 %v7678_v10, %v556_v13  ;;  %6489 = vmatprep.mubr.f32.mxu1 %v641_v9  ;;  %v644_v17 = vmax.f32 %v562_v12, 0.0  ;;  %v2208_v5 = vsel %vm2156_vm0, %v2141_v3, 0.0  ;;  %v2142_v9 = vmul.f32 %v7367_v39, %v2103_v8 }
 0x16d   :  { %v6417_v15 = vpop.f32.mrf.mxu0  ;;  %6490 = vmatmul.mubr.f32.gmra.mxu1 %v642_v11  ;;  %v2104_v11 = vld [vmem:[%s10287_s24 + $0x98] sm:$0xff] }
 0x16e   :  { %v643_v16 = vmax.f32 %v557_v14, 0.0  ;;  %v572_v18 = vadd.f32 %v6417_v15, %v7678_v10  ;;  %v2143_v12 = vmul.f32 %v7367_v39, %v2104_v11  ;;  %v2211_v13 = vsel %vm2156_vm0, %v2142_v9, 0.0  ;;  %v1747_v15 = vld [vmem:[%s10225_s3 + $0x70] sm:$0xff] }
 0x16f   :  { %v566_v19 = vpop.f32.mrf.mxu0 }
 0x170   :  { %v567_v20 = vadd.f32 %v7678_v10, %v566_v19  ;;  %6492 = vmatprep.mubr.f32.mxu1 %v643_v16  ;;  %v646_v24 = vmax.f32 %v572_v18, 0.0  ;;  %v2214_v14 = vsel %vm2156_vm0, %v2143_v12, 0.0  ;;  %v1748_v16 = vld [vmem:[%s10225_s3 + $0x78] sm:$0xff] }
 0x171   :  { %v6420_v22 = vpop.f32.mrf.mxu0  ;;  %6493 = vmatmul.mubr.f32.gmra.mxu1 %v644_v17  ;;  %v7802_v17 = vld [vmem:[%s10229_s7] ss:$0 sm:$0xff] }
 0x172   :  { %v645_v23 = vmax.f32 %v567_v20, 0.0  ;;  %v582_v25 = vadd.f32 %v6420_v22, %v7678_v10 }
 0x173   :  { %v576_v26 = vpop.f32.mrf.mxu0 }
 0x174   :  { %v577_v29 = vadd.f32 %v7678_v10, %v576_v26  ;;  %6495 = vmatprep.mubr.f32.mxu1 %v645_v23  ;;  %v648_v34 = vmax.f32 %v582_v25, 0.0  ;;  %v2144_v25 = vmul.f32 %v7367_v39, %v2105_v21  ;;  %v2106_v26 = vld [vmem:[%s10287_s24 + $0xa8] sm:$0xff] }
 0x175   :  { %v6423_v30 = vpop.f32.mrf.mxu0  ;;  %6496 = vmatmul.mubr.f32.gmra.mxu1 %v646_v24 }
 0x176   :  { %v647_v32 = vmax.f32 %v577_v29, 0.0  ;;  %v592_v35 = vadd.f32 %v6423_v30, %v7678_v10 }
 0x177   :  { %v586_v36 = vpop.f32.mrf.mxu0 }
 0x178   :  { %v587_v38 = vadd.f32 %v7678_v10, %v586_v36  ;;  %6498 = vmatprep.mubr.f32.mxu1 %v647_v32  ;;  %v650_v43 = vmax.f32 %v592_v35, 0.0  ;;  %v2145_v32 = vmul.f32 %v7367_v39, %v2106_v26 }
 0x179   :  { %v6426_v40 = vpop.f32.mrf.mxu0  ;;  %6499 = vmatmul.mubr.f32.gmra.mxu1 %v648_v34  ;;  %v2217_v34 = vsel %vm2156_vm0, %v2144_v25, 0.0 }
 0x17a   :  { %v649_v41 = vmax.f32 %v587_v38, 0.0  ;;  %2200 = vadd.xlane.f32.xlu1 %v2199_v37  ;;  %v602_v44 = vadd.f32 %v6426_v40, %v7678_v10 }
 0x17b   :  { %v596_v45 = vpop.f32.mrf.mxu0 }
 0x17c   :  { %v597_v46 = vadd.f32 %v7678_v10, %v596_v45  ;;  %6501 = vmatprep.mubr.f32.mxu1 %v649_v41  ;;  %v652_v51 = vmax.f32 %v602_v44, 0.0  ;;  %v2220_v41 = vsel %vm2156_vm0, %v2145_v32, 0.0 }
 0x17d   :  { %2203 = vadd.xlane.f32.xlu0 %v2202_v42  ;;  %v6429_v47 = vpop.f32.mrf.mxu0  ;;  %6502 = vmatmul.mubr.f32.gmra.mxu1 %v650_v43 }
 0x17e   :  { %v651_v50 = vmax.f32 %v597_v46, 0.0  ;;  %v612_v52 = vadd.f32 %v6429_v47, %v7678_v10  ;;  %v1307_v47 = vld [vmem:[%s10230_s10 + $0x8] sm:$0xff] }
 0x17f   :  { %v606_v53 = vpop.f32.mrf.mxu0  ;;  %6577 = vmatprep.subr.mxu0 %v1307_v47  ;;  %7029 = vmatprep.subr.mxu1 %v1307_v47 }
 0x180   :  { %v607_v54 = vadd.f32 %v7678_v10, %v606_v53  ;;  %6504 = vmatprep.mubr.f32.mxu1 %v651_v50  ;;  %v654_v57 = vmax.f32 %v612_v52, 0.0  ;;  %7031 = vmatpush3.msra.mxu1 %v1307_v47 }
 0x181   :  { %v6432_v55 = vpop.f32.mrf.mxu0  ;;  %6505 = vmatmul.mubr.f32.gmra.mxu1 %v652_v51 }
 0x182   :  { %v653_v56 = vmax.f32 %v607_v54, 0.0  ;;  %v622_v58 = vadd.f32 %v6432_v55, %v7678_v10 }
 0x183   :  { %v616_v59 = vpop.f32.mrf.mxu0 }
 0x184   :  { %v617_v60 = vadd.f32 %v7678_v10, %v616_v59  ;;  %6507 = vmatprep.mubr.f32.mxu1 %v653_v56  ;;  %v656_v62 = vmax.f32 %v622_v58, 0.0  ;;  %v2101_v10 = vld [vmem:[%s10287_s24 + $0x80] sm:$0xff] }
 0x185   :  { %6508 = vmatmul.mubr.f32.gmra.mxu1 %v654_v57  ;;  %v2140_v1 = vmul.f32 %v7367_v39, %v2101_v10 }
 0x186   :  { %v655_v61 = vmax.f32 %v617_v60, 0.0 }
 0x187   :  { %v2205_v4 = vsel %vm2156_vm0, %v2140_v1, 0.0 }
 0x188   :  { %6510 = vmatprep.mubr.f32.mxu1 %v655_v61 }
 0x189   :  { %6511 = vmatmul.mubr.f32.gmra.mxu1 %v656_v62 }
 0x18b   :  { %1817 = vrot.lane.b32.xlu1 %v1743_v63, %s7105_s21 }
 0x193   :  { %1819 = vrot.lane.b32.xlu0 %v1744_v0, %s7105_s21  ;;  %v1749_v0 = vld [vmem:[%s10225_s3 + $0x80] sm:$0xff] }
 0x1af   :  { %2206 = vadd.xlane.f32.xlu1 %v2205_v4 }
 0x1b2   :  { %2209 = vadd.xlane.f32.xlu0 %v2208_v5 }
 0x1c0   :  { %1821 = vrot.lane.b32.xlu1 %v1745_v6, %s7105_s21 }
 0x1c8   :  { %1823 = vrot.lane.b32.xlu0 %v1746_v7, %s7105_s21 }
 0x1e4   :  { %2212 = vadd.xlane.f32.xlu1 %v2211_v13  ;;  %v1750_v13 = vld [vmem:[%s10225_s3 + $0x88] sm:$0xff] }
 0x1e7   :  { %2215 = vadd.xlane.f32.xlu0 %v2214_v14 }
 0x1f5   :  { %1825 = vrot.lane.b32.xlu1 %v1747_v15, %s7105_s21 }
 0x1fd   :  { %1827 = vrot.lane.b32.xlu0 %v1748_v16, %s7105_s21 }
 0x20d   :  { %v6467_v18 = vpop.f32.mrf.mxu1 }
 0x20e   :  { %v752_v19 = vadd.f32 %v6467_v18, %v7802_v17 }
 0x20f   :  { %v746_v20 = vpop.f32.mrf.mxu1 }
 0x210   :  { %v747_v22 = vadd.f32 %v7802_v17, %v746_v20  ;;  %v906_v27 = vmax.f32 %v752_v19, 0.0 }
 0x211   :  { %v6470_v23 = vpop.f32.mrf.mxu1 }
 0x212   :  { %v905_v24 = vmax.f32 %v747_v22, 0.0  ;;  %v762_v28 = vadd.f32 %v6470_v23, %v7802_v17 }
 0x213   :  { %v756_v29 = vpop.f32.mrf.mxu1 }
 0x214   :  { %v757_v30 = vadd.f32 %v7802_v17, %v756_v29  ;;  %6529 = vmatprep.mubr.msk.f32.mxu0 %vm952_vm3, %v905_v24  ;;  %v908_v35 = vmax.f32 %v762_v28, 0.0 }
 0x215   :  { %v6473_v31 = vpop.f32.mrf.mxu1  ;;  %6530 = vmatmul.mubr.msk.f32.vlgmr.msra.gmra.mxu0 %vm952_vm3, %v906_v27 }
 0x216   :  { %v907_v33 = vmax.f32 %v757_v30, 0.0  ;;  %v772_v36 = vadd.f32 %v6473_v31, %v7802_v17  ;;  %6578 = vmatpush3.msra.mxu0 %v1307_v47  ;;  %v2107_v47 = vld [vmem:[%s10287_s24 + $0xb0] sm:$0xff] }
 0x217   :  { %v766_v37 = vpop.f32.mrf.mxu1 }
 0x218   :  { %v767_v38 = vadd.f32 %v7802_v17, %v766_v37  ;;  %6532 = vmatprep.mubr.msk.f32.mxu0 %vm952_vm3, %v907_v33  ;;  %v910_v43 = vmax.f32 %v772_v36, 0.0  ;;  %v1306_v33 = vld [vmem:[%s10230_s10] sm:$0xff]  ;;  %s7108_s10 = smov 64  }
 0x219   :  { %2218 = vadd.xlane.f32.xlu1 %v2217_v34  ;;  %v6476_v40 = vpop.f32.mrf.mxu1  ;;  %6533 = vmatmul.mubr.msk.f32.gmra.mxu0 %vm952_vm3, %v908_v35 }
 0x21a   :  { %v909_v42 = vmax.f32 %v767_v38, 0.0  ;;  %v782_v39 = vadd.f32 %v6476_v40, %v7802_v17  ;;  %6579 = vmatprep.subr.mxu0 %v1306_v33  ;;  %7030 = vmatprep.subr.mxu1 %v1306_v33 }
 0x21b   :  { %v776_v44 = vpop.f32.mrf.mxu1  ;;  %6580 = vmatpush3.msra.mxu0 %v1306_v33  ;;  %7032 = vmatpush3.msra.mxu1 %v1306_v33 }
 0x21c   :  { %v777_v45 = vadd.f32 %v7802_v17, %v776_v44  ;;  %2221 = vadd.xlane.f32.xlu0 %v2220_v41  ;;  %6535 = vmatprep.mubr.msk.f32.mxu0 %vm952_vm3, %v909_v42  ;;  %v912_v49 = vmax.f32 %v782_v39, 0.0 }
 0x21d   :  { %v6479_v46 = vpop.f32.mrf.mxu1  ;;  %6536 = vmatmul.mubr.msk.f32.gmra.mxu0 %vm952_vm3, %v910_v43 }
 0x21e   :  { %v911_v48 = vmax.f32 %v777_v45, 0.0  ;;  %v792_v50 = vadd.f32 %v6479_v46, %v7802_v17 }
 0x21f   :  { %v786_v51 = vpop.f32.mrf.mxu1 }
 0x220   :  { %v787_v52 = vadd.f32 %v7802_v17, %v786_v51  ;;  %6538 = vmatprep.mubr.msk.f32.mxu0 %vm952_vm3, %v911_v48  ;;  %v914_v55 = vmax.f32 %v792_v50, 0.0 }
 0x221   :  { %v6482_v53 = vpop.f32.mrf.mxu1  ;;  %6539 = vmatmul.mubr.msk.f32.gmra.mxu0 %vm952_vm3, %v912_v49 }
 0x222   :  { %v913_v54 = vmax.f32 %v787_v52, 0.0  ;;  %v802_v56 = vadd.f32 %v6482_v53, %v7802_v17  ;;  %v7889_v53 = vld [vmem:[%s10288_s26] ss:$0 sm:$0xff] }
 0x223   :  { %v796_v57 = vpop.f32.mrf.mxu1 }
 0x224   :  { %v797_v58 = vadd.f32 %v7802_v17, %v796_v57  ;;  %6541 = vmatprep.mubr.msk.f32.mxu0 %vm952_vm3, %v913_v54  ;;  %v916_v61 = vmax.f32 %v802_v56, 0.0  ;;  %v2146_v54 = vmul.f32 %v7889_v53, %v2107_v47 }
 0x225   :  { %v6485_v59 = vpop.f32.mrf.mxu1  ;;  %6542 = vmatmul.mubr.msk.f32.gmra.mxu0 %vm952_vm3, %v914_v55  ;;  %v2108_v55 = vld [vmem:[%s10287_s24 + $0xb8] sm:$0xff] }
 0x226   :  { %v915_v60 = vmax.f32 %v797_v58, 0.0  ;;  %v812_v62 = vadd.f32 %v6485_v59, %v7802_v17  ;;  %v2147_v59 = vmul.f32 %v7889_v53, %v2108_v55 }
 0x227   :  { %v806_v63 = vpop.f32.mrf.mxu1 }
 0x228   :  { %v807_v10 = vadd.f32 %v7802_v17, %v806_v63  ;;  %6544 = vmatprep.mubr.msk.f32.mxu0 %vm952_vm3, %v915_v60  ;;  %v918_v3 = vmax.f32 %v812_v62, 0.0  ;;  %v2223_v63 = vsel %vm2156_vm0, %v2146_v54, 0.0 }
 0x229   :  { %v6488_v1 = vpop.f32.mrf.mxu1  ;;  %6545 = vmatmul.mubr.msk.f32.gmra.mxu0 %vm952_vm3, %v916_v61 }
 0x22a   :  { %v917_v2 = vmax.f32 %v807_v10, 0.0  ;;  %1829 = vrot.lane.b32.xlu1 %v1749_v0, %s7105_s21  ;;  %v822_v4 = vadd.f32 %v6488_v1, %v7802_v17  ;;  %v2226_v1 = vsel %vm2156_vm0, %v2147_v59, 0.0 }
 0x22b   :  { %v816_v5 = vpop.f32.mrf.mxu1 }
 0x22c   :  { %v817_v6 = vadd.f32 %v7802_v17, %v816_v5  ;;  %6547 = vmatprep.mubr.msk.f32.mxu0 %vm952_vm3, %v917_v2  ;;  %v920_v9 = vmax.f32 %v822_v4, 0.0  ;;  %v2109_v4 = vld [vmem:[%s10287_s24 + $0xc0] sm:$0xff] }
 0x22d   :  { %v6491_v7 = vpop.f32.mrf.mxu1  ;;  %6548 = vmatmul.mubr.msk.f32.gmra.mxu0 %vm952_vm3, %v918_v3  ;;  %v1751_v3 = vld [vmem:[%s10225_s3 + $0x90] sm:$0xff]  ;;  %v2148_v5 = vmul.f32 %v7889_v53, %v2109_v4 }
 0x22e   :  { %v919_v8 = vmax.f32 %v817_v6, 0.0  ;;  %v832_v11 = vadd.f32 %v6491_v7, %v7802_v17  ;;  %v2110_v6 = vld [vmem:[%s10287_s24 + $0xc8] sm:$0xff] }
 0x22f   :  { %v826_v12 = vpop.f32.mrf.mxu1  ;;  %v2149_v7 = vmul.f32 %v7889_v53, %v2110_v6 }
 0x230   :  { %v827_v14 = vadd.f32 %v7802_v17, %v826_v12  ;;  %6550 = vmatprep.mubr.msk.f32.mxu0 %vm952_vm3, %v919_v8  ;;  %v922_v18 = vmax.f32 %v832_v11, 0.0  ;;  %v2229_v8 = vsel %vm2156_vm0, %v2148_v5, 0.0  ;;  %v1753_v11 = vld [vmem:[%s10225_s3 + $0xa0] sm:$0xff]  ;;  %v1754_v12 = vld [vmem:[%s10225_s3 + $0xa8] sm:$0xff] }
 0x231   :  { %v6494_v15 = vpop.f32.mrf.mxu1  ;;  %6551 = vmatmul.mubr.msk.f32.gmra.mxu0 %vm952_vm3, %v920_v9  ;;  %v2232_v9 = vsel %vm2156_vm0, %v2149_v7, 0.0 }
 0x232   :  { %v921_v16 = vmax.f32 %v827_v14, 0.0  ;;  %1831 = vrot.lane.b32.xlu0 %v1750_v13, %s7105_s21  ;;  %v842_v19 = vadd.f32 %v6494_v15, %v7802_v17  ;;  %v2111_v13 = vld [vmem:[%s10287_s24 + $0xd0] sm:$0xff]  ;;  %v2112_v15 = vld [vmem:[%s10287_s24 + $0xd8] sm:$0xff] }
 0x233   :  { %v836_v20 = vpop.f32.mrf.mxu1  ;;  %v2150_v14 = vmul.f32 %v7889_v53, %v2111_v13 }
 0x234   :  { %v837_v21 = vadd.f32 %v7802_v17, %v836_v20  ;;  %6553 = vmatprep.mubr.msk.f32.mxu0 %vm952_vm3, %v921_v16  ;;  %v924_v24 = vmax.f32 %v842_v19, 0.0  ;;  %v2151_v16 = vmul.f32 %v7889_v53, %v2112_v15  ;;  %v1755_v20 = vld [vmem:[%s10225_s3 + $0xb0] sm:$0xff] }
 0x235   :  { %v6497_v22 = vpop.f32.mrf.mxu1  ;;  %6554 = vmatmul.mubr.msk.f32.gmra.mxu0 %vm952_vm3, %v922_v18  ;;  %v2235_v18 = vsel %vm2156_vm0, %v2150_v14, 0.0 }
 0x236   :  { %v923_v23 = vmax.f32 %v837_v21, 0.0  ;;  %v852_v25 = vadd.f32 %v6497_v22, %v7802_v17  ;;  %v2238_v19 = vsel %vm2156_vm0, %v2151_v16, 0.0  ;;  %v1756_v21 = vld [vmem:[%s10225_s3 + $0xb8] sm:$0xff]  ;;  %v7954_v22 = vld [vmem:[%s10231_s9] ss:$0 sm:$0xff] }
 0x237   :  { %v846_v26 = vpop.f32.mrf.mxu1 }
 0x238   :  { %v847_v27 = vadd.f32 %v7802_v17, %v846_v26  ;;  %6556 = vmatprep.mubr.msk.f32.mxu0 %vm952_vm3, %v923_v23  ;;  %v926_v30 = vmax.f32 %v852_v25, 0.0 }
 0x239   :  { %v6500_v28 = vpop.f32.mrf.mxu1  ;;  %6557 = vmatmul.mubr.msk.f32.gmra.mxu0 %vm952_vm3, %v924_v24 }
 0x23a   :  { %v925_v29 = vmax.f32 %v847_v27, 0.0  ;;  %v862_v31 = vadd.f32 %v6500_v28, %v7802_v17 }
 0x23b   :  { %v856_v32 = vpop.f32.mrf.mxu1 }
 0x23c   :  { %v857_v34 = vadd.f32 %v7802_v17, %v856_v32  ;;  %6559 = vmatprep.mubr.msk.f32.mxu0 %vm952_vm3, %v925_v29  ;;  %v928_v37 = vmax.f32 %v862_v31, 0.0 }
 0x23d   :  { %v6503_v35 = vpop.f32.mrf.mxu1  ;;  %6560 = vmatmul.mubr.msk.f32.gmra.mxu0 %vm952_vm3, %v926_v30 }
 0x23e   :  { %v927_v36 = vmax.f32 %v857_v34, 0.0  ;;  %v872_v38 = vadd.f32 %v6503_v35, %v7802_v17 }
 0x23f   :  { %v866_v40 = vpop.f32.mrf.mxu1 }
 0x240   :  { %v867_v41 = vadd.f32 %v7802_v17, %v866_v40  ;;  %6562 = vmatprep.mubr.msk.f32.mxu0 %vm952_vm3, %v927_v36  ;;  %v930_v39 = vmax.f32 %v872_v38, 0.0 }
 0x241   :  { %v6506_v42 = vpop.f32.mrf.mxu1  ;;  %6563 = vmatmul.mubr.msk.f32.gmra.mxu0 %vm952_vm3, %v928_v37 }
 0x242   :  { %v929_v43 = vmax.f32 %v867_v41, 0.0  ;;  %v882_v44 = vadd.f32 %v6506_v42, %v7802_v17 }
 0x243   :  { %v876_v45 = vpop.f32.mrf.mxu1 }
 0x244   :  { %v877_v46 = vadd.f32 %v7802_v17, %v876_v45  ;;  %6565 = vmatprep.mubr.msk.f32.mxu0 %vm952_vm3, %v929_v43  ;;  %v932_v50 = vmax.f32 %v882_v44, 0.0  ;;  %v2113_v44 = vld [vmem:[%s10287_s24 + $0xe0] sm:$0xff] }
 0x245   :  { %v6509_v48 = vpop.f32.mrf.mxu1  ;;  %6566 = vmatmul.mubr.msk.f32.gmra.mxu0 %vm952_vm3, %v930_v39 }
 0x246   :  { %v931_v49 = vmax.f32 %v877_v46, 0.0  ;;  %v892_v51 = vadd.f32 %v6509_v48, %v7802_v17  ;;  %v2152_v48 = vmul.f32 %v7889_v53, %v2113_v44 }
 0x247   :  { %v886_v52 = vpop.f32.mrf.mxu1 }
 0x248   :  { %v887_v56 = vadd.f32 %v7802_v17, %v886_v52  ;;  %6568 = vmatprep.mubr.msk.f32.mxu0 %vm952_vm3, %v931_v49  ;;  %v934_v60 = vmax.f32 %v892_v51, 0.0  ;;  %v2114_v49 = vld [vmem:[%s10287_s24 + $0xe8] sm:$0xff] }
 0x249   :  { %v6512_v57 = vpop.f32.mrf.mxu1  ;;  %6569 = vmatmul.mubr.msk.f32.gmra.mxu0 %vm952_vm3, %v932_v50 }
 0x24a   :  { %v933_v58 = vmax.f32 %v887_v56, 0.0  ;;  %v902_v61 = vadd.f32 %v6512_v57, %v7802_v17  ;;  %v2153_v56 = vmul.f32 %v7889_v53, %v2114_v49 }
 0x24b   :  { %v896_v62 = vpop.f32.mrf.mxu1 }
 0x24c   :  { %v897_v0 = vadd.f32 %v7802_v17, %v896_v62  ;;  %6571 = vmatprep.mubr.msk.f32.mxu0 %vm952_vm3, %v933_v58  ;;  %v936_v2 = vmax.f32 %v902_v61, 0.0  ;;  %v1752_v17 = vld [vmem:[%s10225_s3 + $0x98] sm:$0xff]  ;;  %v2241_v58 = vsel %vm2156_vm0, %v2152_v48, 0.0 }
 0x24d   :  { %6572 = vmatmul.mubr.msk.f32.gmra.mxu0 %vm952_vm3, %v934_v60 }
 0x24e   :  { %v935_v10 = vmax.f32 %v897_v0, 0.0  ;;  %2224 = vadd.xlane.f32.xlu1 %v2223_v63  ;;  %v2244_v0 = vsel %vm2156_vm0, %v2153_v56, 0.0 }
 0x250   :  { %6574 = vmatprep.mubr.msk.f32.mxu0 %vm952_vm3, %v935_v10  ;;  %v8022_v10 = vpop.xlane.xlu0 %2158 }
 0x251   :  { %2227 = vadd.xlane.f32.xlu0 %v2226_v1  ;;  %6575 = vmatmul.mubr.msk.f32.gmra.mxu0 %vm952_vm3, %v936_v2 }
 0x25f   :  { %1833 = vrot.lane.b32.xlu1 %v1751_v3, %s7105_s21 }
 0x267   :  { %1835 = vrot.lane.b32.xlu0 %v1752_v17, %s7105_s21 }
 0x283   :  { %2230 = vadd.xlane.f32.xlu1 %v2229_v8 }
 0x286   :  { %2233 = vadd.xlane.f32.xlu0 %v2232_v9 }
 0x294   :  { %1837 = vrot.lane.b32.xlu1 %v1753_v11, %s7105_s21  ;;  %v8039_v11 = vpop.xlane.xlu0 %2164 }
 0x29c   :  { %1839 = vrot.lane.b32.xlu0 %v1754_v12, %s7105_s21 }
 0x2b8   :  { %2236 = vadd.xlane.f32.xlu1 %v2235_v18 }
 0x2bb   :  { %2239 = vadd.xlane.f32.xlu0 %v2238_v19 }
 0x2c9   :  { %1841 = vrot.lane.b32.xlu1 %v1755_v20, %s7105_s21 }
 0x2d1   :  { %1843 = vrot.lane.b32.xlu0 %v1756_v21, %s7105_s21  ;;  %v8056_v21 = vpop.xlane.xlu0 %2167 }
 0x2d5   :  { %v6531_v23 = vpop.f32.mrf.mxu0 }
 0x2d6   :  { %v7957_v24 = vadd.f32 %v6531_v23, %v7954_v22 }
 0x2d7   :  { %v1115_v25 = vpop.f32.mrf.mxu0 }
 0x2d8   :  { %v7960_v26 = vadd.f32 %v7954_v22, %v1115_v25  ;;  %v1275_v29 = vmax.f32 %v7957_v24, 0.0 }
 0x2d9   :  { %v6534_v27 = vpop.f32.mrf.mxu0 }
 0x2da   :  { %v1274_v28 = vmax.f32 %v7960_v26, 0.0  ;;  %v7965_v30 = vadd.f32 %v6534_v27, %v7954_v22 }
 0x2db   :  { %v1125_v31 = vpop.f32.mrf.mxu0 }
 0x2dc   :  { %v7968_v32 = vadd.f32 %v7954_v22, %v1125_v31  ;;  %6581 = vmatprep.mubr.msk.f32.mxu0 %vm1315_vm4, %v1274_v28  ;;  %v1277_v35 = vmax.f32 %v7965_v30, 0.0 }
 0x2dd   :  { %v6537_v33 = vpop.f32.mrf.mxu0  ;;  %6582 = vmatmul.mubr.msk.f32.vlgmr.msra.gmra.mxu0 %vm1315_vm4, %v1275_v29  ;;  %v1757_v29 = vld [vmem:[%s10225_s3 + $0xc0] sm:$0xff] }
 0x2de   :  { %v1276_v34 = vmax.f32 %v7968_v32, 0.0  ;;  %v7975_v36 = vadd.f32 %v6537_v33, %v7954_v22 }
 0x2df   :  { %v1135_v37 = vpop.f32.mrf.mxu0 }
 0x2e0   :  { %v7978_v38 = vadd.f32 %v7954_v22, %v1135_v37  ;;  %6584 = vmatprep.mubr.msk.f32.mxu0 %vm1315_vm4, %v1276_v34  ;;  %v1279_v42 = vmax.f32 %v7975_v36, 0.0 }
 0x2e1   :  { %v6540_v40 = vpop.f32.mrf.mxu0  ;;  %6585 = vmatmul.mubr.msk.f32.gmra.mxu0 %vm1315_vm4, %v1277_v35 }
 0x2e2   :  { %v1278_v41 = vmax.f32 %v7978_v38, 0.0  ;;  %v7985_v43 = vadd.f32 %v6540_v40, %v7954_v22 }
 0x2e3   :  { %v1145_v39 = vpop.f32.mrf.mxu0 }
 0x2e4   :  { %v7991_v45 = vadd.f32 %v7954_v22, %v1145_v39  ;;  %6587 = vmatprep.mubr.msk.f32.mxu1 %vm1315_vm4, %v1278_v41  ;;  %v1281_v50 = vmax.f32 %v7985_v43, 0.0  ;;  %v8077_v41 = vpop.xlane.xlu1 %2161 }
 0x2e5   :  { %v6543_v46 = vpop.f32.mrf.mxu0  ;;  %6588 = vmatmul.mubr.msk.f32.vlgmr.msra.gmra.mxu1 %vm1315_vm4, %v1279_v42  ;;  %v8079_v42 = vpop.xlane.xlu0 %2173 }
 0x2e6   :  { %v1280_v47 = vmax.f32 %v7991_v45, 0.0  ;;  %v8002_v51 = vadd.f32 %v6543_v46, %v7954_v22 }
 0x2e7   :  { %v1155_v52 = vpop.f32.mrf.mxu0 }
 0x2e8   :  { %v8005_v54 = vadd.f32 %v7954_v22, %v1155_v52  ;;  %6590 = vmatprep.mubr.msk.f32.mxu1 %vm1315_vm4, %v1280_v47  ;;  %v1283_v59 = vmax.f32 %v8002_v51, 0.0  ;;  %v8099_v56 = vpop.xlane.xlu1 %2170 }
 0x2e9   :  { %v6546_v55 = vpop.f32.mrf.mxu0  ;;  %6591 = vmatmul.mubr.msk.f32.gmra.mxu1 %vm1315_vm4, %v1281_v50  ;;  %v1758_v50 = vld [vmem:[%s10225_s3 + $0xc8] sm:$0xff] }
 0x2ea   :  { %v1282_v57 = vmax.f32 %v8005_v54, 0.0  ;;  %v8014_v60 = vadd.f32 %v6546_v55, %v7954_v22 }
 0x2eb   :  { %v1165_v61 = vpop.f32.mrf.mxu0 }
 0x2ec   :  { %v8017_v62 = vadd.f32 %v7954_v22, %v1165_v61  ;;  %6593 = vmatprep.mubr.msk.f32.mxu1 %vm1315_vm4, %v1282_v57  ;;  %v1285_v2 = vmax.f32 %v8014_v60, 0.0  ;;  %v8101_v57 = vpop.permute.xlu0 %1799 }
 0x2ed   :  { %2242 = vadd.xlane.f32.xlu1 %v2241_v58  ;;  %v6549_v63 = vpop.f32.mrf.mxu0  ;;  %6594 = vmatmul.mubr.msk.f32.gmra.mxu1 %vm1315_vm4, %v1283_v59 }
 0x2ee   :  { %v1284_v1 = vmax.f32 %v8017_v62, 0.0  ;;  %v8027_v3 = vadd.f32 %v6549_v63, %v7954_v22 }
 0x2ef   :  { %v1175_v17 = vpop.f32.mrf.mxu0 }
 0x2f0   :  { %v8030_v4 = vadd.f32 %v7954_v22, %v1175_v17  ;;  %2245 = vadd.xlane.f32.xlu0 %v2244_v0  ;;  %6596 = vmatprep.mubr.msk.f32.mxu1 %vm1315_vm4, %v1284_v1  ;;  %v1287_v7 = vmax.f32 %v8027_v3, 0.0 }
 0x2f1   :  { %v6552_v5 = vpop.f32.mrf.mxu0  ;;  %6597 = vmatmul.mubr.msk.f32.gmra.mxu1 %vm1315_vm4, %v1285_v2  ;;  %v8114_v2 = vpop.xlane.xlu0 %2179 }
 0x2f2   :  { %v1286_v6 = vmax.f32 %v8030_v4, 0.0  ;;  %v8037_v8 = vadd.f32 %v6552_v5, %v7954_v22 }
 0x2f3   :  { %v1185_v9 = vpop.f32.mrf.mxu0 }
 0x2f4   :  { %v8042_v12 = vadd.f32 %v7954_v22, %v1185_v9  ;;  %6599 = vmatprep.mubr.msk.f32.mxu1 %vm1315_vm4, %v1286_v6  ;;  %v1289_v15 = vmax.f32 %v8037_v8, 0.0  ;;  %v8121_v9 = vpop.permute.xlu1 %1797 }
 0x2f5   :  { %v6555_v13 = vpop.f32.mrf.mxu0  ;;  %6600 = vmatmul.mubr.msk.f32.gmra.mxu1 %vm1315_vm4, %v1287_v7 }
 0x2f6   :  { %v1288_v14 = vmax.f32 %v8042_v12, 0.0  ;;  %v8049_v16 = vadd.f32 %v6555_v13, %v7954_v22 }
 0x2f7   :  { %v1195_v18 = vpop.f32.mrf.mxu0 }
 0x2f8   :  { %v8052_v19 = vadd.f32 %v7954_v22, %v1195_v18  ;;  %6602 = vmatprep.mubr.msk.f32.mxu1 %vm1315_vm4, %v1288_v14  ;;  %v1291_v25 = vmax.f32 %v8049_v16, 0.0 }
 0x2f9   :  { %v6558_v20 = vpop.f32.mrf.mxu0  ;;  %6603 = vmatmul.mubr.msk.f32.gmra.mxu1 %vm1315_vm4, %v1289_v15 }
 0x2fa   :  { %v1290_v23 = vmax.f32 %v8052_v19, 0.0  ;;  %v8061_v27 = vadd.f32 %v6558_v20, %v7954_v22 }
 0x2fb   :  { %v1205_v28 = vpop.f32.mrf.mxu0 }
 0x2fc   :  { %v8067_v31 = vadd.f32 %v7954_v22, %v1205_v28  ;;  %6605 = vmatprep.mubr.msk.f32.mxu1 %vm1315_vm4, %v1290_v23  ;;  %v1293_v35 = vmax.f32 %v8061_v27, 0.0  ;;  %v8135_v28 = vpop.permute.xlu0 %1803 }
 0x2fd   :  { %v6561_v33 = vpop.f32.mrf.mxu0  ;;  %6606 = vmatmul.mubr.msk.f32.gmra.mxu1 %vm1315_vm4, %v1291_v25  ;;  %v8133_v25 = vpop.xlane.xlu1 %2176 }
 0x2fe   :  { %v1292_v34 = vmax.f32 %v8067_v31, 0.0  ;;  %1845 = vrot.lane.b32.xlu1 %v1757_v29, %s7105_s21  ;;  %v8075_v37 = vadd.f32 %v6561_v33, %v7954_v22 }
 0x2ff   :  { %v1215_v40 = vpop.f32.mrf.mxu0 }
 0x300   :  { %v8082_v39 = vadd.f32 %v7954_v22, %v1215_v40  ;;  %6608 = vmatprep.mubr.msk.f32.mxu1 %vm1315_vm4, %v1292_v34  ;;  %v1295_v47 = vmax.f32 %v8075_v37, 0.0 }
 0x301   :  { %v6564_v44 = vpop.f32.mrf.mxu0  ;;  %6609 = vmatmul.mubr.msk.f32.gmra.mxu1 %vm1315_vm4, %v1293_v35 }
 0x302   :  { %v1294_v46 = vmax.f32 %v8082_v39, 0.0  ;;  %v8089_v48 = vadd.f32 %v6564_v44, %v7954_v22 }
 0x303   :  { %v1225_v49 = vpop.f32.mrf.mxu0 }
 0x304   :  { %v8095_v52 = vadd.f32 %v7954_v22, %v1225_v49  ;;  %6611 = vmatprep.mubr.msk.f32.mxu1 %vm1315_vm4, %v1294_v46  ;;  %v1297_v59 = vmax.f32 %v8089_v48, 0.0  ;;  %v8147_v46 = vpop.xlane.xlu0 %2185  ;;  %v8154_v49 = vpop.permute.xlu1 %1801 }
 0x305   :  { %v6567_v55 = vpop.f32.mrf.mxu0  ;;  %6612 = vmatmul.mubr.msk.f32.gmra.mxu1 %vm1315_vm4, %v1295_v47 }
 0x306   :  { %v1296_v58 = vmax.f32 %v8095_v52, 0.0  ;;  %1847 = vrot.lane.b32.xlu0 %v1758_v50, %s7105_s21  ;;  %v8107_v61 = vadd.f32 %v6567_v55, %v7954_v22 }
 0x307   :  { %v1235_v63 = vpop.f32.mrf.mxu0 }
 0x308   :  { %v8110_v0 = vadd.f32 %v7954_v22, %v1235_v63  ;;  %6614 = vmatprep.mubr.msk.f32.mxu1 %vm1315_vm4, %v1296_v58  ;;  %v1299_v5 = vmax.f32 %v8107_v61, 0.0  ;;  %v2115_v58 = vld [vmem:[%s10287_s24 + $0xf0] sm:$0xff] }
 0x309   :  { %v6570_v1 = vpop.f32.mrf.mxu0  ;;  %6615 = vmatmul.mubr.msk.f32.gmra.mxu1 %vm1315_vm4, %v1297_v59  ;;  %v8165_v59 = vpop.permute.xlu0 %1807  ;;  %v2154_v63 = vmul.f32 %v7889_v53, %v2115_v58  ;;  %v1761_v58 = vld [vmem:[%s10225_s3 + $0xe0] sm:$0xff] }
 0x30a   :  { %v1298_v17 = vmax.f32 %v8110_v0, 0.0  ;;  %v8119_v6 = vadd.f32 %v6570_v1, %v7954_v22  ;;  %v2116_v1 = vld [vmem:[%s10287_s24 + $0xf8] sm:$0xff] }
 0x30b   :  { %v1245_v7 = vpop.f32.mrf.mxu0 }
 0x30c   :  { %v8124_v13 = vadd.f32 %v7954_v22, %v1245_v7  ;;  %6617 = vmatprep.mubr.msk.f32.mxu1 %vm1315_vm4, %v1298_v17  ;;  %v1301_v18 = vmax.f32 %v8119_v6, 0.0  ;;  %v2247_v7 = vsel %vm2156_vm0, %v2154_v63, 0.0 }
 0x30d   :  { %v6573_v14 = vpop.f32.mrf.mxu0  ;;  %6618 = vmatmul.mubr.msk.f32.gmra.mxu1 %vm1315_vm4, %v1299_v5  ;;  %v2192_v17 = vpop.xlane.xlu0 %2191  ;;  %v2155_v5 = vmul.f32 %v7889_v53, %v2116_v1  ;;  %v1759_v53 = vld [vmem:[%s10225_s3 + $0xd0] sm:$0xff] }
 0x30e   :  { %v1300_v15 = vmax.f32 %v8124_v13, 0.0  ;;  %v8131_v20 = vadd.f32 %v6573_v14, %v7954_v22 }
 0x30f   :  { %v1255_v23 = vpop.f32.mrf.mxu0 }
 0x310   :  { %v8138_v29 = vadd.f32 %v7954_v22, %v1255_v23  ;;  %6620 = vmatprep.mubr.msk.f32.mxu1 %vm1315_vm4, %v1300_v15  ;;  %v1303_v35 = vmax.f32 %v8131_v20, 0.0  ;;  %v2250_v15 = vsel %vm2156_vm0, %v2155_v5, 0.0  ;;  %v1762_v5 = vld [vmem:[%s10225_s3 + $0xe8] sm:$0xff] }
 0x311   :  { %v6576_v33 = vpop.f32.mrf.mxu0  ;;  %6621 = vmatmul.mubr.msk.f32.gmra.mxu1 %vm1315_vm4, %v1301_v18  ;;  %v8176_v23 = vpop.permute.xlu0 %1811 }
 0x312   :  { %v1302_v34 = vmax.f32 %v8138_v29, 0.0  ;;  %v8145_v40 = vadd.f32 %v6576_v33, %v7954_v22 }
 0x313   :  { %v1265_v44 = vpop.f32.mrf.mxu0 }
 0x314   :  { %10290 = vst [vmem:[#allocation2_spill] sm:$0xff] %v8145_v40  ;;  %v8150_v47 = vadd.f32 %v7954_v22, %v1265_v44  ;;  %6623 = vmatprep.mubr.msk.f32.mxu1 %vm1315_vm4, %v1302_v34  ;;  %v1305_v55 = vmax.f32 %v8145_v40, 0.0  ;;  %v8163_v22 = vpop.xlane.xlu1 %2182 }
 0x315   :  { %6624 = vmatmul.mubr.msk.f32.gmra.mxu1 %vm1315_vm4, %v1303_v35  ;;  %v2198_v33 = vpop.xlane.xlu0 %2197 }
 0x316   :  { %10291 = vst [vmem:[#allocation3_spill] sm:$0xff] %v8150_v47  ;;  %v1304_v50 = vmax.f32 %v8150_v47, 0.0 }
 0x318   :  { %6626 = vmatprep.mubr.msk.f32.mxu1 %vm1315_vm4, %v1304_v50  ;;  %v8173_v14 = vpop.permute.xlu1 %1805 }
 0x319   :  { %6627 = vmatmul.mubr.msk.f32.gmra.mxu1 %vm1315_vm4, %v1305_v55  ;;  %v8180_v44 = vpop.permute.xlu0 %1815 }
 0x31c   :  { %v2189_v18 = vpop.xlane.xlu1 %2188 }
 0x31d   :  { %v2204_v50 = vpop.xlane.xlu0 %2203 }
 0x320   :  { %v8178_v34 = vpop.permute.xlu1 %1809 }
 0x321   :  { %v8192_v1 = vpop.permute.xlu0 %1819 }
 0x322   :  { %2248 = vadd.xlane.f32.xlu1 %v2247_v7  ;;  %10292 = vst [vmem:[#allocation4_spill] sm:$0xff] %v8192_v1  ;;  %v1760_v7 = vld [vmem:[%s10225_s3 + $0xd8] sm:$0xff] }
 0x324   :  { %v2195_v35 = vpop.xlane.xlu1 %2194 }
 0x325   :  { %2251 = vadd.xlane.f32.xlu0 %v2250_v15  ;;  %v2210_v15 = vpop.xlane.xlu0 %2209 }
 0x328   :  { %v8186_v55 = vpop.permute.xlu1 %1813 }
 0x329   :  { %v8216_v1 = vpop.permute.xlu0 %1823 }
 0x32c   :  { %v2201_v63 = vpop.xlane.xlu1 %2200 }
 0x330   :  { %v8207_v40 = vpop.permute.xlu1 %1817 }
 0x333   :  { %1849 = vrot.lane.b32.xlu1 %v1759_v53, %s7105_s21  ;;  %v1763_v53 = vld [vmem:[%s10225_s3 + $0xf0] sm:$0xff] }
 0x334   :  { %v2207_v47 = vpop.xlane.xlu1 %2206 }
 0x337   :  { %1853 = vrot.lane.b32.xlu1 %v1761_v58, %s7105_s21  ;;  %v2254_v58 = vmul.f32 %v8077_v41, %v7957_v24  ;;  %v2253_v24 = vmul.f32 %v8022_v10, %v7960_v26  ;;  %v2258_v41 = vmul.f32 %v8079_v42, %v7975_v36  ;;  %v2257_v36 = vmul.f32 %v8099_v56, %v7978_v38 }
 0x338   :  { %v2262_v42 = vmul.f32 %v8147_v46, %v8002_v51  ;;  %v2261_v38 = vmul.f32 %v8163_v22, %v8005_v54  ;;  %v2266_v51 = vmul.f32 %v2198_v33, %v8027_v3  ;;  %v2265_v54 = vmul.f32 %v2195_v35, %v8030_v4 }
 0x339   :  { %v2270_v3 = vmul.f32 %v2210_v15, %v8049_v16  ;;  %v2269_v4 = vmul.f32 %v2207_v47, %v8052_v19 }
 0x33b   :  { %1855 = vrot.lane.b32.xlu1 %v1762_v5, %s7105_s21  ;;  %1851 = vrot.lane.b32.xlu0 %v1760_v7, %s7105_s21  ;;  %v1764_v5 = vld [vmem:[%s10225_s3 + $0xf8] sm:$0xff]  ;;  %v2256_v7 = vmul.f32 %v8056_v21, %v7965_v30  ;;  %v2255_v30 = vmul.f32 %v8039_v11, %v7968_v32  ;;  %v2260_v21 = vmul.f32 %v8114_v2, %v7985_v43 }
 0x33c   :  { %v2259_v43 = vmul.f32 %v8133_v25, %v7991_v45  ;;  %v2264_v11 = vmul.f32 %v2192_v17, %v8014_v60  ;;  %v2263_v45 = vmul.f32 %v2189_v18, %v8017_v62  ;;  %v2268_v60 = vmul.f32 %v2204_v50, %v8037_v8 }
 0x33d   :  { %v2267_v8 = vmul.f32 %v2201_v63, %v8042_v12 }
 0x33f   :  { %1857 = vrot.lane.b32.xlu0 %v1763_v53, %s7105_s21  ;;  %2319 = vrot.lane.b32.xlu1 %v2254_v58, %s7106_s23  ;;  %v2216_v53 = vpop.xlane.xlu0 %2215  ;;  %v8226_v58 = vpop.permute.xlu1 %1821 }
 0x340   :  { %v2272_v18 = vmul.f32 %v2216_v53, %v8061_v27 }
 0x343   :  { %1859 = vrot.lane.b32.xlu0 %v1764_v5, %s7105_s21  ;;  %2323 = vrot.lane.b32.xlu1 %v2256_v7, %s7106_s23  ;;  %v2213_v26 = vpop.xlane.xlu1 %2212  ;;  %v8234_v10 = vpop.permute.xlu0 %1827 }
 0x344   :  { %v2271_v12 = vmul.f32 %v2213_v26, %v8067_v31 }
 0x347   :  { %2327 = vrot.lane.b32.xlu1 %v2258_v41, %s7106_s23  ;;  %2317 = vrot.lane.b32.xlu0 %v2253_v24, %s7106_s23  ;;  %v2222_v32 = vpop.xlane.xlu0 %2221  ;;  %v8245_v2 = vpop.permute.xlu1 %1825 }
 0x348   :  { %v2274_v16 = vmul.f32 %v2222_v32, %v8075_v37 }
 0x34b   :  { %2331 = vrot.lane.b32.xlu1 %v2260_v21, %s7106_s23  ;;  %2321 = vrot.lane.b32.xlu0 %v2255_v30, %s7106_s23  ;;  %v2219_v56 = vpop.xlane.xlu1 %2218  ;;  %v8252_v46 = vpop.permute.xlu0 %1831 }
 0x34c   :  { %v2273_v19 = vmul.f32 %v2219_v56, %v8082_v39 }
 0x34f   :  { %2335 = vrot.lane.b32.xlu1 %v2262_v42, %s7106_s23  ;;  %2325 = vrot.lane.b32.xlu0 %v2257_v36, %s7106_s23  ;;  %v2228_v25 = vpop.xlane.xlu0 %2227  ;;  %v8260_v17 = vpop.permute.xlu1 %1829 }
 0x350   :  { %v2276_v27 = vmul.f32 %v2228_v25, %v8089_v48 }
 0x353   :  { %2339 = vrot.lane.b32.xlu1 %v2264_v11, %s7106_s23  ;;  %2329 = vrot.lane.b32.xlu0 %v2259_v43, %s7106_s23  ;;  %v8264_v22 = vpop.permute.xlu0 %1835  ;;  %v2225_v62 = vpop.xlane.xlu1 %2224 }
 0x354   :  { %v2275_v31 = vmul.f32 %v2225_v62, %v8095_v52 }
 0x357   :  { %2343 = vrot.lane.b32.xlu1 %v2266_v51, %s7106_s23  ;;  %2333 = vrot.lane.b32.xlu0 %v2261_v38, %s7106_s23  ;;  %v2234_v33 = vpop.xlane.xlu0 %2233  ;;  %v8274_v35 = vpop.permute.xlu1 %1833 }
 0x358   :  { %v2278_v37 = vmul.f32 %v2234_v33, %v8107_v61 }
 0x35b   :  { %2347 = vrot.lane.b32.xlu1 %v2268_v60, %s7106_s23  ;;  %2337 = vrot.lane.b32.xlu0 %v2263_v45, %s7106_s23  ;;  %v8278_v50 = vpop.permute.xlu0 %1839  ;;  %v2231_v63 = vpop.xlane.xlu1 %2230 }
 0x35c   :  { %v2277_v39 = vmul.f32 %v2231_v63, %v8110_v0  ;;  %v8309_v0 = vld [vmem:[%s10232_s11] ss:$0 sm:$0xff] }
 0x35f   :  { %2351 = vrot.lane.b32.xlu1 %v2270_v3, %s7106_s23  ;;  %2341 = vrot.lane.b32.xlu0 %v2265_v54, %s7106_s23  ;;  %v8286_v47 = vpop.permute.xlu1 %1837  ;;  %v2240_v15 = vpop.xlane.xlu0 %2239 }
 0x360   :  { %v2280_v48 = vmul.f32 %v2240_v15, %v8119_v6 }
 0x363   :  { %2355 = vrot.lane.b32.xlu1 %v2272_v18, %s7106_s23  ;;  %2345 = vrot.lane.b32.xlu0 %v2267_v8, %s7106_s23  ;;  %v2237_v5 = vpop.xlane.xlu1 %2236  ;;  %v8294_v7 = vpop.permute.xlu0 %1843 }
 0x364   :  { %v2279_v24 = vmul.f32 %v2237_v5, %v8124_v13 }
 0x367   :  { %2359 = vrot.lane.b32.xlu1 %v2274_v16, %s7106_s23  ;;  %2349 = vrot.lane.b32.xlu0 %v2269_v4, %s7106_s23  ;;  %v8297_v61 = vpop.permute.xlu1 %1841 }
 0x36b   :  { %2363 = vrot.lane.b32.xlu1 %v2276_v27, %s7106_s23  ;;  %2353 = vrot.lane.b32.xlu0 %v2271_v12, %s7106_s23  ;;  %v2445_v12 = vld [vmem:[%s10233_s13] sm:$0xff]  ;;  %s7107_s13 = smov 120  }
 0x36c   :  { %6629 = vmatprep.subr.mxu0 %v2445_v12 }
 0x36d   :  { %6630 = vmatpush3.msra.mxu0 %v2445_v12 }
 0x36f   :  { %2367 = vrot.lane.b32.xlu1 %v2278_v37, %s7106_s23  ;;  %2357 = vrot.lane.b32.xlu0 %v2273_v19, %s7106_s23 }
 0x373   :  { %2371 = vrot.lane.b32.xlu1 %v2280_v48, %s7106_s23  ;;  %2361 = vrot.lane.b32.xlu0 %v2275_v31, %s7106_s23 }
 0x376   :  { %v2243_v53 = vpop.xlane.xlu1 %2242 }
 0x377   :  { %2365 = vrot.lane.b32.xlu0 %v2277_v39, %s7106_s23  ;;  %v2281_v6 = vmul.f32 %v2243_v53, %v8138_v29 }
 0x379   :  { %v2246_v41 = vpop.xlane.xlu0 %2245 }
 0x37a   :  { %v2282_v52 = vmul.f32 %v2246_v41, %v8131_v20 }
 0x37b   :  { %2369 = vrot.lane.b32.xlu0 %v2279_v24, %s7106_s23 }
 0x37c   :  { %2375 = vrot.lane.b32.xlu1 %v2282_v52, %s7106_s23 }
 0x37f   :  { %2373 = vrot.lane.b32.xlu0 %v2281_v6, %s7106_s23 }
 0x39d   :  { %v6583_v30 = vpop.f32.mrf.mxu0 }
 0x39e   :  { %v8312_v13 = vadd.f32 %v6583_v30, %v8309_v0  ;;  %v8355_v30 = vpop.permute.xlu1 %1845 }
 0x39f   :  { %v1478_v21 = vpop.f32.mrf.mxu0 }
 0x3a0   :  { %v1638_v20 = vmul.f32 0.5, %v8312_v13  ;;  %v8316_v26 = vadd.f32 %v8309_v0, %v1478_v21 }
 0x3a1   :  { %v6586_v36 = vpop.f32.mrf.mxu0 }
 0x3a2   :  { %v1671_v42 = vmul.f32 1.442695, %v1638_v20  ;;  %v1637_v29 = vmul.f32 0.5, %v8316_v26  ;;  %v8320_v32 = vadd.f32 %v6586_v36, %v8309_v0 }
 0x3a3   :  { %v1488_v43 = vpop.f32.mrf.mxu0 }
 0x3a4   :  { %7039 = vpow2.f32 %v1671_v42  ;;  %v1669_v11 = vmul.f32 1.442695, %v1637_v29  ;;  %v1640_v38 = vmul.f32 0.5, %v8320_v32  ;;  %v8324_v51 = vadd.f32 %v8309_v0, %v1488_v43 }
 0x3a5   :  { %v6589_v56 = vpop.f32.mrf.mxu1 }
 0x3a6   :  { %7041 = vpow2.f32 %v1669_v11  ;;  %v1675_v45 = vmul.f32 1.442695, %v1640_v38  ;;  %v1639_v60 = vmul.f32 0.5, %v8324_v51  ;;  %v8328_v25 = vadd.f32 %v6589_v56, %v8309_v0 }
 0x3a7   :  { %v1498_v54 = vpop.f32.mrf.mxu1 }
 0x3a8   :  { %v1673_v3 = vmul.f32 1.442695, %v1639_v60  ;;  %v1642_v62 = vmul.f32 0.5, %v8328_v25  ;;  %v8332_v8 = vadd.f32 %v8309_v0, %v1498_v54  ;;  %7043 = vpow2.f32 %v1675_v45 }
 0x3a9   :  { %v6592_v18 = vpop.f32.mrf.mxu1 }
 0x3aa   :  { %7045 = vpow2.f32 %v1673_v3  ;;  %v1679_v33 = vmul.f32 1.442695, %v1642_v62  ;;  %v1641_v4 = vmul.f32 0.5, %v8332_v8  ;;  %v8336_v16 = vadd.f32 %v6592_v18, %v8309_v0 }
 0x3ab   :  { %v1508_v27 = vpop.f32.mrf.mxu1 }
 0x3ac   :  { %v1677_v63 = vmul.f32 1.442695, %v1641_v4  ;;  %v1644_v19 = vmul.f32 0.5, %v8336_v16  ;;  %7047 = vpow2.f32 %v1679_v33  ;;  %v8343_v37 = vadd.f32 %v8309_v0, %v1508_v27  ;;  %v8382_v4 = vpop.permute.xlu0 %1847 }
 0x3ad   :  { %v6595_v15 = vpop.f32.mrf.mxu1 }
 0x3ae   :  { %7049 = vpow2.f32 %v1677_v63  ;;  %v1683_v31 = vmul.f32 1.442695, %v1644_v19  ;;  %v8346_v48 = vadd.f32 %v6595_v15, %v8309_v0  ;;  %v1643_v5 = vmul.f32 0.5, %v8343_v37 }
 0x3af   :  { %v1518_v39 = vpop.f32.mrf.mxu1 }
 0x3b0   :  { %v1646_v24 = vmul.f32 0.5, %v8346_v48  ;;  %v8351_v41 = vadd.f32 %v8309_v0, %v1518_v39  ;;  %7051 = vpow2.f32 %v1683_v31  ;;  %v1681_v52 = vmul.f32 1.442695, %v1643_v5 }
 0x3b1   :  { %v8353_v53 = vpop.eup %7039  ;;  %v6598_v6 = vpop.f32.mrf.mxu1 }
 0x3b2   :  { %10293 = vst [vmem:[#allocation5_spill] sm:$0xff] %v8353_v53  ;;  %v1687_v21 = vmul.f32 1.442695, %v1646_v24  ;;  %v1645_v20 = vmul.f32 0.5, %v8351_v41  ;;  %v8359_v36 = vadd.f32 %v6598_v6, %v8309_v0  ;;  %v1894_v42 = vmul.f32 %v8353_v53, %v8101_v57  ;;  %v8374_v57 = vpop.xlane.xlu1 %2248 }
 0x3b3   :  { %v8363_v29 = vpop.eup %7041  ;;  %7053 = vpow2.f32 %v1681_v52  ;;  %v1528_v43 = vpop.f32.mrf.mxu1 }
 0x3b4   :  { %10294 = vst [vmem:[#allocation6_spill] sm:$0xff] %v8363_v29  ;;  %v1685_v11 = vmul.f32 1.442695, %v1645_v20  ;;  %v1648_v38 = vmul.f32 0.5, %v8359_v36  ;;  %v8367_v56 = vadd.f32 %v8309_v0, %v1528_v43  ;;  %1959 = vrot.lane.b32.xlu1 %v1894_v42, %s7107_s13  ;;  %7055 = vpow2.f32 %v1687_v21  ;;  %v8409_v43 = vpop.xlane.xlu0 %2251 }
 0x3b5   :  { %v6601_v45 = vpop.f32.mrf.mxu1  ;;  %v1893_v60 = vmul.f32 %v8363_v29, %v8121_v9  ;;  %v8372_v54 = vpop.eup %7043 }
 0x3b6   :  { %10295 = vst [vmem:[#allocation7_spill] sm:$0xff] %v8372_v54  ;;  %7057 = vpow2.f32 %v1685_v11  ;;  %v1691_v3 = vmul.f32 1.442695, %v1648_v38  ;;  %v1647_v62 = vmul.f32 0.5, %v8367_v56  ;;  %v8378_v18 = vadd.f32 %v6601_v45, %v8309_v0  ;;  %v8402_v20 = vpop.permute.xlu1 %1849 }
 0x3b7   :  { %v8380_v33 = vpop.eup %7045  ;;  %v1538_v12 = vpop.f32.mrf.mxu1  ;;  %v1896_v31 = vmul.f32 %v8372_v54, %v8135_v28 }
 0x3b8   :  { %10296 = vst [vmem:[#allocation8_spill] sm:$0xff] %v8380_v33  ;;  %v1689_v27 = vmul.f32 1.442695, %v1647_v62  ;;  %v1650_v63 = vmul.f32 0.5, %v8378_v18  ;;  %v8386_v9 = vadd.f32 %v8309_v0, %v1538_v12  ;;  %1957 = vrot.lane.b32.xlu1 %v1893_v60, %s7107_s13  ;;  %7059 = vpow2.f32 %v1691_v3 }
 0x3b9   :  { %v6604_v19 = vpop.f32.mrf.mxu1  ;;  %v1895_v15 = vmul.f32 %v8380_v33, %v8154_v49  ;;  %v8393_v5 = vpop.eup %7047 }
 0x3ba   :  { %10297 = vst [vmem:[#allocation9_spill] sm:$0xff] %v8393_v5  ;;  %7061 = vpow2.f32 %v1689_v27  ;;  %v1695_v39 = vmul.f32 1.442695, %v1650_v63  ;;  %v1649_v24 = vmul.f32 0.5, %v8386_v9  ;;  %v8397_v52 = vadd.f32 %v6604_v19, %v8309_v0 }
 0x3bb   :  { %v8399_v6 = vpop.eup %7049  ;;  %1961 = vrot.lane.b32.xlu0 %v1895_v15, %s7107_s13  ;;  %v1548_v21 = vpop.f32.mrf.mxu1  ;;  %v1898_v45 = vmul.f32 %v8393_v5, %v8165_v59 }
 0x3bc   :  { %10298 = vst [vmem:[#allocation10_spill] sm:$0xff] %v8399_v6  ;;  %v1693_v49 = vmul.f32 1.442695, %v1649_v24  ;;  %v1652_v42 = vmul.f32 0.5, %v8397_v52  ;;  %v8406_v28 = vadd.f32 %v8309_v0, %v1548_v21  ;;  %1963 = vrot.lane.b32.xlu1 %v1896_v31, %s7107_s13  ;;  %7063 = vpow2.f32 %v1695_v39  ;;  %v8435_v21 = vpop.permute.xlu1 %1853 }
 0x3bd   :  { %v6607_v11 = vpop.f32.mrf.mxu1  ;;  %v1897_v38 = vmul.f32 %v8399_v6, %v8173_v14  ;;  %v8415_v60 = vpop.eup %7051 }
 0x3be   :  { %10299 = vst [vmem:[#allocation11_spill] sm:$0xff] %v8415_v60  ;;  %7065 = vpow2.f32 %v1693_v49  ;;  %v1699_v3 = vmul.f32 1.442695, %v1652_v42  ;;  %v1651_v62 = vmul.f32 0.5, %v8406_v28  ;;  %v8419_v12 = vadd.f32 %v6607_v11, %v8309_v0 }
 0x3bf   :  { %1965 = vrot.lane.b32.xlu0 %v1897_v38, %s7107_s13  ;;  %v1558_v27 = vpop.f32.mrf.mxu1  ;;  %v1900_v39 = vmul.f32 %v8415_v60, %v8176_v23 }
 0x3c0   :  { %v8422_v63 = vpop.eup %7053  ;;  %v1697_v19 = vmul.f32 1.442695, %v1651_v62  ;;  %v1654_v14 = vmul.f32 0.5, %v8419_v12  ;;  %v8426_v15 = vadd.f32 %v8309_v0, %v1558_v27  ;;  %1967 = vrot.lane.b32.xlu1 %v1898_v45, %s7107_s13  ;;  %7067 = vpow2.f32 %v1699_v3  ;;  %v8443_v45 = vpop.permute.xlu0 %1851 }
 0x3c1   :  { %10300 = vst [vmem:[#allocation12_spill] sm:$0xff] %v8422_v63  ;;  %v6610_v59 = vpop.f32.mrf.mxu1  ;;  %v1899_v31 = vmul.f32 %v8422_v63, %v8178_v34  ;;  %v8433_v24 = vpop.eup %7055 }
 0x3c2   :  { %10301 = vst [vmem:[#allocation13_spill] sm:$0xff] %v8433_v24  ;;  %7069 = vpow2.f32 %v1697_v19  ;;  %v1703_v49 = vmul.f32 1.442695, %v1654_v14  ;;  %v1653_v42 = vmul.f32 0.5, %v8426_v15  ;;  %v8439_v11 = vadd.f32 %v6610_v59, %v8309_v0 }
 0x3c3   :  { %v8441_v38 = vpop.eup %7057  ;;  %1969 = vrot.lane.b32.xlu0 %v1899_v31, %s7107_s13  ;;  %v1568_v34 = vpop.f32.mrf.mxu1  ;;  %v1902_v14 = vmul.f32 %v8433_v24, %v8180_v44  ;;  %v10305_v24 = vld [vmem:[#allocation4_spill] sm:$0xff] }
 0x3c4   :  { %10302 = vst [vmem:[#allocation14_spill] sm:$0xff] %v8441_v38  ;;  %v1701_v3 = vmul.f32 1.442695, %v1653_v42  ;;  %v1656_v23 = vmul.f32 0.5, %v8439_v11  ;;  %v8448_v62 = vadd.f32 %v8309_v0, %v1568_v34  ;;  %1971 = vrot.lane.b32.xlu1 %v1900_v39, %s7107_s13  ;;  %7071 = vpow2.f32 %v1703_v49  ;;  %v8464_v49 = vpop.permute.xlu1 %1855 }
 0x3c5   :  { %v6613_v27 = vpop.f32.mrf.mxu1  ;;  %v1901_v19 = vmul.f32 %v8441_v38, %v8186_v55  ;;  %v8455_v59 = vpop.eup %7059 }
 0x3c6   :  { %10303 = vst [vmem:[#allocation15_spill] sm:$0xff] %v8455_v59  ;;  %7073 = vpow2.f32 %v1701_v3  ;;  %v1707_v31 = vmul.f32 1.442695, %v1656_v23  ;;  %v1655_v42 = vmul.f32 0.5, %v8448_v62  ;;  %v8459_v60 = vadd.f32 %v6613_v27, %v8309_v0  ;;  %v8471_v3 = vpop.permute.xlu0 %1857 }
 0x3c7   :  { %v8461_v34 = vpop.eup %7061  ;;  %1973 = vrot.lane.b32.xlu0 %v1901_v19, %s7107_s13  ;;  %v1578_v39 = vpop.f32.mrf.mxu1  ;;  %v1904_v19 = vmul.f32 %v8455_v59, %v10305_v24 }
 0x3c8   :  { %10304 = vst [vmem:[#allocation16_spill] sm:$0xff] %v8461_v34  ;;  %v1705_v55 = vmul.f32 1.442695, %v1655_v42  ;;  %v1658_v38 = vmul.f32 0.5, %v8459_v60  ;;  %v8468_v44 = vadd.f32 %v8309_v0, %v1578_v39  ;;  %1975 = vrot.lane.b32.xlu1 %v1902_v14, %s7107_s13  ;;  %7075 = vpow2.f32 %v1707_v31 }
 0x3c9   :  { %v6616_v23 = vpop.f32.mrf.mxu1  ;;  %v1903_v27 = vmul.f32 %v8461_v34, %v8207_v40  ;;  %v8477_v63 = vpop.eup %7063 }
 0x3ca   :  { %10306 = vst [vmem:[#allocation4_spill] sm:$0xff] %v8477_v63  ;;  %7077 = vpow2.f32 %v1705_v55  ;;  %v1711_v42 = vmul.f32 1.442695, %v1658_v38  ;;  %v1657_v5 = vmul.f32 0.5, %v8468_v44  ;;  %v8481_v39 = vadd.f32 %v6616_v23, %v8309_v0 }
 0x3cb   :  { %v8483_v14 = vpop.eup %7065  ;;  %1977 = vrot.lane.b32.xlu0 %v1903_v27, %s7107_s13  ;;  %v1588_v31 = vpop.f32.mrf.mxu1  ;;  %v1906_v55 = vmul.f32 %v8477_v63, %v8216_v1 }
 0x3cc   :  { %10307 = vst [vmem:[#allocation17_spill] sm:$0xff] %v8483_v14  ;;  %v1709_v6 = vmul.f32 1.442695, %v1657_v5  ;;  %v1660_v40 = vmul.f32 0.5, %v8481_v39  ;;  %v8488_v34 = vadd.f32 %v8309_v0, %v1588_v31  ;;  %1979 = vrot.lane.b32.xlu1 %v1904_v19, %s7107_s13  ;;  %7079 = vpow2.f32 %v1711_v42  ;;  %v8497_v27 = vpop.permute.xlu1 %2319  ;;  %v8505_v42 = vpop.permute.xlu0 %1859 }
 0x3cd   :  { %v6619_v24 = vpop.f32.mrf.mxu1  ;;  %v1905_v38 = vmul.f32 %v8483_v14, %v8226_v58  ;;  %v8495_v23 = vpop.eup %7067 }
 0x3ce   :  { %10308 = vst [vmem:[#allocation18_spill] sm:$0xff] %v8495_v23  ;;  %7081 = vpow2.f32 %v1709_v6  ;;  %v1715_v5 = vmul.f32 1.442695, %v1660_v40  ;;  %v1659_v59 = vmul.f32 0.5, %v8488_v34  ;;  %v8501_v31 = vadd.f32 %v6619_v24, %v8309_v0 }
 0x3cf   :  { %v8503_v19 = vpop.eup %7069  ;;  %1981 = vrot.lane.b32.xlu0 %v1905_v38, %s7107_s13  ;;  %v1598_v58 = vpop.f32.mrf.mxu1  ;;  %v1908_v24 = vmul.f32 %v8495_v23, %v8234_v10 }
 0x3d0   :  { %10309 = vst [vmem:[#allocation19_spill] sm:$0xff] %v8503_v19  ;;  %v1713_v14 = vmul.f32 1.442695, %v1659_v59  ;;  %v1662_v1 = vmul.f32 0.5, %v8501_v31  ;;  %v8510_v63 = vadd.f32 %v8309_v0, %v1598_v58  ;;  %1983 = vrot.lane.b32.xlu1 %v1906_v55, %s7107_s13  ;;  %7083 = vpow2.f32 %v1715_v5  ;;  %v8526_v5 = vpop.permute.xlu1 %2323 }
 0x3d1   :  { %v6622_v6 = vpop.f32.mrf.mxu1  ;;  %v1907_v40 = vmul.f32 %v8503_v19, %v8245_v2  ;;  %v8517_v54 = vpop.eup %7071 }
 0x3d2   :  { %10310 = vst [vmem:[#allocation20_spill] sm:$0xff] %v8517_v54  ;;  %7085 = vpow2.f32 %v1713_v14  ;;  %v1719_v38 = vmul.f32 1.442695, %v1662_v1  ;;  %v1661_v59 = vmul.f32 0.5, %v8510_v63  ;;  %v8521_v33 = vadd.f32 %v6622_v6, %v8309_v0  ;;  %v8533_v14 = vpop.permute.xlu0 %2317 }
 0x3d3   :  { %v8523_v58 = vpop.eup %7073  ;;  %1985 = vrot.lane.b32.xlu0 %v1907_v40, %s7107_s13  ;;  %v1608_v55 = vpop.f32.mrf.mxu1  ;;  %v1910_v40 = vmul.f32 %v8517_v54, %v8252_v46 }
 0x3d4   :  { %10311 = vst [vmem:[#allocation21_spill] sm:$0xff] %v8523_v58  ;;  %v1717_v2 = vmul.f32 1.442695, %v1661_v59  ;;  %v1664_v19 = vmul.f32 0.5, %v8521_v33  ;;  %v8530_v10 = vadd.f32 %v8309_v0, %v1608_v55  ;;  %1987 = vrot.lane.b32.xlu1 %v1908_v24, %s7107_s13  ;;  %7087 = vpow2.f32 %v1719_v38 }
 0x3d5   :  { %v6625_v1 = vpop.f32.mrf.mxu1  ;;  %v1909_v6 = vmul.f32 %v8523_v58, %v8260_v17  ;;  %v8539_v23 = vpop.eup %7075 }
 0x3d6   :  { %10312 = vst [vmem:[#allocation22_spill] sm:$0xff] %v8539_v23  ;;  %7089 = vpow2.f32 %v1717_v2  ;;  %v1723_v59 = vmul.f32 1.442695, %v1664_v19  ;;  %v1663_v53 = vmul.f32 0.5, %v8530_v10  ;;  %v8543_v55 = vadd.f32 %v6625_v1, %v8309_v0 }
 0x3d7   :  { %v8545_v24 = vpop.eup %7077  ;;  %1989 = vrot.lane.b32.xlu0 %v1909_v6, %s7107_s13  ;;  %v1618_v38 = vpop.f32.mrf.mxu1  ;;  %v1912_v2 = vmul.f32 %v8539_v23, %v8264_v22 }
 0x3d8   :  { %10313 = vst [vmem:[#allocation23_spill] sm:$0xff] %v8545_v24  ;;  %v1721_v29 = vmul.f32 1.442695, %v1663_v53  ;;  %v1666_v17 = vmul.f32 0.5, %v8543_v55  ;;  %v8550_v58 = vadd.f32 %v8309_v0, %v1618_v38  ;;  %1991 = vrot.lane.b32.xlu1 %v1910_v40, %s7107_s13  ;;  %7091 = vpow2.f32 %v1723_v59  ;;  %v8559_v6 = vpop.permute.xlu1 %2327  ;;  %v8567_v59 = vpop.permute.xlu0 %2321 }
 0x3d9   :  { %v6628_v46 = vpop.f32.mrf.mxu1  ;;  %v1911_v19 = vmul.f32 %v8545_v24, %v8274_v35  ;;  %v8557_v1 = vpop.eup %7079  ;;  %10315 = vst [vmem:[#allocation25_spill] sm:$0xff] %v8559_v6 }
 0x3da   :  { %10314 = vst [vmem:[#allocation24_spill] sm:$0xff] %v8557_v1  ;;  %7093 = vpow2.f32 %v1721_v29  ;;  %v1727_v53 = vmul.f32 1.442695, %v1666_v17  ;;  %v1665_v54 = vmul.f32 0.5, %v8550_v58  ;;  %v8563_v38 = vadd.f32 %v6628_v46, %v8309_v0 }
 0x3db   :  { %v8565_v40 = vpop.eup %7081  ;;  %1993 = vrot.lane.b32.xlu0 %v1911_v19, %s7107_s13  ;;  %v1628_v35 = vpop.f32.mrf.mxu1 }
 0x3dc   :  { %10316 = vst [vmem:[#allocation26_spill] sm:$0xff] %v8565_v40  ;;  %v1725_v24 = vmul.f32 1.442695, %v1665_v54  ;;  %v1668_v22 = vmul.f32 0.5, %v8563_v38  ;;  %v8572_v23 = vadd.f32 %v8309_v0, %v1628_v35  ;;  %1995 = vrot.lane.b32.xlu1 %v1912_v2, %s7107_s13  ;;  %7095 = vpow2.f32 %v1727_v53  ;;  %v8585_v0 = vpop.permute.xlu1 %2331  ;;  %v8590_v53 = vpop.permute.xlu0 %2325 }
 0x3dd   :  { %v1913_v29 = vmul.f32 %v8565_v40, %v8286_v47  ;;  %v8577_v17 = vpop.eup %7083  ;;  %v1914_v54 = vmul.f32 %v8557_v1, %v8278_v50 }
 0x3de   :  { %10317 = vst [vmem:[#allocation27_spill] sm:$0xff] %v8577_v17  ;;  %7097 = vpow2.f32 %v1725_v24  ;;  %v1731_v46 = vmul.f32 1.442695, %v1668_v22  ;;  %v1667_v6 = vmul.f32 0.5, %v8572_v23  ;;  %v1916_v50 = vmul.f32 %v8577_v17, %v8294_v7 }
 0x3df   :  { %v8582_v19 = vpop.eup %7085  ;;  %1997 = vrot.lane.b32.xlu0 %v1913_v29, %s7107_s13 }
 0x3e0   :  { %10318 = vst [vmem:[#allocation28_spill] sm:$0xff] %v8582_v19  ;;  %v1729_v2 = vmul.f32 1.442695, %v1667_v6  ;;  %1999 = vrot.lane.b32.xlu1 %v1914_v54, %s7107_s13  ;;  %v1915_v47 = vmul.f32 %v8582_v19, %v8297_v61  ;;  %7099 = vpow2.f32 %v1731_v46  ;;  %v8604_v61 = vpop.permute.xlu1 %2335  ;;  %v8610_v54 = vpop.permute.xlu0 %2329 }
 0x3e1   :  { %v8592_v24 = vpop.eup %7087 }
 0x3e2   :  { %10319 = vst [vmem:[#allocation29_spill] sm:$0xff] %v8592_v24  ;;  %7101 = vpow2.f32 %v1729_v2  ;;  %v1918_v29 = vmul.f32 %v8592_v24, %v8382_v4 }
 0x3e3   :  { %v8596_v35 = vpop.eup %7089  ;;  %2001 = vrot.lane.b32.xlu0 %v1915_v47, %s7107_s13 }
 0x3e4   :  { %10320 = vst [vmem:[#allocation30_spill] sm:$0xff] %v8596_v35  ;;  %2003 = vrot.lane.b32.xlu1 %v1916_v50, %s7107_s13  ;;  %v1917_v6 = vmul.f32 %v8596_v35, %v8355_v30  ;;  %v8623_v4 = vpop.permute.xlu1 %2339 }
 0x3e5   :  { %v8602_v22 = vpop.eup %7091 }
 0x3e6   :  { %10321 = vst [vmem:[#allocation31_spill] sm:$0xff] %v8602_v22  ;;  %v1920_v30 = vmul.f32 %v8602_v22, %v8443_v45 }
 0x3e7   :  { %v8608_v46 = vpop.eup %7093  ;;  %2005 = vrot.lane.b32.xlu0 %v1917_v6, %s7107_s13  ;;  %v8628_v6 = vpop.permute.xlu0 %2333 }
 0x3e8   :  { %10322 = vst [vmem:[#allocation32_spill] sm:$0xff] %v8608_v46  ;;  %2007 = vrot.lane.b32.xlu1 %v1918_v29, %s7107_s13  ;;  %v1919_v7 = vmul.f32 %v8608_v46, %v8402_v20 }
 0x3e9   :  { %v8616_v2 = vpop.eup %7095 }
 0x3ea   :  { %10323 = vst [vmem:[#allocation33_spill] sm:$0xff] %v8616_v2  ;;  %v1922_v20 = vmul.f32 %v8616_v2, %v8464_v49  ;;  %v10327_v49 = vld [vmem:[#allocation3_spill] sm:$0xff] }
 0x3eb   :  { %v8620_v47 = vpop.eup %7097  ;;  %2009 = vrot.lane.b32.xlu0 %v1919_v7, %s7107_s13  ;;  %v8640_v7 = vpop.permute.xlu1 %2343  ;;  %v2283_v2 = vmul.f32 %v8374_v57, %v10327_v49 }
 0x3ec   :  { %10324 = vst [vmem:[#allocation34_spill] sm:$0xff] %v8620_v47  ;;  %2011 = vrot.lane.b32.xlu1 %v1920_v30, %s7107_s13  ;;  %v1921_v50 = vmul.f32 %v8620_v47, %v8435_v21  ;;  %v8644_v30 = vpop.permute.xlu0 %2337 }
 0x3ed   :  { %v8630_v29 = vpop.eup %7099 }
 0x3ee   :  { %10325 = vst [vmem:[#allocation35_spill] sm:$0xff] %v8630_v29  ;;  %v1924_v21 = vmul.f32 %v8630_v29, %v8505_v42 }
 0x3ef   :  { %v8634_v46 = vpop.eup %7101  ;;  %2013 = vrot.lane.b32.xlu0 %v1921_v50, %s7107_s13  ;;  %v10328_v50 = vld [vmem:[#allocation2_spill] sm:$0xff] }
 0x3f0   :  { %10326 = vst [vmem:[#allocation36_spill] sm:$0xff] %v8634_v46  ;;  %2015 = vrot.lane.b32.xlu1 %v1922_v20, %s7107_s13  ;;  %v1923_v45 = vmul.f32 %v8634_v46, %v8471_v3  ;;  %v2284_v20 = vmul.f32 %v8409_v43, %v10328_v50  ;;  %v8653_v3 = vpop.permute.xlu1 %2347  ;;  %v8656_v46 = vpop.permute.xlu0 %2341 }
 0x3f3   :  { %2017 = vrot.lane.b32.xlu0 %v1923_v45, %s7107_s13 }
 0x3f4   :  { %2019 = vrot.lane.b32.xlu1 %v1924_v21, %s7107_s13  ;;  %v8662_v42 = vpop.permute.xlu1 %2351  ;;  %v8664_v57 = vpop.permute.xlu0 %2345 }
 0x3f7   :  { %2377 = vrot.lane.b32.xlu0 %v2283_v2, %s7106_s23 }
 0x3f8   :  { %2379 = vrot.lane.b32.xlu1 %v2284_v20, %s7106_s23  ;;  %v8672_v43 = vpop.permute.xlu1 %2355  ;;  %v8676_v2 = vpop.permute.xlu0 %2349 }
 0x3fb   :  { %5070 = vrot.lane.b32.xlu0 %v8316_v26, %s7108_s10 }
 0x3fc   :  { %5072 = vrot.lane.b32.xlu1 %v8312_v13, %s7108_s10  ;;  %v8682_v45 = vpop.permute.xlu1 %2359  ;;  %v8684_v21 = vpop.permute.xlu0 %2353 }
 0x3ff   :  { %5074 = vrot.lane.b32.xlu0 %v8324_v51, %s7108_s10 }
 0x400   :  { %5076 = vrot.lane.b32.xlu1 %v8320_v32, %s7108_s10  ;;  %v8692_v49 = vpop.permute.xlu1 %2363  ;;  %v8696_v50 = vpop.permute.xlu0 %2357 }
 0x403   :  { %5078 = vrot.lane.b32.xlu0 %v8332_v8, %s7108_s10 }
 0x404   :  { %5080 = vrot.lane.b32.xlu1 %v8328_v25, %s7108_s10  ;;  %v8702_v20 = vpop.permute.xlu1 %2367  ;;  %v8704_v29 = vpop.permute.xlu0 %2361 }
 0x407   :  { %5082 = vrot.lane.b32.xlu0 %v8343_v37, %s7108_s10 }
 0x408   :  { %5084 = vrot.lane.b32.xlu1 %v8336_v16, %s7108_s10  ;;  %v8712_v47 = vpop.permute.xlu1 %2371  ;;  %v8716_v22 = vpop.permute.xlu0 %2365 }
 0x409   :  { %10329 = vst [vmem:[#allocation3_spill] sm:$0xff] %v8712_v47 }
 0x40b   :  { %5086 = vrot.lane.b32.xlu0 %v8351_v41, %s7108_s10 }
 0x40c   :  { %5088 = vrot.lane.b32.xlu1 %v8346_v48, %s7108_s10  ;;  %v8722_v24 = vpop.permute.xlu1 %2375  ;;  %v8724_v35 = vpop.permute.xlu0 %2369 }
 0x40d   :  { %10330 = vst [vmem:[#allocation2_spill] sm:$0xff] %v8722_v24  ;;  %10331 = vst [vmem:[#allocation37_spill] sm:$0xff] %v8724_v35 }
 0x40f   :  { %5090 = vrot.lane.b32.xlu0 %v8367_v56, %s7108_s10 }
 0x410   :  { %5092 = vrot.lane.b32.xlu1 %v8359_v36, %s7108_s10  ;;  %v8734_v19 = vpop.permute.xlu0 %2373 }
 0x411   :  { %10332 = vst [vmem:[#allocation38_spill] sm:$0xff] %v8734_v19 }
 0x413   :  { %5094 = vrot.lane.b32.xlu0 %v8386_v9, %s7108_s10 }
 0x414   :  { %5096 = vrot.lane.b32.xlu1 %v8378_v18, %s7108_s10 }
 0x417   :  { %5098 = vrot.lane.b32.xlu0 %v8406_v28, %s7108_s10 }
 0x418   :  { %5100 = vrot.lane.b32.xlu1 %v8397_v52, %s7108_s10 }
 0x41b   :  { %5102 = vrot.lane.b32.xlu0 %v8426_v15, %s7108_s10 }
 0x41c   :  { %5104 = vrot.lane.b32.xlu1 %v8419_v12, %s7108_s10 }
 0x41f   :  { %5106 = vrot.lane.b32.xlu0 %v8448_v62, %s7108_s10 }
 0x420   :  { %5108 = vrot.lane.b32.xlu1 %v8439_v11, %s7108_s10 }
 0x423   :  { %5110 = vrot.lane.b32.xlu0 %v8468_v44, %s7108_s10 }
 0x424   :  { %5112 = vrot.lane.b32.xlu1 %v8459_v60, %s7108_s10 }
 0x426   :  { %v1960_v17 = vpop.permute.xlu1 %1959 }
 0x427   :  { %5114 = vrot.lane.b32.xlu0 %v8488_v34, %s7108_s10  ;;  %v8737_v1 = vadd.f32 %v1960_v17, %v8312_v13 }
 0x428   :  { %5116 = vrot.lane.b32.xlu1 %v8481_v39, %s7108_s10 }
 0x429   :  { %v2414_v19 = vadd.f32 %v8497_v27, %v8737_v1 }
 0x42a   :  { %v1958_v24 = vpop.permute.xlu1 %1957 }
 0x42b   :  { %5118 = vrot.lane.b32.xlu0 %v8510_v63, %s7108_s10  ;;  %v8742_v40 = vadd.f32 %v1958_v24, %v8316_v26 }
 0x42c   :  { %5120 = vrot.lane.b32.xlu1 %v8501_v31, %s7108_s10 }
 0x42d   :  { %v2413_v47 = vadd.f32 %v8533_v14, %v8742_v40  ;;  %v1962_v35 = vpop.permute.xlu0 %1961 }
 0x42e   :  { %v8751_v13 = vadd.f32 %v1962_v35, %v8324_v51  ;;  %v1964_v17 = vpop.permute.xlu1 %1963 }
 0x42f   :  { %5122 = vrot.lane.b32.xlu0 %v8530_v10, %s7108_s10  ;;  %v8756_v26 = vadd.f32 %v1964_v17, %v8320_v32  ;;  %6631 = vmatprep.mubr.msk.f32.mxu0 %vm2156_vm0, %v2413_v47 }
 0x430   :  { %v2415_v24 = vadd.f32 %v8567_v59, %v8751_v13  ;;  %5124 = vrot.lane.b32.xlu1 %v8521_v33, %s7108_s10  ;;  %6632 = vmatmul.mubr.msk.f32.vlgmr.msra.gmra.mxu0 %vm2156_vm0, %v2414_v19 }
 0x431   :  { %v2416_v51 = vadd.f32 %v8526_v5, %v8756_v26  ;;  %v1966_v27 = vpop.permute.xlu0 %1965 }
 0x432   :  { %v8767_v14 = vadd.f32 %v1966_v27, %v8332_v8  ;;  %6634 = vmatprep.mubr.msk.f32.mxu0 %vm2156_vm0, %v2415_v24  ;;  %v1968_v32 = vpop.permute.xlu1 %1967  ;;  %v10333_v8 = vld [vmem:[#allocation25_spill] sm:$0xff] }
 0x433   :  { %5126 = vrot.lane.b32.xlu0 %v8550_v58, %s7108_s10  ;;  %v8773_v59 = vadd.f32 %v1968_v32, %v8328_v25  ;;  %v3023_v32 = vld [vmem:[%s10234_s14] sm:$0xff]  ;;  %s7109_s14 = smov 80  }
 0x434   :  { %v2417_v35 = vadd.f32 %v8590_v53, %v8767_v14  ;;  %5128 = vrot.lane.b32.xlu1 %v8543_v55, %s7108_s10  ;;  %6635 = vmatmul.mubr.msk.f32.gmra.mxu0 %vm2156_vm0, %v2416_v51 }
 0x435   :  { %v2418_v5 = vadd.f32 %v10333_v8, %v8773_v59  ;;  %v1970_v19 = vpop.permute.xlu0 %1969  ;;  %6727 = vmatprep.subr.mxu1 %v3023_v32 }
 0x436   :  { %v8783_v47 = vadd.f32 %v1970_v19, %v8343_v37  ;;  %6637 = vmatprep.mubr.msk.f32.mxu0 %vm2156_vm0, %v2417_v35  ;;  %v1972_v17 = vpop.permute.xlu1 %1971  ;;  %v10335_v35 = vld [vmem:[#allocation5_spill] sm:$0xff]  ;;  %6728 = vmatpush3.msra.mxu1 %v3023_v32  ;;  %v10336_v19 = vld [vmem:[#allocation8_spill] sm:$0xff] }
 0x437   :  { %5130 = vrot.lane.b32.xlu0 %v8572_v23, %s7108_s10  ;;  %v8789_v25 = vadd.f32 %v1972_v17, %v8336_v16  ;;  %v10334_v16 = vld [vmem:[#allocation6_spill] sm:$0xff] }
 0x438   :  { %v2419_v53 = vadd.f32 %v8610_v54, %v8783_v47  ;;  %5132 = vrot.lane.b32.xlu1 %v8563_v38, %s7108_s10  ;;  %6638 = vmatmul.mubr.msk.f32.gmra.mxu0 %vm2156_vm0, %v2418_v5 }
 0x439   :  { %v2420_v37 = vadd.f32 %v8585_v0, %v8789_v25  ;;  %v1974_v24 = vpop.permute.xlu0 %1973 }
 0x43a   :  { %v8799_v51 = vadd.f32 %v1974_v24, %v8351_v41  ;;  %6640 = vmatprep.mubr.msk.f32.mxu0 %vm2156_vm0, %v2419_v53  ;;  %v1976_v27 = vpop.permute.xlu1 %1975 }
 0x43b   :  { %5198 = vrot.lane.b32.xlu0 %v10334_v16, %s7108_s10  ;;  %v8805_v54 = vadd.f32 %v1976_v27, %v8346_v48  ;;  %v10339_v16 = vld [vmem:[#allocation9_spill] sm:$0xff] }
 0x43c   :  { %v2421_v0 = vadd.f32 %v8628_v6, %v8799_v51  ;;  %5200 = vrot.lane.b32.xlu1 %v10335_v35, %s7108_s10  ;;  %6641 = vmatmul.mubr.msk.f32.gmra.mxu0 %vm2156_vm0, %v2420_v37 }
 0x43d   :  { %v2422_v41 = vadd.f32 %v8604_v61, %v8805_v54  ;;  %v1978_v8 = vpop.permute.xlu0 %1977  ;;  %v10337_v61 = vld [vmem:[#allocation7_spill] sm:$0xff] }
 0x43e   :  { %v8818_v48 = vadd.f32 %v1978_v8, %v8367_v56  ;;  %6643 = vmatprep.mubr.msk.f32.mxu0 %vm2156_vm0, %v2421_v0  ;;  %v1980_v5 = vpop.permute.xlu1 %1979 }
 0x43f   :  { %5202 = vrot.lane.b32.xlu0 %v10336_v19, %s7108_s10  ;;  %v8824_v6 = vadd.f32 %v1980_v5, %v8359_v36  ;;  %v10338_v36 = vld [vmem:[#allocation10_spill] sm:$0xff] }
 0x440   :  { %v2423_v17 = vadd.f32 %v8644_v30, %v8818_v48  ;;  %5204 = vrot.lane.b32.xlu1 %v10337_v61, %s7108_s10  ;;  %6644 = vmatmul.mubr.msk.f32.gmra.mxu0 %vm2156_vm0, %v2422_v41  ;;  %v10341_v41 = vld [vmem:[#allocation11_spill] sm:$0xff] }
 0x441   :  { %v2424_v56 = vadd.f32 %v8623_v4, %v8824_v6  ;;  %v1982_v53 = vpop.permute.xlu0 %1981 }
 0x442   :  { %v8834_v37 = vadd.f32 %v1982_v53, %v8386_v9  ;;  %6646 = vmatprep.mubr.msk.f32.mxu0 %vm2156_vm0, %v2423_v17  ;;  %v1984_v24 = vpop.permute.xlu1 %1983  ;;  %v10343_v17 = vld [vmem:[#allocation13_spill] sm:$0xff] }
 0x443   :  { %5206 = vrot.lane.b32.xlu0 %v10338_v36, %s7108_s10  ;;  %v8840_v30 = vadd.f32 %v1984_v24, %v8378_v18  ;;  %v10340_v18 = vld [vmem:[#allocation12_spill] sm:$0xff]  ;;  %v10345_v24 = vld [vmem:[#allocation15_spill] sm:$0xff] }
 0x444   :  { %v2425_v27 = vadd.f32 %v8656_v46, %v8834_v37  ;;  %5208 = vrot.lane.b32.xlu1 %v10339_v16, %s7108_s10  ;;  %6647 = vmatmul.mubr.msk.f32.gmra.mxu0 %vm2156_vm0, %v2424_v56 }
 0x445   :  { %v2426_v9 = vadd.f32 %v8640_v7, %v8840_v30  ;;  %v1986_v4 = vpop.permute.xlu0 %1985 }
 0x446   :  { %v8850_v32 = vadd.f32 %v1986_v4, %v8406_v28  ;;  %6649 = vmatprep.mubr.msk.f32.mxu0 %vm2156_vm0, %v2425_v27  ;;  %v1988_v0 = vpop.permute.xlu1 %1987 }
 0x447   :  { %5210 = vrot.lane.b32.xlu0 %v10340_v18, %s7108_s10  ;;  %v8856_v46 = vadd.f32 %v1988_v0, %v8397_v52  ;;  %v10342_v52 = vld [vmem:[#allocation14_spill] sm:$0xff] }
 0x448   :  { %v2427_v35 = vadd.f32 %v8664_v57, %v8850_v32  ;;  %5212 = vrot.lane.b32.xlu1 %v10341_v41, %s7108_s10  ;;  %6650 = vmatmul.mubr.msk.f32.gmra.mxu0 %vm2156_vm0, %v2426_v9  ;;  %v10347_v9 = vld [vmem:[#allocation4_spill] sm:$0xff] }
 0x449   :  { %v2428_v28 = vadd.f32 %v8653_v3, %v8856_v46  ;;  %v1990_v7 = vpop.permute.xlu0 %1989 }
 0x44a   :  { %v8866_v8 = vadd.f32 %v1990_v7, %v8426_v15  ;;  %6652 = vmatprep.mubr.msk.f32.mxu0 %vm2156_vm0, %v2427_v35  ;;  %v1992_v5 = vpop.permute.xlu1 %1991  ;;  %v10349_v35 = vld [vmem:[#allocation18_spill] sm:$0xff] }
 0x44b   :  { %5214 = vrot.lane.b32.xlu0 %v10342_v52, %s7108_s10  ;;  %v8872_v57 = vadd.f32 %v1992_v5, %v8419_v12  ;;  %v10344_v12 = vld [vmem:[#allocation16_spill] sm:$0xff] }
 0x44c   :  { %v2429_v19 = vadd.f32 %v8676_v2, %v8866_v8  ;;  %5216 = vrot.lane.b32.xlu1 %v10343_v17, %s7108_s10  ;;  %6653 = vmatmul.mubr.msk.f32.gmra.mxu0 %vm2156_vm0, %v2428_v28  ;;  %v10351_v5 = vld [vmem:[#allocation20_spill] sm:$0xff]  ;;  %v10353_v17 = vld [vmem:[#allocation37_spill] sm:$0xff] }
 0x44d   :  { %v2430_v15 = vadd.f32 %v8662_v42, %v8872_v57  ;;  %v1994_v3 = vpop.permute.xlu0 %1993 }
 0x44e   :  { %v8882_v61 = vadd.f32 %v1994_v3, %v8448_v62  ;;  %6655 = vmatprep.mubr.msk.f32.mxu0 %vm2156_vm0, %v2429_v19  ;;  %v1996_v56 = vpop.permute.xlu1 %1995  ;;  %v10354_v3 = vld [vmem:[#allocation22_spill] sm:$0xff] }
 0x44f   :  { %5218 = vrot.lane.b32.xlu0 %v10344_v12, %s7108_s10  ;;  %v8888_v2 = vadd.f32 %v1996_v56, %v8439_v11  ;;  %v10346_v11 = vld [vmem:[#allocation17_spill] sm:$0xff] }
 0x450   :  { %v2431_v53 = vadd.f32 %v8684_v21, %v8882_v61  ;;  %5220 = vrot.lane.b32.xlu1 %v10345_v24, %s7108_s10  ;;  %6656 = vmatmul.mubr.msk.f32.gmra.mxu0 %vm2156_vm0, %v2430_v15 }
 0x451   :  { %v2432_v62 = vadd.f32 %v8672_v43, %v8888_v2  ;;  %v1998_v42 = vpop.permute.xlu0 %1997 }
 0x452   :  { %v8898_v36 = vadd.f32 %v1998_v42, %v8468_v44  ;;  %6658 = vmatprep.mubr.msk.f32.mxu0 %vm2156_vm0, %v2431_v53  ;;  %v2000_v27 = vpop.permute.xlu1 %1999 }
 0x453   :  { %5222 = vrot.lane.b32.xlu0 %v10346_v11, %s7108_s10  ;;  %v8904_v21 = vadd.f32 %v2000_v27, %v8459_v60  ;;  %v10348_v60 = vld [vmem:[#allocation19_spill] sm:$0xff]  ;;  %v10358_v27 = vld [vmem:[#allocation24_spill] sm:$0xff] }
 0x454   :  { %v2433_v16 = vadd.f32 %v8696_v50, %v8898_v36  ;;  %5224 = vrot.lane.b32.xlu1 %v10347_v9, %s7108_s10  ;;  %6659 = vmatmul.mubr.msk.f32.gmra.mxu0 %vm2156_vm0, %v2432_v62  ;;  %v10357_v62 = vld [vmem:[#allocation38_spill] sm:$0xff] }
 0x455   :  { %v2434_v44 = vadd.f32 %v8682_v45, %v8904_v21  ;;  %v2002_v43 = vpop.permute.xlu0 %2001 }
 0x456   :  { %v8914_v4 = vadd.f32 %v2002_v43, %v8488_v34  ;;  %6661 = vmatprep.mubr.msk.f32.mxu0 %vm2156_vm0, %v2433_v16  ;;  %v2004_v0 = vpop.permute.xlu1 %2003  ;;  %v10361_v43 = vld [vmem:[#allocation27_spill] sm:$0xff] }
 0x457   :  { %5226 = vrot.lane.b32.xlu0 %v10348_v60, %s7108_s10  ;;  %v8920_v50 = vadd.f32 %v2004_v0, %v8481_v39  ;;  %v10350_v39 = vld [vmem:[#allocation21_spill] sm:$0xff] }
 0x458   :  { %v2435_v18 = vadd.f32 %v8704_v29, %v8914_v4  ;;  %5228 = vrot.lane.b32.xlu1 %v10349_v35, %s7108_s10  ;;  %6662 = vmatmul.mubr.msk.f32.gmra.mxu0 %vm2156_vm0, %v2434_v44  ;;  %v10360_v44 = vld [vmem:[#allocation28_spill] sm:$0xff] }
 0x459   :  { %v2436_v34 = vadd.f32 %v8692_v49, %v8920_v50  ;;  %v2006_v45 = vpop.permute.xlu0 %2005 }
 0x45a   :  { %v8930_v41 = vadd.f32 %v2006_v45, %v8510_v63  ;;  %6664 = vmatprep.mubr.msk.f32.mxu0 %vm2156_vm0, %v2435_v18  ;;  %v2008_v28 = vpop.permute.xlu1 %2007 }
 0x45b   :  { %5230 = vrot.lane.b32.xlu0 %v10350_v39, %s7108_s10  ;;  %v8936_v29 = vadd.f32 %v2008_v28, %v8501_v31  ;;  %v10352_v31 = vld [vmem:[#allocation23_spill] sm:$0xff]  ;;  %v10366_v39 = vld [vmem:[#allocation34_spill] sm:$0xff] }
 0x45c   :  { %v2437_v7 = vadd.f32 %v8716_v22, %v8930_v41  ;;  %5232 = vrot.lane.b32.xlu1 %v10351_v5, %s7108_s10  ;;  %6665 = vmatmul.mubr.msk.f32.gmra.mxu0 %vm2156_vm0, %v2436_v34  ;;  %v10362_v34 = vld [vmem:[#allocation30_spill] sm:$0xff]  ;;  %v10365_v28 = vld [vmem:[#allocation31_spill] sm:$0xff]  ;;  %v10368_v5 = vld [vmem:[#allocation36_spill] sm:$0xff] }
 0x45d   :  { %v2438_v63 = vadd.f32 %v8702_v20, %v8936_v29  ;;  %v2010_v49 = vpop.permute.xlu0 %2009 }
 0x45e   :  { %v8946_v52 = vadd.f32 %v2010_v49, %v8530_v10  ;;  %6667 = vmatprep.mubr.msk.f32.mxu0 %vm2156_vm0, %v2437_v7  ;;  %v2012_v19 = vpop.permute.xlu1 %2011  ;;  %v10355_v10 = vld [vmem:[#allocation3_spill] sm:$0xff]  ;;  %v10367_v7 = vld [vmem:[#allocation33_spill] sm:$0xff] }
 0x45f   :  { %5234 = vrot.lane.b32.xlu0 %v10352_v31, %s7108_s10  ;;  %v8952_v22 = vadd.f32 %v2012_v19, %v8521_v33  ;;  %v10356_v33 = vld [vmem:[#allocation26_spill] sm:$0xff] }
 0x460   :  { %v2439_v15 = vadd.f32 %v10353_v17, %v8946_v52  ;;  %5236 = vrot.lane.b32.xlu1 %v10354_v3, %s7108_s10  ;;  %6668 = vmatmul.mubr.msk.f32.gmra.mxu0 %vm2156_vm0, %v2438_v63  ;;  %v10369_v63 = vld [vmem:[#allocation35_spill] sm:$0xff] }
 0x461   :  { %v2440_v20 = vadd.f32 %v10355_v10, %v8952_v22  ;;  %v2014_v56 = vpop.permute.xlu0 %2013 }
 0x462   :  { %v8962_v12 = vadd.f32 %v2014_v56, %v8550_v58  ;;  %6670 = vmatprep.mubr.msk.f32.mxu0 %vm2156_vm0, %v2439_v15  ;;  %v2016_v53 = vpop.permute.xlu1 %2015  ;;  %v10359_v58 = vld [vmem:[#allocation2_spill] sm:$0xff] }
 0x463   :  { %5238 = vrot.lane.b32.xlu0 %v10356_v33, %s7108_s10  ;;  %v8968_v24 = vadd.f32 %v2016_v53, %v8543_v55 }
 0x464   :  { %v2441_v42 = vadd.f32 %v10357_v62, %v8962_v12  ;;  %5240 = vrot.lane.b32.xlu1 %v10358_v27, %s7108_s10  ;;  %6671 = vmatmul.mubr.msk.f32.gmra.mxu0 %vm2156_vm0, %v2440_v20 }
 0x465   :  { %v2442_v11 = vadd.f32 %v10359_v58, %v8968_v24  ;;  %v2018_v16 = vpop.permute.xlu0 %2017 }
 0x466   :  { %6673 = vmatprep.mubr.msk.f32.mxu0 %vm2156_vm0, %v2441_v42  ;;  %v2020_v9 = vpop.permute.xlu1 %2019  ;;  %v8981_v55 = vadd.f32 %v2018_v16, %v8572_v23  ;;  %v10363_v23 = vld [vmem:[#allocation29_spill] sm:$0xff] }
 0x467   :  { %5242 = vrot.lane.b32.xlu0 %v10360_v44, %s7108_s10  ;;  %v8987_v0 = vadd.f32 %v2020_v9, %v8563_v38  ;;  %v10364_v38 = vld [vmem:[#allocation32_spill] sm:$0xff] }
 0x468   :  { %5244 = vrot.lane.b32.xlu1 %v10361_v43, %s7108_s10  ;;  %6674 = vmatmul.mubr.msk.f32.gmra.mxu0 %vm2156_vm0, %v2442_v11 }
 0x469   :  { %v2378_v60 = vpop.permute.xlu0 %2377 }
 0x46a   :  { %v2443_v18 = vadd.f32 %v2378_v60, %v8981_v55  ;;  %v2380_v35 = vpop.permute.xlu1 %2379 }
 0x46b   :  { %5246 = vrot.lane.b32.xlu0 %v10362_v34, %s7108_s10  ;;  %v2444_v45 = vadd.f32 %v2380_v35, %v8987_v0 }
 0x46c   :  { %6676 = vmatprep.mubr.msk.f32.mxu0 %vm2156_vm0, %v2443_v18  ;;  %5248 = vrot.lane.b32.xlu1 %v10363_v23, %s7108_s10 }
 0x46d   :  { %6677 = vmatmul.mubr.msk.f32.gmra.mxu0 %vm2156_vm0, %v2444_v45 }
 0x46e   :  { %6679 = vmatprep.mubr.msk.f32.mxu0 %vm2156_vm0, %v8742_v40 }
 0x46f   :  { %5250 = vrot.lane.b32.xlu0 %v10364_v38, %s7108_s10 }
 0x470   :  { %5252 = vrot.lane.b32.xlu1 %v10365_v28, %s7108_s10 }
 0x471   :  { %6680 = vmatmul.mubr.msk.f32.gmra.mxu0 %vm2156_vm0, %v8737_v1 }
 0x472   :  { %6682 = vmatprep.mubr.msk.f32.mxu0 %vm2156_vm0, %v8751_v13 }
 0x473   :  { %5254 = vrot.lane.b32.xlu0 %v10366_v39, %s7108_s10 }
 0x474   :  { %5256 = vrot.lane.b32.xlu1 %v10367_v7, %s7108_s10 }
 0x475   :  { %6683 = vmatmul.mubr.msk.f32.gmra.mxu0 %vm2156_vm0, %v8756_v26 }
 0x476   :  { %6685 = vmatprep.mubr.msk.f32.mxu0 %vm2156_vm0, %v8767_v14 }
 0x477   :  { %5258 = vrot.lane.b32.xlu0 %v10368_v5, %s7108_s10 }
 0x478   :  { %5260 = vrot.lane.b32.xlu1 %v10369_v63, %s7108_s10 }
 0x479   :  { %6686 = vmatmul.mubr.msk.f32.gmra.mxu0 %vm2156_vm0, %v8773_v59 }
 0x47a   :  { %6688 = vmatprep.mubr.msk.f32.mxu0 %vm2156_vm0, %v8783_v47 }
 0x47b   :  { %5294 = vrot.lane.b32.xlu0 %v8742_v40, %s7109_s14 }
 0x47c   :  { %5296 = vrot.lane.b32.xlu1 %v8737_v1, %s7109_s14  ;;  %v3673_v1 = vld [vmem:[%s10235_s16 + $0x8] sm:$0xff] }
 0x47d   :  { %6689 = vmatmul.mubr.msk.f32.gmra.mxu0 %vm2156_vm0, %v8789_v25  ;;  %6825 = vmatprep.subr.mxu0 %v3673_v1 }
 0x47e   :  { %6691 = vmatprep.mubr.msk.f32.mxu0 %vm2156_vm0, %v8799_v51  ;;  %6826 = vmatpush3.msra.mxu0 %v3673_v1 }
 0x47f   :  { %5298 = vrot.lane.b32.xlu0 %v8751_v13, %s7109_s14  ;;  %v3672_v13 = vld [vmem:[%s10235_s16] sm:$0xff] }
 0x480   :  { %5300 = vrot.lane.b32.xlu1 %v8756_v26, %s7109_s14  ;;  %6827 = vmatprep.subr.mxu0 %v3672_v13 }
 0x481   :  { %6692 = vmatmul.mubr.msk.f32.gmra.mxu0 %vm2156_vm0, %v8805_v54 }
 0x482   :  { %6694 = vmatprep.mubr.msk.f32.mxu0 %vm2156_vm0, %v8818_v48  ;;  %6828 = vmatpush3.msra.mxu0 %v3672_v13 }
 0x483   :  { %5302 = vrot.lane.b32.xlu0 %v8767_v14, %s7109_s14 }
 0x484   :  { %5304 = vrot.lane.b32.xlu1 %v8773_v59, %s7109_s14 }
 0x485   :  { %6695 = vmatmul.mubr.msk.f32.gmra.mxu0 %vm2156_vm0, %v8824_v6 }
 0x486   :  { %6697 = vmatprep.mubr.msk.f32.mxu0 %vm2156_vm0, %v8834_v37 }
 0x487   :  { %5306 = vrot.lane.b32.xlu0 %v8783_v47, %s7109_s14 }
 0x488   :  { %5308 = vrot.lane.b32.xlu1 %v8789_v25, %s7109_s14 }
 0x489   :  { %6698 = vmatmul.mubr.msk.f32.gmra.mxu0 %vm2156_vm0, %v8840_v30 }
 0x48a   :  { %6700 = vmatprep.mubr.msk.f32.mxu0 %vm2156_vm0, %v8850_v32 }
 0x48b   :  { %5310 = vrot.lane.b32.xlu0 %v8799_v51, %s7109_s14 }
 0x48c   :  { %5312 = vrot.lane.b32.xlu1 %v8805_v54, %s7109_s14 }
 0x48d   :  { %6701 = vmatmul.mubr.msk.f32.gmra.mxu0 %vm2156_vm0, %v8856_v46 }
 0x48e   :  { %6703 = vmatprep.mubr.msk.f32.mxu0 %vm2156_vm0, %v8866_v8 }
 0x48f   :  { %5314 = vrot.lane.b32.xlu0 %v8818_v48, %s7109_s14 }
 0x490   :  { %5316 = vrot.lane.b32.xlu1 %v8824_v6, %s7109_s14 }
 0x491   :  { %6704 = vmatmul.mubr.msk.f32.gmra.mxu0 %vm2156_vm0, %v8872_v57 }
 0x492   :  { %6706 = vmatprep.mubr.msk.f32.mxu0 %vm2156_vm0, %v8882_v61 }
 0x493   :  { %5318 = vrot.lane.b32.xlu0 %v8834_v37, %s7109_s14 }
 0x494   :  { %5320 = vrot.lane.b32.xlu1 %v8840_v30, %s7109_s14 }
 0x495   :  { %6707 = vmatmul.mubr.msk.f32.gmra.mxu0 %vm2156_vm0, %v8888_v2 }
 0x496   :  { %6709 = vmatprep.mubr.msk.f32.mxu0 %vm2156_vm0, %v8898_v36 }
 0x497   :  { %5322 = vrot.lane.b32.xlu0 %v8850_v32, %s7109_s14 }
 0x498   :  { %5324 = vrot.lane.b32.xlu1 %v8856_v46, %s7109_s14 }
 0x499   :  { %6710 = vmatmul.mubr.msk.f32.gmra.mxu0 %vm2156_vm0, %v8904_v21 }
 0x49a   :  { %6712 = vmatprep.mubr.msk.f32.mxu0 %vm2156_vm0, %v8914_v4 }
 0x49b   :  { %5326 = vrot.lane.b32.xlu0 %v8866_v8, %s7109_s14 }
 0x49c   :  { %5328 = vrot.lane.b32.xlu1 %v8872_v57, %s7109_s14 }
 0x49d   :  { %6713 = vmatmul.mubr.msk.f32.gmra.mxu0 %vm2156_vm0, %v8920_v50 }
 0x49e   :  { %6715 = vmatprep.mubr.msk.f32.mxu0 %vm2156_vm0, %v8930_v41 }
 0x49f   :  { %5330 = vrot.lane.b32.xlu0 %v8882_v61, %s7109_s14 }
 0x4a0   :  { %5332 = vrot.lane.b32.xlu1 %v8888_v2, %s7109_s14 }
 0x4a1   :  { %6716 = vmatmul.mubr.msk.f32.gmra.mxu0 %vm2156_vm0, %v8936_v29 }
 0x4a2   :  { %6718 = vmatprep.mubr.msk.f32.mxu0 %vm2156_vm0, %v8946_v52 }
 0x4a3   :  { %5334 = vrot.lane.b32.xlu0 %v8898_v36, %s7109_s14 }
 0x4a4   :  { %5336 = vrot.lane.b32.xlu1 %v8904_v21, %s7109_s14 }
 0x4a5   :  { %6719 = vmatmul.mubr.msk.f32.gmra.mxu0 %vm2156_vm0, %v8952_v22 }
 0x4a6   :  { %6721 = vmatprep.mubr.msk.f32.mxu0 %vm2156_vm0, %v8962_v12 }
 0x4a7   :  { %5338 = vrot.lane.b32.xlu0 %v8914_v4, %s7109_s14 }
 0x4a8   :  { %5340 = vrot.lane.b32.xlu1 %v8920_v50, %s7109_s14 }
 0x4a9   :  { %6722 = vmatmul.mubr.msk.f32.gmra.mxu0 %vm2156_vm0, %v8968_v24 }
 0x4aa   :  { %6724 = vmatprep.mubr.msk.f32.mxu0 %vm2156_vm0, %v8981_v55 }
 0x4ab   :  { %5342 = vrot.lane.b32.xlu0 %v8930_v41, %s7109_s14 }
 0x4ac   :  { %5344 = vrot.lane.b32.xlu1 %v8936_v29, %s7109_s14 }
 0x4ad   :  { %6725 = vmatmul.mubr.msk.f32.gmra.mxu0 %vm2156_vm0, %v8987_v0 }
 0x4af   :  { %5346 = vrot.lane.b32.xlu0 %v8946_v52, %s7109_s14 }
 0x4b0   :  { %5348 = vrot.lane.b32.xlu1 %v8952_v22, %s7109_s14 }
 0x4b3   :  { %5350 = vrot.lane.b32.xlu0 %v8962_v12, %s7109_s14 }
 0x4b4   :  { %5352 = vrot.lane.b32.xlu1 %v8968_v24, %s7109_s14 }
 0x4f0   :  { %v6633_v40 = vpop.f32.mrf.mxu0 }
 0x4f2   :  { %v2704_v26 = vpop.f32.mrf.mxu0 }
 0x4f3   :  { %6729 = vmatprep.mubr.msk.f32.mxu1 %vm2156_vm0, %v2704_v26 }
 0x4f4   :  { %v6636_v14 = vpop.f32.mrf.mxu0  ;;  %6730 = vmatmul.mubr.msk.f32.vlgmr.msra.gmra.mxu1 %vm2156_vm0, %v6633_v40 }
 0x4f6   :  { %v2714_v59 = vpop.f32.mrf.mxu0 }
 0x4f7   :  { %6732 = vmatprep.mubr.msk.f32.mxu1 %vm2156_vm0, %v2714_v59  ;;  %v4324_v59 = vld [vmem:[%s10236_s18 + $0x10] sm:$0xff] }
 0x4f8   :  { %v6639_v47 = vpop.f32.mrf.mxu0  ;;  %6733 = vmatmul.mubr.msk.f32.gmra.mxu1 %vm2156_vm0, %v6636_v14  ;;  %v4325_v14 = vld [vmem:[%s10236_s18 + $0x18] sm:$0xff] }
 0x4f9   :  { %6925 = vmatprep.subr.mxu1 %v4325_v14 }
 0x4fa   :  { %v2724_v25 = vpop.f32.mrf.mxu0  ;;  %6926 = vmatpush3.msra.mxu1 %v4325_v14 }
 0x4fb   :  { %6735 = vmatprep.mubr.msk.f32.mxu1 %vm2156_vm0, %v2724_v25  ;;  %6927 = vmatprep.subr.mxu1 %v4324_v59 }
 0x4fc   :  { %v6642_v51 = vpop.f32.mrf.mxu0  ;;  %6736 = vmatmul.mubr.msk.f32.gmra.mxu1 %vm2156_vm0, %v6639_v47  ;;  %v9212_v47 = vld [vmem:[%s10237_s15] ss:$0 sm:$0xff] }
 0x4fd   :  { %6928 = vmatpush3.msra.mxu1 %v4324_v59 }
 0x4fe   :  { %v2734_v54 = vpop.f32.mrf.mxu0 }
 0x4ff   :  { %6738 = vmatprep.mubr.msk.f32.mxu1 %vm2156_vm0, %v2734_v54 }
 0x500   :  { %v6645_v48 = vpop.f32.mrf.mxu0  ;;  %6739 = vmatmul.mubr.msk.f32.gmra.mxu1 %vm2156_vm0, %v6642_v51 }
 0x502   :  { %v2744_v6 = vpop.f32.mrf.mxu0 }
 0x503   :  { %6741 = vmatprep.mubr.msk.f32.mxu1 %vm2156_vm0, %v2744_v6 }
 0x504   :  { %v6648_v37 = vpop.f32.mrf.mxu0  ;;  %6742 = vmatmul.mubr.msk.f32.gmra.mxu1 %vm2156_vm0, %v6645_v48 }
 0x506   :  { %v2754_v30 = vpop.f32.mrf.mxu0 }
 0x507   :  { %6744 = vmatprep.mubr.msk.f32.mxu1 %vm2156_vm0, %v2754_v30  ;;  %v4323_v30 = vld [vmem:[%s10236_s18 + $0x8] sm:$0xff] }
 0x508   :  { %v6651_v32 = vpop.f32.mrf.mxu0  ;;  %6745 = vmatmul.mubr.msk.f32.gmra.mxu1 %vm2156_vm0, %v6648_v37  ;;  %6929 = vmatprep.subr.mxu1 %v4323_v30 }
 0x509   :  { %6930 = vmatpush3.msra.mxu1 %v4323_v30 }
 0x50a   :  { %v2764_v46 = vpop.f32.mrf.mxu0 }
 0x50b   :  { %6747 = vmatprep.mubr.msk.f32.mxu1 %vm2156_vm0, %v2764_v46 }
 0x50c   :  { %v6654_v8 = vpop.f32.mrf.mxu0  ;;  %6748 = vmatmul.mubr.msk.f32.gmra.mxu1 %vm2156_vm0, %v6651_v32  ;;  %v4322_v32 = vld [vmem:[%s10236_s18] sm:$0xff] }
 0x50d   :  { %6931 = vmatprep.subr.mxu1 %v4322_v32 }
 0x50e   :  { %v2774_v57 = vpop.f32.mrf.mxu0  ;;  %6932 = vmatpush3.msra.mxu1 %v4322_v32 }
 0x50f   :  { %6750 = vmatprep.mubr.msk.f32.mxu1 %vm2156_vm0, %v2774_v57 }
 0x510   :  { %v6657_v61 = vpop.f32.mrf.mxu0  ;;  %6751 = vmatmul.mubr.msk.f32.gmra.mxu1 %vm2156_vm0, %v6654_v8 }
 0x512   :  { %v2784_v2 = vpop.f32.mrf.mxu0 }
 0x513   :  { %6753 = vmatprep.mubr.msk.f32.mxu1 %vm2156_vm0, %v2784_v2 }
 0x514   :  { %v6660_v36 = vpop.f32.mrf.mxu0  ;;  %6754 = vmatmul.mubr.msk.f32.gmra.mxu1 %vm2156_vm0, %v6657_v61 }
 0x516   :  { %v2794_v21 = vpop.f32.mrf.mxu0 }
 0x517   :  { %6756 = vmatprep.mubr.msk.f32.mxu1 %vm2156_vm0, %v2794_v21 }
 0x518   :  { %v6663_v4 = vpop.f32.mrf.mxu0  ;;  %6757 = vmatmul.mubr.msk.f32.gmra.mxu1 %vm2156_vm0, %v6660_v36 }
 0x51a   :  { %v2804_v50 = vpop.f32.mrf.mxu0 }
 0x51b   :  { %6759 = vmatprep.mubr.msk.f32.mxu1 %vm2156_vm0, %v2804_v50 }
 0x51c   :  { %v6666_v41 = vpop.f32.mrf.mxu0  ;;  %6760 = vmatmul.mubr.msk.f32.gmra.mxu1 %vm2156_vm0, %v6663_v4 }
 0x51e   :  { %v2814_v29 = vpop.f32.mrf.mxu0 }
 0x51f   :  { %6762 = vmatprep.mubr.msk.f32.mxu1 %vm2156_vm0, %v2814_v29 }
 0x520   :  { %v6669_v49 = vpop.f32.mrf.mxu0  ;;  %6763 = vmatmul.mubr.msk.f32.gmra.mxu1 %vm2156_vm0, %v6666_v41 }
 0x522   :  { %v2824_v52 = vpop.f32.mrf.mxu0 }
 0x523   :  { %6765 = vmatprep.mubr.msk.f32.mxu1 %vm2156_vm0, %v2824_v52 }
 0x524   :  { %v6672_v19 = vpop.f32.mrf.mxu0  ;;  %6766 = vmatmul.mubr.msk.f32.gmra.mxu1 %vm2156_vm0, %v6669_v49 }
 0x526   :  { %v2834_v31 = vpop.f32.mrf.mxu0 }
 0x527   :  { %6768 = vmatprep.mubr.msk.f32.mxu1 %vm2156_vm0, %v2834_v31 }
 0x528   :  { %v6675_v22 = vpop.f32.mrf.mxu0  ;;  %6769 = vmatmul.mubr.msk.f32.gmra.mxu1 %vm2156_vm0, %v6672_v19 }
 0x52a   :  { %v2844_v17 = vpop.f32.mrf.mxu0 }
 0x52b   :  { %6771 = vmatprep.mubr.msk.f32.mxu1 %vm2156_vm0, %v2844_v17 }
 0x52c   :  { %6772 = vmatmul.mubr.msk.f32.gmra.mxu1 %vm2156_vm0, %v6675_v22 }
 0x52d   :  { %v6678_v15 = vpop.f32.mrf.mxu0 }
 0x52f   :  { %v2854_v3 = vpop.f32.mrf.mxu0 }
 0x530   :  { %6774 = vmatprep.mubr.msk.f32.mxu1 %vm2156_vm0, %v2854_v3 }
 0x531   :  { %v6681_v10 = vpop.f32.mrf.mxu0  ;;  %6775 = vmatmul.mubr.msk.f32.gmra.mxu1 %vm2156_vm0, %v6678_v15 }
 0x533   :  { %v2864_v20 = vpop.f32.mrf.mxu0 }
 0x534   :  { %6777 = vmatprep.mubr.msk.f32.mxu1 %vm2156_vm0, %v2864_v20 }
 0x535   :  { %v6684_v56 = vpop.f32.mrf.mxu0  ;;  %6778 = vmatmul.mubr.msk.f32.gmra.mxu1 %vm2156_vm0, %v6681_v10 }
 0x537   :  { %v2874_v12 = vpop.f32.mrf.mxu0 }
 0x538   :  { %6780 = vmatprep.mubr.msk.f32.mxu1 %vm2156_vm0, %v2874_v12 }
 0x539   :  { %v6687_v53 = vpop.f32.mrf.mxu0  ;;  %6781 = vmatmul.mubr.msk.f32.gmra.mxu1 %vm2156_vm0, %v6684_v56 }
 0x53b   :  { %v2884_v33 = vpop.f32.mrf.mxu0 }
 0x53c   :  { %6783 = vmatprep.mubr.msk.f32.mxu1 %vm2156_vm0, %v2884_v33 }
 0x53d   :  { %v6690_v24 = vpop.f32.mrf.mxu0  ;;  %6784 = vmatmul.mubr.msk.f32.gmra.mxu1 %vm2156_vm0, %v6687_v53 }
 0x53f   :  { %v2894_v62 = vpop.f32.mrf.mxu0 }
 0x540   :  { %6786 = vmatprep.mubr.msk.f32.mxu1 %vm2156_vm0, %v2894_v62 }
 0x541   :  { %v6693_v42 = vpop.f32.mrf.mxu0  ;;  %6787 = vmatmul.mubr.msk.f32.gmra.mxu1 %vm2156_vm0, %v6690_v24 }
 0x543   :  { %v2904_v27 = vpop.f32.mrf.mxu0 }
 0x544   :  { %6789 = vmatprep.mubr.msk.f32.mxu1 %vm2156_vm0, %v2904_v27 }
 0x545   :  { %v6696_v58 = vpop.f32.mrf.mxu0  ;;  %6790 = vmatmul.mubr.msk.f32.gmra.mxu1 %vm2156_vm0, %v6693_v42 }
 0x547   :  { %v2914_v11 = vpop.f32.mrf.mxu0 }
 0x548   :  { %6792 = vmatprep.mubr.msk.f32.mxu1 %vm2156_vm0, %v2914_v11 }
 0x549   :  { %v6699_v16 = vpop.f32.mrf.mxu0  ;;  %6793 = vmatmul.mubr.msk.f32.gmra.mxu1 %vm2156_vm0, %v6696_v58 }
 0x54b   :  { %v2924_v9 = vpop.f32.mrf.mxu0 }
 0x54c   :  { %6795 = vmatprep.mubr.msk.f32.mxu1 %vm2156_vm0, %v2924_v9 }
 0x54d   :  { %v6702_v44 = vpop.f32.mrf.mxu0  ;;  %6796 = vmatmul.mubr.msk.f32.gmra.mxu1 %vm2156_vm0, %v6699_v16 }
 0x54f   :  { %v2934_v43 = vpop.f32.mrf.mxu0 }
 0x550   :  { %6798 = vmatprep.mubr.msk.f32.mxu1 %vm2156_vm0, %v2934_v43 }
 0x551   :  { %v6705_v60 = vpop.f32.mrf.mxu0  ;;  %6799 = vmatmul.mubr.msk.f32.gmra.mxu1 %vm2156_vm0, %v6702_v44 }
 0x553   :  { %v2944_v18 = vpop.f32.mrf.mxu0 }
 0x554   :  { %6801 = vmatprep.mubr.msk.f32.mxu1 %vm2156_vm0, %v2944_v18 }
 0x555   :  { %v6708_v35 = vpop.f32.mrf.mxu0  ;;  %6802 = vmatmul.mubr.msk.f32.gmra.mxu1 %vm2156_vm0, %v6705_v60 }
 0x557   :  { %v2954_v34 = vpop.f32.mrf.mxu0 }
 0x558   :  { %6804 = vmatprep.mubr.msk.f32.mxu1 %vm2156_vm0, %v2954_v34 }
 0x559   :  { %v6711_v45 = vpop.f32.mrf.mxu0  ;;  %6805 = vmatmul.mubr.msk.f32.gmra.mxu1 %vm2156_vm0, %v6708_v35 }
 0x55b   :  { %v2964_v23 = vpop.f32.mrf.mxu0 }
 0x55c   :  { %6807 = vmatprep.mubr.msk.f32.mxu1 %vm2156_vm0, %v2964_v23 }
 0x55d   :  { %v6714_v38 = vpop.f32.mrf.mxu0  ;;  %6808 = vmatmul.mubr.msk.f32.gmra.mxu1 %vm2156_vm0, %v6711_v45 }
 0x55f   :  { %v2974_v28 = vpop.f32.mrf.mxu0 }
 0x560   :  { %6810 = vmatprep.mubr.msk.f32.mxu1 %vm2156_vm0, %v2974_v28 }
 0x561   :  { %v6717_v39 = vpop.f32.mrf.mxu0  ;;  %6811 = vmatmul.mubr.msk.f32.gmra.mxu1 %vm2156_vm0, %v6714_v38 }
 0x563   :  { %v2984_v7 = vpop.f32.mrf.mxu0 }
 0x564   :  { %6813 = vmatprep.mubr.msk.f32.mxu1 %vm2156_vm0, %v2984_v7 }
 0x565   :  { %v6720_v5 = vpop.f32.mrf.mxu0  ;;  %6814 = vmatmul.mubr.msk.f32.gmra.mxu1 %vm2156_vm0, %v6717_v39 }
 0x567   :  { %v2994_v63 = vpop.f32.mrf.mxu0 }
 0x568   :  { %6816 = vmatprep.mubr.msk.f32.mxu1 %vm2156_vm0, %v2994_v63 }
 0x569   :  { %v6723_v1 = vpop.f32.mrf.mxu0  ;;  %6817 = vmatmul.mubr.msk.f32.gmra.mxu1 %vm2156_vm0, %v6720_v5 }
 0x56b   :  { %v3004_v40 = vpop.f32.mrf.mxu0 }
 0x56c   :  { %6819 = vmatprep.mubr.msk.f32.mxu1 %vm2156_vm0, %v3004_v40 }
 0x56d   :  { %v6726_v13 = vpop.f32.mrf.mxu0  ;;  %6820 = vmatmul.mubr.msk.f32.gmra.mxu1 %vm2156_vm0, %v6723_v1 }
 0x56f   :  { %v3014_v26 = vpop.f32.mrf.mxu0 }
 0x570   :  { %6822 = vmatprep.mubr.msk.f32.mxu1 %vm2156_vm0, %v3014_v26 }
 0x571   :  { %6823 = vmatmul.mubr.msk.f32.gmra.mxu1 %vm2156_vm0, %v6726_v13 }
 0x5b4   :  { %v6731_v25 = vpop.f32.mrf.mxu1 }
 0x5b5   :  { %v3295_v51 = vadd.f32 %v6731_v25, %v9212_v47 }
 0x5b6   :  { %v3289_v54 = vpop.f32.mrf.mxu1 }
 0x5b7   :  { %v3290_v48 = vadd.f32 %v9212_v47, %v3289_v54  ;;  %v3609_v46 = vmax.f32 %v3295_v51, 0.0 }
 0x5b8   :  { %v6734_v6 = vpop.f32.mrf.mxu1 }
 0x5b9   :  { %v3608_v37 = vmax.f32 %v3290_v48, 0.0  ;;  %v3305_v8 = vadd.f32 %v6734_v6, %v9212_v47 }
 0x5ba   :  { %v3299_v57 = vpop.f32.mrf.mxu1 }
 0x5bb   :  { %v3300_v61 = vadd.f32 %v9212_v47, %v3299_v57  ;;  %6829 = vmatprep.mubr.msk.f32.mxu0 %vm1315_vm4, %v3608_v37  ;;  %v3611_v21 = vmax.f32 %v3305_v8, 0.0 }
 0x5bc   :  { %v6737_v2 = vpop.f32.mrf.mxu1  ;;  %6830 = vmatmul.mubr.msk.f32.vlgmr.msra.gmra.mxu0 %vm1315_vm4, %v3609_v46 }
 0x5bd   :  { %v3610_v36 = vmax.f32 %v3300_v61, 0.0  ;;  %v3315_v4 = vadd.f32 %v6737_v2, %v9212_v47 }
 0x5be   :  { %v3309_v50 = vpop.f32.mrf.mxu1 }
 0x5bf   :  { %v3310_v41 = vadd.f32 %v9212_v47, %v3309_v50  ;;  %6832 = vmatprep.mubr.msk.f32.mxu0 %vm1315_vm4, %v3610_v36  ;;  %v3613_v52 = vmax.f32 %v3315_v4, 0.0 }
 0x5c0   :  { %v6740_v29 = vpop.f32.mrf.mxu1  ;;  %6833 = vmatmul.mubr.msk.f32.gmra.mxu0 %vm1315_vm4, %v3611_v21 }
 0x5c1   :  { %v3612_v49 = vmax.f32 %v3310_v41, 0.0  ;;  %v3325_v19 = vadd.f32 %v6740_v29, %v9212_v47 }
 0x5c2   :  { %v3319_v31 = vpop.f32.mrf.mxu1 }
 0x5c3   :  { %v3320_v22 = vadd.f32 %v9212_v47, %v3319_v31  ;;  %6835 = vmatprep.mubr.msk.f32.mxu0 %vm1315_vm4, %v3612_v49  ;;  %v3615_v3 = vmax.f32 %v3325_v19, 0.0 }
 0x5c4   :  { %v6743_v17 = vpop.f32.mrf.mxu1  ;;  %6836 = vmatmul.mubr.msk.f32.gmra.mxu0 %vm1315_vm4, %v3613_v52 }
 0x5c5   :  { %v3614_v15 = vmax.f32 %v3320_v22, 0.0  ;;  %v3335_v10 = vadd.f32 %v6743_v17, %v9212_v47 }
 0x5c6   :  { %v3329_v20 = vpop.f32.mrf.mxu1 }
 0x5c7   :  { %v3330_v56 = vadd.f32 %v9212_v47, %v3329_v20  ;;  %6838 = vmatprep.mubr.msk.f32.mxu0 %vm1315_vm4, %v3614_v15  ;;  %v3617_v33 = vmax.f32 %v3335_v10, 0.0 }
 0x5c8   :  { %v6746_v12 = vpop.f32.mrf.mxu1  ;;  %6839 = vmatmul.mubr.msk.f32.gmra.mxu0 %vm1315_vm4, %v3615_v3 }
 0x5c9   :  { %v3616_v53 = vmax.f32 %v3330_v56, 0.0  ;;  %v3345_v24 = vadd.f32 %v6746_v12, %v9212_v47 }
 0x5ca   :  { %v3339_v62 = vpop.f32.mrf.mxu1 }
 0x5cb   :  { %v3340_v42 = vadd.f32 %v9212_v47, %v3339_v62  ;;  %6841 = vmatprep.mubr.msk.f32.mxu0 %vm1315_vm4, %v3616_v53  ;;  %v3619_v11 = vmax.f32 %v3345_v24, 0.0 }
 0x5cc   :  { %v6749_v27 = vpop.f32.mrf.mxu1  ;;  %6842 = vmatmul.mubr.msk.f32.gmra.mxu0 %vm1315_vm4, %v3617_v33 }
 0x5cd   :  { %v3618_v58 = vmax.f32 %v3340_v42, 0.0  ;;  %v3355_v16 = vadd.f32 %v6749_v27, %v9212_v47 }
 0x5ce   :  { %v3349_v9 = vpop.f32.mrf.mxu1 }
 0x5cf   :  { %v3350_v44 = vadd.f32 %v9212_v47, %v3349_v9  ;;  %6844 = vmatprep.mubr.msk.f32.mxu0 %vm1315_vm4, %v3618_v58  ;;  %v3621_v18 = vmax.f32 %v3355_v16, 0.0 }
 0x5d0   :  { %v6752_v43 = vpop.f32.mrf.mxu1  ;;  %6845 = vmatmul.mubr.msk.f32.gmra.mxu0 %vm1315_vm4, %v3619_v11 }
 0x5d1   :  { %v3620_v60 = vmax.f32 %v3350_v44, 0.0  ;;  %v3365_v35 = vadd.f32 %v6752_v43, %v9212_v47 }
 0x5d2   :  { %v3359_v34 = vpop.f32.mrf.mxu1 }
 0x5d3   :  { %v3360_v45 = vadd.f32 %v9212_v47, %v3359_v34  ;;  %6847 = vmatprep.mubr.msk.f32.mxu0 %vm1315_vm4, %v3620_v60  ;;  %v3623_v28 = vmax.f32 %v3365_v35, 0.0 }
 0x5d4   :  { %v6755_v23 = vpop.f32.mrf.mxu1  ;;  %6848 = vmatmul.mubr.msk.f32.gmra.mxu0 %vm1315_vm4, %v3621_v18 }
 0x5d5   :  { %v3622_v38 = vmax.f32 %v3360_v45, 0.0  ;;  %v3375_v39 = vadd.f32 %v6755_v23, %v9212_v47 }
 0x5d6   :  { %v3369_v7 = vpop.f32.mrf.mxu1 }
 0x5d7   :  { %v3370_v5 = vadd.f32 %v9212_v47, %v3369_v7  ;;  %6850 = vmatprep.mubr.msk.f32.mxu0 %vm1315_vm4, %v3622_v38  ;;  %v3625_v40 = vmax.f32 %v3375_v39, 0.0 }
 0x5d8   :  { %v6758_v63 = vpop.f32.mrf.mxu1  ;;  %6851 = vmatmul.mubr.msk.f32.gmra.mxu0 %vm1315_vm4, %v3623_v28 }
 0x5d9   :  { %v3624_v1 = vmax.f32 %v3370_v5, 0.0  ;;  %v3385_v13 = vadd.f32 %v6758_v63, %v9212_v47 }
 0x5da   :  { %v3379_v26 = vpop.f32.mrf.mxu1 }
 0x5db   :  { %v3380_v14 = vadd.f32 %v9212_v47, %v3379_v26  ;;  %6853 = vmatprep.mubr.msk.f32.mxu0 %vm1315_vm4, %v3624_v1  ;;  %v3627_v51 = vmax.f32 %v3385_v13, 0.0 }
 0x5dc   :  { %v6761_v59 = vpop.f32.mrf.mxu1  ;;  %6854 = vmatmul.mubr.msk.f32.gmra.mxu0 %vm1315_vm4, %v3625_v40 }
 0x5dd   :  { %v3626_v25 = vmax.f32 %v3380_v14, 0.0  ;;  %v3395_v54 = vadd.f32 %v6761_v59, %v9212_v47 }
 0x5de   :  { %v3389_v48 = vpop.f32.mrf.mxu1 }
 0x5df   :  { %v3390_v6 = vadd.f32 %v9212_v47, %v3389_v48  ;;  %6856 = vmatprep.mubr.msk.f32.mxu0 %vm1315_vm4, %v3626_v25  ;;  %v3629_v32 = vmax.f32 %v3395_v54, 0.0 }
 0x5e0   :  { %v6764_v37 = vpop.f32.mrf.mxu1  ;;  %6857 = vmatmul.mubr.msk.f32.gmra.mxu0 %vm1315_vm4, %v3627_v51 }
 0x5e1   :  { %v3628_v30 = vmax.f32 %v3390_v6, 0.0  ;;  %v3405_v46 = vadd.f32 %v6764_v37, %v9212_v47 }
 0x5e2   :  { %v3399_v8 = vpop.f32.mrf.mxu1 }
 0x5e3   :  { %v3400_v57 = vadd.f32 %v9212_v47, %v3399_v8  ;;  %6859 = vmatprep.mubr.msk.f32.mxu0 %vm1315_vm4, %v3628_v30  ;;  %v3631_v36 = vmax.f32 %v3405_v46, 0.0 }
 0x5e4   :  { %v6767_v61 = vpop.f32.mrf.mxu1  ;;  %6860 = vmatmul.mubr.msk.f32.gmra.mxu0 %vm1315_vm4, %v3629_v32 }
 0x5e5   :  { %v3630_v2 = vmax.f32 %v3400_v57, 0.0  ;;  %v3415_v21 = vadd.f32 %v6767_v61, %v9212_v47 }
 0x5e6   :  { %v3409_v4 = vpop.f32.mrf.mxu1 }
 0x5e7   :  { %v3410_v50 = vadd.f32 %v9212_v47, %v3409_v4  ;;  %6862 = vmatprep.mubr.msk.f32.mxu0 %vm1315_vm4, %v3630_v2  ;;  %v3633_v49 = vmax.f32 %v3415_v21, 0.0 }
 0x5e8   :  { %v6770_v41 = vpop.f32.mrf.mxu1  ;;  %6863 = vmatmul.mubr.msk.f32.gmra.mxu0 %vm1315_vm4, %v3631_v36 }
 0x5e9   :  { %v3632_v29 = vmax.f32 %v3410_v50, 0.0  ;;  %v3425_v52 = vadd.f32 %v6770_v41, %v9212_v47 }
 0x5ea   :  { %v3419_v19 = vpop.f32.mrf.mxu1 }
 0x5eb   :  { %v3420_v31 = vadd.f32 %v9212_v47, %v3419_v19  ;;  %6865 = vmatprep.mubr.msk.f32.mxu0 %vm1315_vm4, %v3632_v29  ;;  %v3635_v15 = vmax.f32 %v3425_v52, 0.0 }
 0x5ec   :  { %v6773_v22 = vpop.f32.mrf.mxu1  ;;  %6866 = vmatmul.mubr.msk.f32.gmra.mxu0 %vm1315_vm4, %v3633_v49 }
 0x5ed   :  { %v3634_v17 = vmax.f32 %v3420_v31, 0.0  ;;  %v3435_v3 = vadd.f32 %v6773_v22, %v9212_v47 }
 0x5ee   :  { %v3429_v10 = vpop.f32.mrf.mxu1 }
 0x5ef   :  { %v3430_v20 = vadd.f32 %v9212_v47, %v3429_v10  ;;  %6868 = vmatprep.mubr.msk.f32.mxu0 %vm1315_vm4, %v3634_v17  ;;  %v3637_v53 = vmax.f32 %v3435_v3, 0.0 }
 0x5f0   :  { %6869 = vmatmul.mubr.msk.f32.gmra.mxu0 %vm1315_vm4, %v3635_v15 }
 0x5f1   :  { %v3636_v56 = vmax.f32 %v3430_v20, 0.0  ;;  %v6776_v12 = vpop.f32.mrf.mxu1 }
 0x5f2   :  { %v3445_v33 = vadd.f32 %v6776_v12, %v9212_v47 }
 0x5f3   :  { %v3439_v24 = vpop.f32.mrf.mxu1  ;;  %6871 = vmatprep.mubr.msk.f32.mxu0 %vm1315_vm4, %v3636_v56 }
 0x5f4   :  { %v3440_v62 = vadd.f32 %v9212_v47, %v3439_v24  ;;  %6872 = vmatmul.mubr.msk.f32.gmra.mxu0 %vm1315_vm4, %v3637_v53  ;;  %v3639_v58 = vmax.f32 %v3445_v33, 0.0 }
 0x5f5   :  { %v6779_v42 = vpop.f32.mrf.mxu1 }
 0x5f6   :  { %v3638_v27 = vmax.f32 %v3440_v62, 0.0  ;;  %v3455_v11 = vadd.f32 %v6779_v42, %v9212_v47 }
 0x5f7   :  { %v3449_v16 = vpop.f32.mrf.mxu1 }
 0x5f8   :  { %v3450_v9 = vadd.f32 %v9212_v47, %v3449_v16  ;;  %6874 = vmatprep.mubr.msk.f32.mxu0 %vm1315_vm4, %v3638_v27  ;;  %v3641_v60 = vmax.f32 %v3455_v11, 0.0 }
 0x5f9   :  { %v6782_v44 = vpop.f32.mrf.mxu1  ;;  %6875 = vmatmul.mubr.msk.f32.gmra.mxu0 %vm1315_vm4, %v3639_v58 }
 0x5fa   :  { %v3640_v43 = vmax.f32 %v3450_v9, 0.0  ;;  %v3465_v18 = vadd.f32 %v6782_v44, %v9212_v47 }
 0x5fb   :  { %v3459_v35 = vpop.f32.mrf.mxu1 }
 0x5fc   :  { %v3460_v34 = vadd.f32 %v9212_v47, %v3459_v35  ;;  %6877 = vmatprep.mubr.msk.f32.mxu0 %vm1315_vm4, %v3640_v43  ;;  %v3643_v38 = vmax.f32 %v3465_v18, 0.0 }
 0x5fd   :  { %v6785_v45 = vpop.f32.mrf.mxu1  ;;  %6878 = vmatmul.mubr.msk.f32.gmra.mxu0 %vm1315_vm4, %v3641_v60 }
 0x5fe   :  { %v3642_v23 = vmax.f32 %v3460_v34, 0.0  ;;  %v3475_v28 = vadd.f32 %v6785_v45, %v9212_v47 }
 0x5ff   :  { %v3469_v39 = vpop.f32.mrf.mxu1 }
 0x600   :  { %v3470_v7 = vadd.f32 %v9212_v47, %v3469_v39  ;;  %6880 = vmatprep.mubr.msk.f32.mxu0 %vm1315_vm4, %v3642_v23  ;;  %v3645_v1 = vmax.f32 %v3475_v28, 0.0 }
 0x601   :  { %v6788_v5 = vpop.f32.mrf.mxu1  ;;  %6881 = vmatmul.mubr.msk.f32.gmra.mxu0 %vm1315_vm4, %v3643_v38 }
 0x602   :  { %v3644_v63 = vmax.f32 %v3470_v7, 0.0  ;;  %v3485_v40 = vadd.f32 %v6788_v5, %v9212_v47 }
 0x603   :  { %v3479_v13 = vpop.f32.mrf.mxu1 }
 0x604   :  { %v3480_v26 = vadd.f32 %v9212_v47, %v3479_v13  ;;  %6883 = vmatprep.mubr.msk.f32.mxu0 %vm1315_vm4, %v3644_v63  ;;  %v3647_v25 = vmax.f32 %v3485_v40, 0.0 }
 0x605   :  { %v6791_v14 = vpop.f32.mrf.mxu1  ;;  %6884 = vmatmul.mubr.msk.f32.gmra.mxu0 %vm1315_vm4, %v3645_v1 }
 0x606   :  { %v3646_v59 = vmax.f32 %v3480_v26, 0.0  ;;  %v3495_v51 = vadd.f32 %v6791_v14, %v9212_v47 }
 0x607   :  { %v3489_v54 = vpop.f32.mrf.mxu1 }
 0x608   :  { %v3490_v48 = vadd.f32 %v9212_v47, %v3489_v54  ;;  %6886 = vmatprep.mubr.msk.f32.mxu0 %vm1315_vm4, %v3646_v59  ;;  %v3649_v30 = vmax.f32 %v3495_v51, 0.0 }
 0x609   :  { %v6794_v6 = vpop.f32.mrf.mxu1  ;;  %6887 = vmatmul.mubr.msk.f32.gmra.mxu0 %vm1315_vm4, %v3647_v25 }
 0x60a   :  { %v3648_v37 = vmax.f32 %v3490_v48, 0.0  ;;  %v3505_v32 = vadd.f32 %v6794_v6, %v9212_v47 }
 0x60b   :  { %v3499_v46 = vpop.f32.mrf.mxu1 }
 0x60c   :  { %v3500_v8 = vadd.f32 %v9212_v47, %v3499_v46  ;;  %6889 = vmatprep.mubr.msk.f32.mxu0 %vm1315_vm4, %v3648_v37  ;;  %v3651_v2 = vmax.f32 %v3505_v32, 0.0 }
 0x60d   :  { %v6797_v57 = vpop.f32.mrf.mxu1  ;;  %6890 = vmatmul.mubr.msk.f32.gmra.mxu0 %vm1315_vm4, %v3649_v30 }
 0x60e   :  { %v3650_v61 = vmax.f32 %v3500_v8, 0.0  ;;  %v3515_v36 = vadd.f32 %v6797_v57, %v9212_v47 }
 0x60f   :  { %v3509_v21 = vpop.f32.mrf.mxu1 }
 0x610   :  { %v3510_v4 = vadd.f32 %v9212_v47, %v3509_v21  ;;  %6892 = vmatprep.mubr.msk.f32.mxu0 %vm1315_vm4, %v3650_v61  ;;  %v3653_v29 = vmax.f32 %v3515_v36, 0.0  ;;  %v9351_v61 = vld [vmem:[%s10238_s17] ss:$0 sm:$0xff] }
 0x611   :  { %v6800_v50 = vpop.f32.mrf.mxu1  ;;  %6893 = vmatmul.mubr.msk.f32.gmra.mxu0 %vm1315_vm4, %v3651_v2 }
 0x612   :  { %v3652_v41 = vmax.f32 %v3510_v4, 0.0  ;;  %v3525_v49 = vadd.f32 %v6800_v50, %v9212_v47 }
 0x613   :  { %v3519_v52 = vpop.f32.mrf.mxu1 }
 0x614   :  { %v3520_v19 = vadd.f32 %v9212_v47, %v3519_v52  ;;  %6895 = vmatprep.mubr.msk.f32.mxu0 %vm1315_vm4, %v3652_v41  ;;  %v3655_v17 = vmax.f32 %v3525_v49, 0.0 }
 0x615   :  { %v6803_v31 = vpop.f32.mrf.mxu1  ;;  %6896 = vmatmul.mubr.msk.f32.gmra.mxu0 %vm1315_vm4, %v3653_v29 }
 0x616   :  { %v3654_v22 = vmax.f32 %v3520_v19, 0.0  ;;  %v3535_v15 = vadd.f32 %v6803_v31, %v9212_v47 }
 0x617   :  { %v3529_v3 = vpop.f32.mrf.mxu1 }
 0x618   :  { %v3530_v10 = vadd.f32 %v9212_v47, %v3529_v3  ;;  %6898 = vmatprep.mubr.msk.f32.mxu0 %vm1315_vm4, %v3654_v22  ;;  %v3657_v12 = vmax.f32 %v3535_v15, 0.0 }
 0x619   :  { %v6806_v20 = vpop.f32.mrf.mxu1  ;;  %6899 = vmatmul.mubr.msk.f32.gmra.mxu0 %vm1315_vm4, %v3655_v17 }
 0x61a   :  { %v3656_v56 = vmax.f32 %v3530_v10, 0.0  ;;  %v3545_v53 = vadd.f32 %v6806_v20, %v9212_v47 }
 0x61b   :  { %v3539_v33 = vpop.f32.mrf.mxu1 }
 0x61c   :  { %v3540_v24 = vadd.f32 %v9212_v47, %v3539_v33  ;;  %6901 = vmatprep.mubr.msk.f32.mxu0 %vm1315_vm4, %v3656_v56  ;;  %v3659_v27 = vmax.f32 %v3545_v53, 0.0 }
 0x61d   :  { %v6809_v62 = vpop.f32.mrf.mxu1  ;;  %6902 = vmatmul.mubr.msk.f32.gmra.mxu0 %vm1315_vm4, %v3657_v12 }
 0x61e   :  { %v3658_v42 = vmax.f32 %v3540_v24, 0.0  ;;  %v3555_v58 = vadd.f32 %v6809_v62, %v9212_v47 }
 0x61f   :  { %v3549_v11 = vpop.f32.mrf.mxu1 }
 0x620   :  { %v3550_v16 = vadd.f32 %v9212_v47, %v3549_v11  ;;  %6904 = vmatprep.mubr.msk.f32.mxu0 %vm1315_vm4, %v3658_v42  ;;  %v3661_v43 = vmax.f32 %v3555_v58, 0.0 }
 0x621   :  { %v6812_v9 = vpop.f32.mrf.mxu1  ;;  %6905 = vmatmul.mubr.msk.f32.gmra.mxu0 %vm1315_vm4, %v3659_v27 }
 0x622   :  { %v3660_v44 = vmax.f32 %v3550_v16, 0.0  ;;  %v3565_v60 = vadd.f32 %v6812_v9, %v9212_v47 }
 0x623   :  { %v3559_v18 = vpop.f32.mrf.mxu1 }
 0x624   :  { %v3560_v35 = vadd.f32 %v9212_v47, %v3559_v18  ;;  %6907 = vmatprep.mubr.msk.f32.mxu0 %vm1315_vm4, %v3660_v44  ;;  %v3663_v23 = vmax.f32 %v3565_v60, 0.0 }
 0x625   :  { %v6815_v34 = vpop.f32.mrf.mxu1  ;;  %6908 = vmatmul.mubr.msk.f32.gmra.mxu0 %vm1315_vm4, %v3661_v43 }
 0x626   :  { %v3662_v45 = vmax.f32 %v3560_v35, 0.0  ;;  %v3575_v38 = vadd.f32 %v6815_v34, %v9212_v47 }
 0x627   :  { %v3569_v28 = vpop.f32.mrf.mxu1 }
 0x628   :  { %v3570_v39 = vadd.f32 %v9212_v47, %v3569_v28  ;;  %6910 = vmatprep.mubr.msk.f32.mxu0 %vm1315_vm4, %v3662_v45  ;;  %v3665_v63 = vmax.f32 %v3575_v38, 0.0 }
 0x629   :  { %v6818_v7 = vpop.f32.mrf.mxu1  ;;  %6911 = vmatmul.mubr.msk.f32.gmra.mxu0 %vm1315_vm4, %v3663_v23 }
 0x62a   :  { %v3664_v5 = vmax.f32 %v3570_v39, 0.0  ;;  %v3585_v1 = vadd.f32 %v6818_v7, %v9212_v47 }
 0x62b   :  { %v3579_v40 = vpop.f32.mrf.mxu1 }
 0x62c   :  { %v3580_v13 = vadd.f32 %v9212_v47, %v3579_v40  ;;  %6913 = vmatprep.mubr.msk.f32.mxu0 %vm1315_vm4, %v3664_v5  ;;  %v3667_v59 = vmax.f32 %v3585_v1, 0.0 }
 0x62d   :  { %v6821_v26 = vpop.f32.mrf.mxu1  ;;  %6914 = vmatmul.mubr.msk.f32.gmra.mxu0 %vm1315_vm4, %v3665_v63 }
 0x62e   :  { %v3666_v14 = vmax.f32 %v3580_v13, 0.0  ;;  %v3595_v25 = vadd.f32 %v6821_v26, %v9212_v47 }
 0x62f   :  { %v3589_v51 = vpop.f32.mrf.mxu1 }
 0x630   :  { %v3590_v54 = vadd.f32 %v9212_v47, %v3589_v51  ;;  %6916 = vmatprep.mubr.msk.f32.mxu0 %vm1315_vm4, %v3666_v14  ;;  %v3669_v37 = vmax.f32 %v3595_v25, 0.0 }
 0x631   :  { %v6824_v48 = vpop.f32.mrf.mxu1  ;;  %6917 = vmatmul.mubr.msk.f32.gmra.mxu0 %vm1315_vm4, %v3667_v59 }
 0x632   :  { %v3668_v6 = vmax.f32 %v3590_v54, 0.0  ;;  %v3605_v30 = vadd.f32 %v6824_v48, %v9212_v47 }
 0x633   :  { %v3599_v32 = vpop.f32.mrf.mxu1 }
 0x634   :  { %v3600_v46 = vadd.f32 %v9212_v47, %v3599_v32  ;;  %6919 = vmatprep.mubr.msk.f32.mxu0 %vm1315_vm4, %v3668_v6  ;;  %v3671_v57 = vmax.f32 %v3605_v30, 0.0 }
 0x635   :  { %6920 = vmatmul.mubr.msk.f32.gmra.mxu0 %vm1315_vm4, %v3669_v37 }
 0x636   :  { %v3670_v8 = vmax.f32 %v3600_v46, 0.0 }
 0x638   :  { %6922 = vmatprep.mubr.msk.f32.mxu0 %vm1315_vm4, %v3670_v8 }
 0x639   :  { %6923 = vmatmul.mubr.msk.f32.gmra.mxu0 %vm1315_vm4, %v3671_v57 }
 0x67c   :  { %v6831_v2 = vpop.f32.mrf.mxu0 }
 0x67d   :  { %v3945_v36 = vadd.f32 %v6831_v2, %v9351_v61 }
 0x67e   :  { %v3939_v21 = vpop.f32.mrf.mxu0 }
 0x67f   :  { %v3940_v47 = vadd.f32 %v9351_v61, %v3939_v21  ;;  %v4259_v41 = vmax.f32 %v3945_v36, 0.0 }
 0x680   :  { %v6834_v4 = vpop.f32.mrf.mxu0 }
 0x681   :  { %v4258_v50 = vmax.f32 %v3940_v47, 0.0  ;;  %v3955_v29 = vadd.f32 %v6834_v4, %v9351_v61 }
 0x682   :  { %v3949_v49 = vpop.f32.mrf.mxu0 }
 0x683   :  { %v3950_v52 = vadd.f32 %v9351_v61, %v3949_v49  ;;  %6933 = vmatprep.mubr.msk.f32.mxu1 %vm257_vm1, %v4258_v50  ;;  %v4261_v22 = vmax.f32 %v3955_v29, 0.0 }
 0x684   :  { %v6837_v19 = vpop.f32.mrf.mxu0  ;;  %6934 = vmatmul.mubr.msk.f32.vlgmr.msra.gmra.mxu1 %vm257_vm1, %v4259_v41 }
 0x685   :  { %v4260_v31 = vmax.f32 %v3950_v52, 0.0  ;;  %v3965_v17 = vadd.f32 %v6837_v19, %v9351_v61 }
 0x686   :  { %v3959_v15 = vpop.f32.mrf.mxu0 }
 0x687   :  { %v3960_v3 = vadd.f32 %v9351_v61, %v3959_v15  ;;  %6936 = vmatprep.mubr.msk.f32.mxu1 %vm257_vm1, %v4260_v31  ;;  %v4263_v56 = vmax.f32 %v3965_v17, 0.0 }
 0x688   :  { %v6840_v10 = vpop.f32.mrf.mxu0  ;;  %6937 = vmatmul.mubr.msk.f32.gmra.mxu1 %vm257_vm1, %v4261_v22 }
 0x689   :  { %v4262_v20 = vmax.f32 %v3960_v3, 0.0  ;;  %v3975_v12 = vadd.f32 %v6840_v10, %v9351_v61 }
 0x68a   :  { %v3969_v53 = vpop.f32.mrf.mxu0 }
 0x68b   :  { %v3970_v33 = vadd.f32 %v9351_v61, %v3969_v53  ;;  %6939 = vmatprep.mubr.msk.f32.mxu1 %vm257_vm1, %v4262_v20  ;;  %v4265_v42 = vmax.f32 %v3975_v12, 0.0 }
 0x68c   :  { %v6843_v24 = vpop.f32.mrf.mxu0  ;;  %6940 = vmatmul.mubr.msk.f32.gmra.mxu1 %vm257_vm1, %v4263_v56 }
 0x68d   :  { %v4264_v62 = vmax.f32 %v3970_v33, 0.0  ;;  %v3985_v27 = vadd.f32 %v6843_v24, %v9351_v61 }
 0x68e   :  { %v3979_v58 = vpop.f32.mrf.mxu0 }
 0x68f   :  { %v3980_v11 = vadd.f32 %v9351_v61, %v3979_v58  ;;  %6942 = vmatprep.mubr.msk.f32.mxu1 %vm257_vm1, %v4264_v62  ;;  %v4267_v44 = vmax.f32 %v3985_v27, 0.0 }
 0x690   :  { %v6846_v16 = vpop.f32.mrf.mxu0  ;;  %6943 = vmatmul.mubr.msk.f32.gmra.mxu1 %vm257_vm1, %v4265_v42 }
 0x691   :  { %v4266_v9 = vmax.f32 %v3980_v11, 0.0  ;;  %v3995_v43 = vadd.f32 %v6846_v16, %v9351_v61 }
 0x692   :  { %v3989_v60 = vpop.f32.mrf.mxu0 }
 0x693   :  { %v3990_v18 = vadd.f32 %v9351_v61, %v3989_v60  ;;  %6945 = vmatprep.mubr.msk.f32.mxu1 %vm257_vm1, %v4266_v9  ;;  %v4269_v45 = vmax.f32 %v3995_v43, 0.0 }
 0x694   :  { %v6849_v35 = vpop.f32.mrf.mxu0  ;;  %6946 = vmatmul.mubr.msk.f32.gmra.mxu1 %vm257_vm1, %v4267_v44 }
 0x695   :  { %v4268_v34 = vmax.f32 %v3990_v18, 0.0  ;;  %v4005_v23 = vadd.f32 %v6849_v35, %v9351_v61 }
 0x696   :  { %v3999_v38 = vpop.f32.mrf.mxu0 }
 0x697   :  { %v4000_v28 = vadd.f32 %v9351_v61, %v3999_v38  ;;  %6948 = vmatprep.mubr.msk.f32.mxu1 %vm257_vm1, %v4268_v34  ;;  %v4271_v5 = vmax.f32 %v4005_v23, 0.0 }
 0x698   :  { %v6852_v39 = vpop.f32.mrf.mxu0  ;;  %6949 = vmatmul.mubr.msk.f32.gmra.mxu1 %vm257_vm1, %v4269_v45 }
 0x699   :  { %v4270_v7 = vmax.f32 %v4000_v28, 0.0  ;;  %v4015_v63 = vadd.f32 %v6852_v39, %v9351_v61 }
 0x69a   :  { %v4009_v1 = vpop.f32.mrf.mxu0 }
 0x69b   :  { %v4010_v40 = vadd.f32 %v9351_v61, %v4009_v1  ;;  %6951 = vmatprep.mubr.msk.f32.mxu1 %vm257_vm1, %v4270_v7  ;;  %v4273_v14 = vmax.f32 %v4015_v63, 0.0 }
 0x69c   :  { %v6855_v13 = vpop.f32.mrf.mxu0  ;;  %6952 = vmatmul.mubr.msk.f32.gmra.mxu1 %vm257_vm1, %v4271_v5 }
 0x69d   :  { %v4272_v26 = vmax.f32 %v4010_v40, 0.0  ;;  %v4025_v59 = vadd.f32 %v6855_v13, %v9351_v61 }
 0x69e   :  { %v4019_v25 = vpop.f32.mrf.mxu0 }
 0x69f   :  { %v4020_v51 = vadd.f32 %v9351_v61, %v4019_v25  ;;  %6954 = vmatprep.mubr.msk.f32.mxu1 %vm257_vm1, %v4272_v26  ;;  %v4275_v6 = vmax.f32 %v4025_v59, 0.0 }
 0x6a0   :  { %v6858_v54 = vpop.f32.mrf.mxu0  ;;  %6955 = vmatmul.mubr.msk.f32.gmra.mxu1 %vm257_vm1, %v4273_v14 }
 0x6a1   :  { %v4274_v48 = vmax.f32 %v4020_v51, 0.0  ;;  %v4035_v37 = vadd.f32 %v6858_v54, %v9351_v61 }
 0x6a2   :  { %v4029_v30 = vpop.f32.mrf.mxu0 }
 0x6a3   :  { %v4030_v32 = vadd.f32 %v9351_v61, %v4029_v30  ;;  %6957 = vmatprep.mubr.msk.f32.mxu1 %vm257_vm1, %v4274_v48  ;;  %v4277_v57 = vmax.f32 %v4035_v37, 0.0 }
 0x6a4   :  { %v6861_v46 = vpop.f32.mrf.mxu0  ;;  %6958 = vmatmul.mubr.msk.f32.gmra.mxu1 %vm257_vm1, %v4275_v6 }
 0x6a5   :  { %v4276_v8 = vmax.f32 %v4030_v32, 0.0  ;;  %v4045_v2 = vadd.f32 %v6861_v46, %v9351_v61 }
 0x6a6   :  { %v4039_v36 = vpop.f32.mrf.mxu0 }
 0x6a7   :  { %v4040_v21 = vadd.f32 %v9351_v61, %v4039_v36  ;;  %6960 = vmatprep.mubr.msk.f32.mxu1 %vm257_vm1, %v4276_v8  ;;  %v4279_v50 = vmax.f32 %v4045_v2, 0.0 }
 0x6a8   :  { %v6864_v47 = vpop.f32.mrf.mxu0  ;;  %6961 = vmatmul.mubr.msk.f32.gmra.mxu1 %vm257_vm1, %v4277_v57 }
 0x6a9   :  { %v4278_v4 = vmax.f32 %v4040_v21, 0.0  ;;  %v4055_v41 = vadd.f32 %v6864_v47, %v9351_v61 }
 0x6aa   :  { %v4049_v29 = vpop.f32.mrf.mxu0 }
 0x6ab   :  { %v4050_v49 = vadd.f32 %v9351_v61, %v4049_v29  ;;  %6963 = vmatprep.mubr.msk.f32.mxu1 %vm257_vm1, %v4278_v4  ;;  %v4281_v31 = vmax.f32 %v4055_v41, 0.0 }
 0x6ac   :  { %v6867_v52 = vpop.f32.mrf.mxu0  ;;  %6964 = vmatmul.mubr.msk.f32.gmra.mxu1 %vm257_vm1, %v4279_v50 }
 0x6ad   :  { %v4280_v19 = vmax.f32 %v4050_v49, 0.0  ;;  %v4065_v22 = vadd.f32 %v6867_v52, %v9351_v61 }
 0x6ae   :  { %v4059_v17 = vpop.f32.mrf.mxu0 }
 0x6af   :  { %v4060_v15 = vadd.f32 %v9351_v61, %v4059_v17  ;;  %6966 = vmatprep.mubr.msk.f32.mxu1 %vm257_vm1, %v4280_v19  ;;  %v4283_v20 = vmax.f32 %v4065_v22, 0.0 }
 0x6b0   :  { %v6870_v3 = vpop.f32.mrf.mxu0  ;;  %6967 = vmatmul.mubr.msk.f32.gmra.mxu1 %vm257_vm1, %v4281_v31 }
 0x6b1   :  { %v4282_v10 = vmax.f32 %v4060_v15, 0.0  ;;  %v4075_v56 = vadd.f32 %v6870_v3, %v9351_v61 }
 0x6b2   :  { %v4069_v12 = vpop.f32.mrf.mxu0 }
 0x6b3   :  { %v4070_v53 = vadd.f32 %v9351_v61, %v4069_v12  ;;  %6969 = vmatprep.mubr.msk.f32.mxu1 %vm257_vm1, %v4282_v10  ;;  %v4285_v62 = vmax.f32 %v4075_v56, 0.0 }
 0x6b4   :  { %v6873_v33 = vpop.f32.mrf.mxu0  ;;  %6970 = vmatmul.mubr.msk.f32.gmra.mxu1 %vm257_vm1, %v4283_v20 }
 0x6b5   :  { %v4284_v24 = vmax.f32 %v4070_v53, 0.0  ;;  %v4085_v42 = vadd.f32 %v6873_v33, %v9351_v61 }
 0x6b6   :  { %v4079_v27 = vpop.f32.mrf.mxu0 }
 0x6b7   :  { %v4080_v58 = vadd.f32 %v9351_v61, %v4079_v27  ;;  %6972 = vmatprep.mubr.msk.f32.mxu1 %vm257_vm1, %v4284_v24  ;;  %v4287_v9 = vmax.f32 %v4085_v42, 0.0 }
 0x6b8   :  { %6973 = vmatmul.mubr.msk.f32.gmra.mxu1 %vm257_vm1, %v4285_v62 }
 0x6b9   :  { %v4286_v11 = vmax.f32 %v4080_v58, 0.0  ;;  %v6876_v16 = vpop.f32.mrf.mxu0 }
 0x6ba   :  { %v4095_v44 = vadd.f32 %v6876_v16, %v9351_v61 }
 0x6bb   :  { %v4089_v43 = vpop.f32.mrf.mxu0  ;;  %6975 = vmatprep.mubr.msk.f32.mxu1 %vm257_vm1, %v4286_v11  ;;  %v9451_v11 = vpop.permute.xlu1 %5072 }
 0x6bc   :  { %v4090_v60 = vadd.f32 %v9351_v61, %v4089_v43  ;;  %6976 = vmatmul.mubr.msk.f32.gmra.mxu1 %vm257_vm1, %v4287_v9  ;;  %v4289_v34 = vmax.f32 %v4095_v44, 0.0 }
 0x6bd   :  { %v6879_v18 = vpop.f32.mrf.mxu0 }
 0x6be   :  { %v4288_v35 = vmax.f32 %v4090_v60, 0.0  ;;  %v4105_v45 = vadd.f32 %v6879_v18, %v9351_v61  ;;  %v9454_v60 = vpop.permute.xlu0 %5070 }
 0x6bf   :  { %v4099_v23 = vpop.f32.mrf.mxu0 }
 0x6c0   :  { %v4100_v38 = vadd.f32 %v9351_v61, %v4099_v23  ;;  %6978 = vmatprep.mubr.msk.f32.mxu1 %vm257_vm1, %v4288_v35  ;;  %v4291_v7 = vmax.f32 %v4105_v45, 0.0 }
 0x6c1   :  { %v6882_v28 = vpop.f32.mrf.mxu0  ;;  %6979 = vmatmul.mubr.msk.f32.gmra.mxu1 %vm257_vm1, %v4289_v34 }
 0x6c2   :  { %v4290_v39 = vmax.f32 %v4100_v38, 0.0  ;;  %v4115_v5 = vadd.f32 %v6882_v28, %v9351_v61  ;;  %v9460_v28 = vpop.permute.xlu1 %5076 }
 0x6c3   :  { %v4109_v63 = vpop.f32.mrf.mxu0 }
 0x6c4   :  { %v4110_v1 = vadd.f32 %v9351_v61, %v4109_v63  ;;  %6981 = vmatprep.mubr.msk.f32.mxu1 %vm257_vm1, %v4290_v39  ;;  %v4293_v26 = vmax.f32 %v4115_v5, 0.0  ;;  %v9465_v5 = vpop.permute.xlu0 %5074 }
 0x6c5   :  { %v6885_v40 = vpop.f32.mrf.mxu0  ;;  %6982 = vmatmul.mubr.msk.f32.gmra.mxu1 %vm257_vm1, %v4291_v7 }
 0x6c6   :  { %v4292_v13 = vmax.f32 %v4110_v1, 0.0  ;;  %v4125_v14 = vadd.f32 %v6885_v40, %v9351_v61 }
 0x6c7   :  { %v4119_v59 = vpop.f32.mrf.mxu0 }
 0x6c8   :  { %v4120_v25 = vadd.f32 %v9351_v61, %v4119_v59  ;;  %6984 = vmatprep.mubr.msk.f32.mxu1 %vm257_vm1, %v4292_v13  ;;  %v4295_v48 = vmax.f32 %v4125_v14, 0.0  ;;  %v9471_v59 = vpop.permute.xlu1 %5080 }
 0x6c9   :  { %v6888_v51 = vpop.f32.mrf.mxu0  ;;  %6985 = vmatmul.mubr.msk.f32.gmra.mxu1 %vm257_vm1, %v4293_v26 }
 0x6ca   :  { %v4294_v54 = vmax.f32 %v4120_v25, 0.0  ;;  %v4135_v6 = vadd.f32 %v6888_v51, %v9351_v61 }
 0x6cb   :  { %v4129_v37 = vpop.f32.mrf.mxu0 }
 0x6cc   :  { %v4130_v30 = vadd.f32 %v9351_v61, %v4129_v37  ;;  %6987 = vmatprep.mubr.msk.f32.mxu1 %vm257_vm1, %v4294_v54  ;;  %v4297_v8 = vmax.f32 %v4135_v6, 0.0  ;;  %v9474_v6 = vpop.permute.xlu0 %5078 }
 0x6cd   :  { %v6891_v32 = vpop.f32.mrf.mxu0  ;;  %6988 = vmatmul.mubr.msk.f32.gmra.mxu1 %vm257_vm1, %v4295_v48 }
 0x6ce   :  { %v4296_v46 = vmax.f32 %v4130_v30, 0.0  ;;  %v4145_v57 = vadd.f32 %v6891_v32, %v9351_v61 }
 0x6cf   :  { %v4139_v2 = vpop.f32.mrf.mxu0 }
 0x6d0   :  { %v4140_v36 = vadd.f32 %v9351_v61, %v4139_v2  ;;  %6990 = vmatprep.mubr.msk.f32.mxu1 %vm257_vm1, %v4296_v46  ;;  %v4299_v4 = vmax.f32 %v4145_v57, 0.0  ;;  %v9480_v2 = vpop.permute.xlu1 %5084 }
 0x6d1   :  { %v6894_v21 = vpop.f32.mrf.mxu0  ;;  %6991 = vmatmul.mubr.msk.f32.gmra.mxu1 %vm257_vm1, %v4297_v8 }
 0x6d2   :  { %v4298_v47 = vmax.f32 %v4140_v36, 0.0  ;;  %v4155_v50 = vadd.f32 %v6894_v21, %v9351_v61 }
 0x6d3   :  { %v4149_v41 = vpop.f32.mrf.mxu0 }
 0x6d4   :  { %v4150_v29 = vadd.f32 %v9351_v61, %v4149_v41  ;;  %6993 = vmatprep.mubr.msk.f32.mxu1 %vm257_vm1, %v4298_v47  ;;  %v4301_v19 = vmax.f32 %v4155_v50, 0.0  ;;  %v9485_v47 = vpop.permute.xlu0 %5082 }
 0x6d5   :  { %v6897_v49 = vpop.f32.mrf.mxu0  ;;  %6994 = vmatmul.mubr.msk.f32.gmra.mxu1 %vm257_vm1, %v4299_v4 }
 0x6d6   :  { %v4300_v52 = vmax.f32 %v4150_v29, 0.0  ;;  %v4165_v31 = vadd.f32 %v6897_v49, %v9351_v61 }
 0x6d7   :  { %v4159_v22 = vpop.f32.mrf.mxu0 }
 0x6d8   :  { %v4160_v17 = vadd.f32 %v9351_v61, %v4159_v22  ;;  %6996 = vmatprep.mubr.msk.f32.mxu1 %vm257_vm1, %v4300_v52  ;;  %v4303_v10 = vmax.f32 %v4165_v31, 0.0 }
 0x6d9   :  { %v6900_v15 = vpop.f32.mrf.mxu0  ;;  %6997 = vmatmul.mubr.msk.f32.gmra.mxu1 %vm257_vm1, %v4301_v19  ;;  %v9491_v19 = vpop.permute.xlu1 %5088 }
 0x6da   :  { %v4302_v3 = vmax.f32 %v4160_v17, 0.0  ;;  %v4175_v20 = vadd.f32 %v6900_v15, %v9351_v61 }
 0x6db   :  { %v4169_v56 = vpop.f32.mrf.mxu0 }
 0x6dc   :  { %v4170_v12 = vadd.f32 %v9351_v61, %v4169_v56  ;;  %6999 = vmatprep.mubr.msk.f32.mxu1 %vm257_vm1, %v4302_v3  ;;  %v4305_v24 = vmax.f32 %v4175_v20, 0.0  ;;  %v9494_v3 = vpop.permute.xlu0 %5086 }
 0x6dd   :  { %v6903_v53 = vpop.f32.mrf.mxu0  ;;  %7000 = vmatmul.mubr.msk.f32.gmra.mxu1 %vm257_vm1, %v4303_v10 }
 0x6de   :  { %v4304_v33 = vmax.f32 %v4170_v12, 0.0  ;;  %v4185_v62 = vadd.f32 %v6903_v53, %v9351_v61  ;;  %v9499_v12 = vpop.permute.xlu1 %5092 }
 0x6df   :  { %v4179_v42 = vpop.f32.mrf.mxu0 }
 0x6e0   :  { %v4180_v27 = vadd.f32 %v9351_v61, %v4179_v42  ;;  %7002 = vmatprep.mubr.msk.f32.mxu1 %vm257_vm1, %v4304_v33  ;;  %v4307_v9 = vmax.f32 %v4185_v62, 0.0  ;;  %v9503_v53 = vpop.permute.xlu0 %5090 }
 0x6e1   :  { %v6906_v58 = vpop.f32.mrf.mxu0  ;;  %7003 = vmatmul.mubr.msk.f32.gmra.mxu1 %vm257_vm1, %v4305_v24 }
 0x6e2   :  { %v4306_v16 = vmax.f32 %v4180_v27, 0.0  ;;  %v4195_v44 = vadd.f32 %v6906_v58, %v9351_v61  ;;  %v9505_v33 = vpop.permute.xlu1 %5096 }
 0x6e3   :  { %v4189_v43 = vpop.f32.mrf.mxu0 }
 0x6e4   :  { %v4190_v18 = vadd.f32 %v9351_v61, %v4189_v43  ;;  %7005 = vmatprep.mubr.msk.f32.mxu1 %vm257_vm1, %v4306_v16  ;;  %v4309_v45 = vmax.f32 %v4195_v44, 0.0  ;;  %v9507_v24 = vpop.permute.xlu0 %5094 }
 0x6e5   :  { %v6909_v35 = vpop.f32.mrf.mxu0  ;;  %7006 = vmatmul.mubr.msk.f32.gmra.mxu1 %vm257_vm1, %v4307_v9  ;;  %10370 = vst [vmem:[#allocation25_spill] sm:$0xff] %v9507_v24 }
 0x6e6   :  { %v4308_v34 = vmax.f32 %v4190_v18, 0.0  ;;  %v4205_v23 = vadd.f32 %v6909_v35, %v9351_v61  ;;  %v9509_v62 = vpop.permute.xlu1 %5100 }
 0x6e7   :  { %v4199_v38 = vpop.f32.mrf.mxu0  ;;  %10371 = vst [vmem:[#allocation6_spill] sm:$0xff] %v9509_v62 }
 0x6e8   :  { %v4200_v39 = vadd.f32 %v9351_v61, %v4199_v38  ;;  %7008 = vmatprep.mubr.msk.f32.mxu1 %vm257_vm1, %v4308_v34  ;;  %v4311_v1 = vmax.f32 %v4205_v23, 0.0 }
 0x6e9   :  { %v6912_v7 = vpop.f32.mrf.mxu0  ;;  %7009 = vmatmul.mubr.msk.f32.gmra.mxu1 %vm257_vm1, %v4309_v45 }
 0x6ea   :  { %v4310_v63 = vmax.f32 %v4200_v39, 0.0  ;;  %v4215_v40 = vadd.f32 %v6912_v7, %v9351_v61  ;;  %v9513_v42 = vpop.permute.xlu1 %5104 }
 0x6eb   :  { %v4209_v13 = vpop.f32.mrf.mxu0  ;;  %10373 = vst [vmem:[#allocation8_spill] sm:$0xff] %v9513_v42 }
 0x6ec   :  { %v4210_v26 = vadd.f32 %v9351_v61, %v4209_v13  ;;  %7011 = vmatprep.mubr.msk.f32.mxu1 %vm257_vm1, %v4310_v63  ;;  %v4313_v51 = vmax.f32 %v4215_v40, 0.0 }
 0x6ed   :  { %v6915_v14 = vpop.f32.mrf.mxu0  ;;  %7012 = vmatmul.mubr.msk.f32.gmra.mxu1 %vm257_vm1, %v4311_v1 }
 0x6ee   :  { %v4312_v25 = vmax.f32 %v4210_v26, 0.0  ;;  %v4225_v54 = vadd.f32 %v6915_v14, %v9351_v61  ;;  %v9517_v58 = vpop.permute.xlu1 %5108 }
 0x6ef   :  { %v4219_v48 = vpop.f32.mrf.mxu0  ;;  %10375 = vst [vmem:[#allocation10_spill] sm:$0xff] %v9517_v58 }
 0x6f0   :  { %v4220_v37 = vadd.f32 %v9351_v61, %v4219_v48  ;;  %7014 = vmatprep.mubr.msk.f32.mxu1 %vm257_vm1, %v4312_v25  ;;  %v4315_v46 = vmax.f32 %v4225_v54, 0.0 }
 0x6f1   :  { %v6918_v30 = vpop.f32.mrf.mxu0  ;;  %7015 = vmatmul.mubr.msk.f32.gmra.mxu1 %vm257_vm1, %v4313_v51 }
 0x6f2   :  { %v4314_v32 = vmax.f32 %v4220_v37, 0.0  ;;  %v4235_v8 = vadd.f32 %v6918_v30, %v9351_v61  ;;  %v9521_v9 = vpop.permute.xlu1 %5112 }
 0x6f3   :  { %v4229_v57 = vpop.f32.mrf.mxu0  ;;  %10377 = vst [vmem:[#allocation12_spill] sm:$0xff] %v9521_v9 }
 0x6f4   :  { %v4230_v36 = vadd.f32 %v9351_v61, %v4229_v57  ;;  %7017 = vmatprep.mubr.msk.f32.mxu1 %vm257_vm1, %v4314_v32  ;;  %v4317_v50 = vmax.f32 %v4235_v8, 0.0 }
 0x6f5   :  { %v6921_v21 = vpop.f32.mrf.mxu0  ;;  %7018 = vmatmul.mubr.msk.f32.gmra.mxu1 %vm257_vm1, %v4315_v46 }
 0x6f6   :  { %v4316_v4 = vmax.f32 %v4230_v36, 0.0  ;;  %v4245_v41 = vadd.f32 %v6921_v21, %v9351_v61  ;;  %v9525_v43 = vpop.permute.xlu1 %5116 }
 0x6f7   :  { %v4239_v29 = vpop.f32.mrf.mxu0  ;;  %10379 = vst [vmem:[#allocation14_spill] sm:$0xff] %v9525_v43 }
 0x6f8   :  { %v4240_v49 = vadd.f32 %v9351_v61, %v4239_v29  ;;  %7020 = vmatprep.mubr.msk.f32.mxu1 %vm257_vm1, %v4316_v4  ;;  %v4319_v22 = vmax.f32 %v4245_v41, 0.0 }
 0x6f9   :  { %v6924_v52 = vpop.f32.mrf.mxu0  ;;  %7021 = vmatmul.mubr.msk.f32.gmra.mxu1 %vm257_vm1, %v4317_v50 }
 0x6fa   :  { %v4318_v31 = vmax.f32 %v4240_v49, 0.0  ;;  %v4255_v17 = vadd.f32 %v6924_v52, %v9351_v61  ;;  %v9529_v35 = vpop.permute.xlu1 %5120 }
 0x6fb   :  { %v4249_v15 = vpop.f32.mrf.mxu0  ;;  %10381 = vst [vmem:[#allocation16_spill] sm:$0xff] %v9529_v35 }
 0x6fc   :  { %v4250_v10 = vadd.f32 %v9351_v61, %v4249_v15  ;;  %7023 = vmatprep.mubr.msk.f32.mxu1 %vm257_vm1, %v4318_v31  ;;  %v4321_v56 = vmax.f32 %v4255_v17, 0.0  ;;  %v9511_v61 = vpop.permute.xlu0 %5098 }
 0x6fd   :  { %7024 = vmatmul.mubr.msk.f32.gmra.mxu1 %vm257_vm1, %v4319_v22  ;;  %10372 = vst [vmem:[#allocation5_spill] sm:$0xff] %v9511_v61 }
 0x6fe   :  { %v4320_v20 = vmax.f32 %v4250_v10, 0.0  ;;  %v9533_v45 = vpop.permute.xlu1 %5124 }
 0x6ff   :  { %10383 = vst [vmem:[#allocation17_spill] sm:$0xff] %v9533_v45 }
 0x700   :  { %7026 = vmatprep.mubr.msk.f32.mxu1 %vm257_vm1, %v4320_v20  ;;  %v9515_v27 = vpop.permute.xlu0 %5102 }
 0x701   :  { %7027 = vmatmul.mubr.msk.f32.gmra.mxu1 %vm257_vm1, %v4321_v56  ;;  %10374 = vst [vmem:[#allocation7_spill] sm:$0xff] %v9515_v27 }
 0x702   :  { %v9537_v38 = vpop.permute.xlu1 %5128 }
 0x703   :  { %10385 = vst [vmem:[#allocation19_spill] sm:$0xff] %v9537_v38 }
 0x704   :  { %v9519_v16 = vpop.permute.xlu0 %5106 }
 0x705   :  { %10376 = vst [vmem:[#allocation9_spill] sm:$0xff] %v9519_v16 }
 0x706   :  { %v9541_v7 = vpop.permute.xlu1 %5132 }
 0x707   :  { %10387 = vst [vmem:[#allocation21_spill] sm:$0xff] %v9541_v7 }
 0x708   :  { %v9523_v44 = vpop.permute.xlu0 %5110 }
 0x709   :  { %10378 = vst [vmem:[#allocation11_spill] sm:$0xff] %v9523_v44 }
 0x70a   :  { %v9545_v1 = vpop.permute.xlu1 %5200 }
 0x70c   :  { %v9527_v18 = vpop.permute.xlu0 %5114 }
 0x70d   :  { %10380 = vst [vmem:[#allocation13_spill] sm:$0xff] %v9527_v18 }
 0x70e   :  { %v9553_v14 = vpop.permute.xlu1 %5204 }
 0x710   :  { %v9531_v34 = vpop.permute.xlu0 %5118 }
 0x711   :  { %10382 = vst [vmem:[#allocation15_spill] sm:$0xff] %v9531_v34 }
 0x712   :  { %v9563_v37 = vpop.permute.xlu1 %5208 }
 0x714   :  { %v9535_v23 = vpop.permute.xlu0 %5122 }
 0x715   :  { %10384 = vst [vmem:[#allocation4_spill] sm:$0xff] %v9535_v23 }
 0x716   :  { %v9573_v57 = vpop.permute.xlu1 %5212 }
 0x718   :  { %v9539_v39 = vpop.permute.xlu0 %5126 }
 0x719   :  { %10386 = vst [vmem:[#allocation18_spill] sm:$0xff] %v9539_v39 }
 0x71a   :  { %v9583_v41 = vpop.permute.xlu1 %5216 }
 0x71c   :  { %v9543_v63 = vpop.permute.xlu0 %5130 }
 0x71d   :  { %10388 = vst [vmem:[#allocation20_spill] sm:$0xff] %v9543_v63 }
 0x71e   :  { %v9593_v22 = vpop.permute.xlu1 %5220 }
 0x720   :  { %v9547_v40 = vpop.permute.xlu0 %5198 }
 0x722   :  { %v9603_v56 = vpop.permute.xlu1 %5224 }
 0x723   :  { %10391 = vst [vmem:[#allocation22_spill] sm:$0xff] %v9603_v56 }
 0x724   :  { %v9557_v51 = vpop.permute.xlu0 %5202 }
 0x726   :  { %v9613_v23 = vpop.permute.xlu1 %5228 }
 0x727   :  { %10396 = vst [vmem:[#allocation2_spill] sm:$0xff] %v9613_v23 }
 0x728   :  { %v9567_v32 = vpop.permute.xlu0 %5206 }
 0x72a   :  { %v9623_v43 = vpop.permute.xlu1 %5232 }
 0x72b   :  { %10401 = vst [vmem:[#allocation32_spill] sm:$0xff] %v9623_v43 }
 0x72c   :  { %v9577_v21 = vpop.permute.xlu0 %5210 }
 0x730   :  { %v9587_v49 = vpop.permute.xlu0 %5214 }
 0x734   :  { %v9597_v15 = vpop.permute.xlu0 %5218 }
 0x738   :  { %v9607_v7 = vpop.permute.xlu0 %5222 }
 0x739   :  { %10393 = vst [vmem:[#allocation26_spill] sm:$0xff] %v9607_v7 }
 0x73c   :  { %v9617_v34 = vpop.permute.xlu0 %5226 }
 0x73d   :  { %10398 = vst [vmem:[#allocation27_spill] sm:$0xff] %v9617_v34 }
 0x740   :  { %v9627_v9 = vpop.permute.xlu0 %5230 }
 0x741   :  { %10403 = vst [vmem:[#allocation34_spill] sm:$0xff] %v9627_v9 }
 0x744   :  { %v9549_v13 = vpop.f32.mrf.mxu1 }
 0x746   :  { %v9551_v26 = vpop.f32.mrf.mxu1 }
 0x748   :  { %v9555_v25 = vpop.f32.mrf.mxu1 }
 0x74a   :  { %v9559_v54 = vpop.f32.mrf.mxu1 }
 0x74c   :  { %v9561_v48 = vpop.f32.mrf.mxu1 }
 0x74e   :  { %v9565_v30 = vpop.f32.mrf.mxu1 }
 0x750   :  { %v9569_v46 = vpop.f32.mrf.mxu1 }
 0x752   :  { %v9571_v8 = vpop.f32.mrf.mxu1 }
 0x754   :  { %v9575_v36 = vpop.f32.mrf.mxu1 }
 0x756   :  { %v9579_v4 = vpop.f32.mrf.mxu1 }
 0x758   :  { %v9581_v50 = vpop.f32.mrf.mxu1 }
 0x75a   :  { %v9585_v29 = vpop.f32.mrf.mxu1 }
 0x75c   :  { %v9589_v52 = vpop.f32.mrf.mxu1 }
 0x75e   :  { %v9591_v31 = vpop.f32.mrf.mxu1 }
 0x760   :  { %v9595_v17 = vpop.f32.mrf.mxu1 }
 0x762   :  { %v9599_v10 = vpop.f32.mrf.mxu1 }
 0x763   :  { %10389 = vst [vmem:[#allocation23_spill] sm:$0xff] %v9599_v10 }
 0x764   :  { %v9601_v20 = vpop.f32.mrf.mxu1 }
 0x765   :  { %10390 = vst [vmem:[#allocation37_spill] sm:$0xff] %v9601_v20 }
 0x766   :  { %v9605_v63 = vpop.f32.mrf.mxu1 }
 0x767   :  { %10392 = vst [vmem:[#allocation3_spill] sm:$0xff] %v9605_v63 }
 0x768   :  { %v9609_v39 = vpop.f32.mrf.mxu1 }
 0x769   :  { %10394 = vst [vmem:[#allocation38_spill] sm:$0xff] %v9609_v39 }
 0x76a   :  { %v9611_v38 = vpop.f32.mrf.mxu1 }
 0x76b   :  { %10395 = vst [vmem:[#allocation24_spill] sm:$0xff] %v9611_v38  ;;  %v9633_v38 = vpop.permute.xlu1 %5236 }
 0x76c   :  { %v9615_v45 = vpop.f32.mrf.mxu1  ;;  %10406 = vst [vmem:[#allocation35_spill] sm:$0xff] %v9633_v38 }
 0x76d   :  { %10397 = vst [vmem:[#allocation28_spill] sm:$0xff] %v9615_v45  ;;  %v9637_v45 = vpop.permute.xlu0 %5234 }
 0x76e   :  { %v9619_v35 = vpop.f32.mrf.mxu1  ;;  %10408 = vst [vmem:[#allocation40_spill] sm:$0xff] %v9637_v45 }
 0x76f   :  { %10399 = vst [vmem:[#allocation30_spill] sm:$0xff] %v9619_v35 }
 0x770   :  { %v9621_v18 = vpop.f32.mrf.mxu1 }
 0x771   :  { %10400 = vst [vmem:[#allocation29_spill] sm:$0xff] %v9621_v18  ;;  %v9643_v18 = vpop.permute.xlu1 %5240 }
 0x772   :  { %v9625_v44 = vpop.f32.mrf.mxu1  ;;  %10411 = vst [vmem:[#allocation43_spill] sm:$0xff] %v9643_v18 }
 0x773   :  { %10402 = vst [vmem:[#allocation31_spill] sm:$0xff] %v9625_v44  ;;  %v9647_v44 = vpop.permute.xlu0 %5238 }
 0x774   :  { %v9629_v16 = vpop.f32.mrf.mxu1  ;;  %10413 = vst [vmem:[#allocation45_spill] sm:$0xff] %v9647_v44 }
 0x775   :  { %10404 = vst [vmem:[#allocation33_spill] sm:$0xff] %v9629_v16 }
 0x776   :  { %v9631_v58 = vpop.f32.mrf.mxu1 }
 0x777   :  { %10405 = vst [vmem:[#allocation36_spill] sm:$0xff] %v9631_v58  ;;  %v9653_v58 = vpop.permute.xlu1 %5244  ;;  %v9660_v45 = vpop.permute.xlu0 %5242 }
 0x778   :  { %v9635_v27 = vpop.f32.mrf.mxu1  ;;  %10416 = vst [vmem:[#allocation48_spill] sm:$0xff] %v9653_v58  ;;  %10417 = vst [vmem:[#allocation49_spill] sm:$0xff] %v9660_v45 }
 0x779   :  { %10407 = vst [vmem:[#allocation39_spill] sm:$0xff] %v9635_v27  ;;  %v9658_v27 = vld [vmem:[%s10239_s19] ss:$0 sm:$0xff] }
 0x77a   :  { %v9639_v39 = vpop.f32.mrf.mxu1 }
 0x77b   :  { %10409 = vst [vmem:[#allocation41_spill] sm:$0xff] %v9639_v39  ;;  %v9665_v44 = vpop.permute.xlu1 %5248  ;;  %v9669_v38 = vpop.permute.xlu0 %5246 }
 0x77c   :  { %v9641_v35 = vpop.f32.mrf.mxu1  ;;  %10418 = vst [vmem:[#allocation50_spill] sm:$0xff] %v9665_v44  ;;  %10419 = vst [vmem:[#allocation51_spill] sm:$0xff] %v9669_v38 }
 0x77d   :  { %10410 = vst [vmem:[#allocation42_spill] sm:$0xff] %v9641_v35 }
 0x77e   :  { %v9645_v43 = vpop.f32.mrf.mxu1 }
 0x77f   :  { %10412 = vst [vmem:[#allocation44_spill] sm:$0xff] %v9645_v43 }
 0x781   :  { %v9649_v9 = vpop.f32.mrf.mxu1 }
 0x782   :  { %10414 = vst [vmem:[#allocation46_spill] sm:$0xff] %v9649_v9 }
 0x783   :  { %v9651_v16 = vpop.f32.mrf.mxu1 }
 0x784   :  { %10415 = vst [vmem:[#allocation47_spill] sm:$0xff] %v9651_v16 }
 0x785   :  { %v6983_v39 = vpop.f32.mrf.mxu1 }
 0x786   :  { %v4757_v35 = vadd.f32 %v6983_v39, %v9658_v27 }
 0x787   :  { %v4751_v18 = vpop.f32.mrf.mxu1 }
 0x788   :  { %v4752_v43 = vadd.f32 %v9658_v27, %v4751_v18  ;;  %4944 = vrot.lane.b32.xlu1 %v4757_v35, %s7104_s25  ;;  %v9675_v35 = vpop.permute.xlu1 %5252 }
 0x789   :  { %v6986_v9 = vpop.f32.mrf.mxu1  ;;  %10420 = vst [vmem:[#allocation52_spill] sm:$0xff] %v9675_v35 }
 0x78a   :  { %v4767_v16 = vadd.f32 %v6986_v9, %v9658_v27  ;;  %4942 = vrot.lane.b32.xlu0 %v4752_v43, %s7104_s25  ;;  %v9679_v43 = vpop.permute.xlu0 %5250 }
 0x78b   :  { %v4761_v58 = vpop.f32.mrf.mxu1  ;;  %10421 = vst [vmem:[#allocation53_spill] sm:$0xff] %v9679_v43 }
 0x78c   :  { %v4762_v42 = vadd.f32 %v9658_v27, %v4761_v58  ;;  %4948 = vrot.lane.b32.xlu1 %v4767_v16, %s7104_s25 }
 0x78d   :  { %v6989_v39 = vpop.f32.mrf.mxu1 }
 0x78e   :  { %v4777_v45 = vadd.f32 %v6989_v39, %v9658_v27  ;;  %4946 = vrot.lane.b32.xlu0 %v4762_v42, %s7104_s25  ;;  %v9685_v39 = vpop.permute.xlu1 %5256 }
 0x78f   :  { %v4771_v18 = vpop.f32.mrf.mxu1  ;;  %10422 = vst [vmem:[#allocation54_spill] sm:$0xff] %v9685_v39 }
 0x790   :  { %v4772_v44 = vadd.f32 %v9658_v27, %v4771_v18  ;;  %4952 = vrot.lane.b32.xlu1 %v4777_v45, %s7104_s25  ;;  %v9689_v18 = vpop.permute.xlu0 %5254 }
 0x791   :  { %v6992_v9 = vpop.f32.mrf.mxu1  ;;  %10423 = vst [vmem:[#allocation55_spill] sm:$0xff] %v9689_v18 }
 0x792   :  { %v4787_v38 = vadd.f32 %v6992_v9, %v9658_v27  ;;  %4950 = vrot.lane.b32.xlu0 %v4772_v44, %s7104_s25 }
 0x793   :  { %v4781_v58 = vpop.f32.mrf.mxu1 }
 0x794   :  { %v4782_v16 = vadd.f32 %v9658_v27, %v4781_v58  ;;  %4956 = vrot.lane.b32.xlu1 %v4787_v38, %s7104_s25  ;;  %v9695_v58 = vpop.permute.xlu1 %5260 }
 0x795   :  { %v6995_v42 = vpop.f32.mrf.mxu1  ;;  %10424 = vst [vmem:[#allocation56_spill] sm:$0xff] %v9695_v58 }
 0x796   :  { %v4797_v35 = vadd.f32 %v6995_v42, %v9658_v27  ;;  %4954 = vrot.lane.b32.xlu0 %v4782_v16, %s7104_s25  ;;  %v9699_v42 = vpop.permute.xlu0 %5258 }
 0x797   :  { %v4791_v45 = vpop.f32.mrf.mxu1  ;;  %10425 = vst [vmem:[#allocation57_spill] sm:$0xff] %v9699_v42 }
 0x798   :  { %v4792_v43 = vadd.f32 %v9658_v27, %v4791_v45  ;;  %4960 = vrot.lane.b32.xlu1 %v4797_v35, %s7104_s25 }
 0x799   :  { %v6998_v44 = vpop.f32.mrf.mxu1 }
 0x79a   :  { %v4807_v9 = vadd.f32 %v6998_v44, %v9658_v27  ;;  %4958 = vrot.lane.b32.xlu0 %v4792_v43, %s7104_s25  ;;  %v9705_v44 = vpop.permute.xlu1 %5296 }
 0x79b   :  { %v4801_v38 = vpop.f32.mrf.mxu1 }
 0x79c   :  { %v4802_v39 = vadd.f32 %v9658_v27, %v4801_v38  ;;  %4964 = vrot.lane.b32.xlu1 %v4807_v9, %s7104_s25  ;;  %v9709_v38 = vpop.permute.xlu0 %5294 }
 0x79d   :  { %v7001_v16 = vpop.f32.mrf.mxu1 }
 0x79e   :  { %v4817_v18 = vadd.f32 %v7001_v16, %v9658_v27  ;;  %4962 = vrot.lane.b32.xlu0 %v4802_v39, %s7104_s25 }
 0x79f   :  { %v4811_v35 = vpop.f32.mrf.mxu1 }
 0x7a0   :  { %v4812_v45 = vadd.f32 %v9658_v27, %v4811_v35  ;;  %4968 = vrot.lane.b32.xlu1 %v4817_v18, %s7104_s25  ;;  %v9715_v35 = vpop.permute.xlu1 %5300 }
 0x7a1   :  { %v7004_v43 = vpop.f32.mrf.mxu1 }
 0x7a2   :  { %v4827_v58 = vadd.f32 %v7004_v43, %v9658_v27  ;;  %4966 = vrot.lane.b32.xlu0 %v4812_v45, %s7104_s25  ;;  %v9719_v43 = vpop.permute.xlu0 %5298 }
 0x7a3   :  { %v4821_v9 = vpop.f32.mrf.mxu1 }
 0x7a4   :  { %v4822_v42 = vadd.f32 %v9658_v27, %v4821_v9  ;;  %4972 = vrot.lane.b32.xlu1 %v4827_v58, %s7104_s25 }
 0x7a5   :  { %v7007_v39 = vpop.f32.mrf.mxu1 }
 0x7a6   :  { %v4837_v16 = vadd.f32 %v7007_v39, %v9658_v27  ;;  %4970 = vrot.lane.b32.xlu0 %v4822_v42, %s7104_s25  ;;  %v9725_v39 = vpop.permute.xlu1 %5304 }
 0x7a7   :  { %v4831_v18 = vpop.f32.mrf.mxu1 }
 0x7a8   :  { %v4832_v34 = vadd.f32 %v9658_v27, %v4831_v18  ;;  %4976 = vrot.lane.b32.xlu1 %v4837_v16, %s7104_s25  ;;  %v9729_v18 = vpop.permute.xlu0 %5302 }
 0x7a9   :  { %v7010_v45 = vpop.f32.mrf.mxu1 }
 0x7aa   :  { %v4847_v63 = vadd.f32 %v7010_v45, %v9658_v27  ;;  %4974 = vrot.lane.b32.xlu0 %v4832_v34, %s7104_s25 }
 0x7ab   :  { %v4841_v58 = vpop.f32.mrf.mxu1 }
 0x7ac   :  { %v4842_v9 = vadd.f32 %v9658_v27, %v4841_v58  ;;  %4980 = vrot.lane.b32.xlu1 %v4847_v63, %s7104_s25  ;;  %v9735_v58 = vpop.permute.xlu1 %5308 }
 0x7ad   :  { %v7013_v42 = vpop.f32.mrf.mxu1 }
 0x7ae   :  { %v4857_v61 = vadd.f32 %v7013_v42, %v9658_v27  ;;  %4978 = vrot.lane.b32.xlu0 %v4842_v9, %s7104_s25  ;;  %v9739_v42 = vpop.permute.xlu0 %5306 }
 0x7af   :  { %v4851_v16 = vpop.f32.mrf.mxu1 }
 0x7b0   :  { %v4852_v23 = vadd.f32 %v9658_v27, %v4851_v16  ;;  %4984 = vrot.lane.b32.xlu1 %v4857_v61, %s7104_s25 }
 0x7b1   :  { %v7016_v34 = vpop.f32.mrf.mxu1 }
 0x7b2   :  { %v4867_v45 = vadd.f32 %v7016_v34, %v9658_v27  ;;  %4982 = vrot.lane.b32.xlu0 %v4852_v23, %s7104_s25  ;;  %v9745_v34 = vpop.permute.xlu1 %5312 }
 0x7b3   :  { %v4861_v63 = vpop.f32.mrf.mxu1 }
 0x7b4   :  { %v4862_v20 = vadd.f32 %v9658_v27, %v4861_v63  ;;  %4988 = vrot.lane.b32.xlu1 %v4867_v45, %s7104_s25  ;;  %v9749_v63 = vpop.permute.xlu0 %5310 }
 0x7b5   :  { %v7019_v9 = vpop.f32.mrf.mxu1 }
 0x7b6   :  { %v4877_v62 = vadd.f32 %v7019_v9, %v9658_v27  ;;  %4986 = vrot.lane.b32.xlu0 %v4862_v20, %s7104_s25 }
 0x7b7   :  { %v4871_v61 = vpop.f32.mrf.mxu1 }
 0x7b8   :  { %v4872_v16 = vadd.f32 %v9658_v27, %v4871_v61  ;;  %4992 = vrot.lane.b32.xlu1 %v4877_v62, %s7104_s25  ;;  %v9755_v61 = vpop.permute.xlu1 %5316 }
 0x7b9   :  { %v7022_v23 = vpop.f32.mrf.mxu1 }
 0x7ba   :  { %v4887_v7 = vadd.f32 %v7022_v23, %v9658_v27  ;;  %4990 = vrot.lane.b32.xlu0 %v4872_v16, %s7104_s25  ;;  %v9759_v23 = vpop.permute.xlu0 %5314 }
 0x7bb   :  { %v4881_v45 = vpop.f32.mrf.mxu1 }
 0x7bc   :  { %v4882_v10 = vadd.f32 %v9658_v27, %v4881_v45  ;;  %4996 = vrot.lane.b32.xlu1 %v4887_v7, %s7104_s25 }
 0x7bd   :  { %v7025_v20 = vpop.f32.mrf.mxu1 }
 0x7be   :  { %v4897_v9 = vadd.f32 %v7025_v20, %v9658_v27  ;;  %4994 = vrot.lane.b32.xlu0 %v4882_v10, %s7104_s25  ;;  %v9765_v10 = vpop.permute.xlu1 %5320  ;;  %v9768_v20 = vpop.permute.xlu0 %5318 }
 0x7bf   :  { %v4891_v62 = vpop.f32.mrf.mxu1  ;;  %10426 = vst [vmem:[#allocation58_spill] sm:$0xff] %v9765_v10  ;;  %10427 = vst [vmem:[#allocation59_spill] sm:$0xff] %v9768_v20 }
 0x7c0   :  { %v4892_v24 = vadd.f32 %v9658_v27, %v4891_v62  ;;  %5000 = vrot.lane.b32.xlu1 %v4897_v9, %s7104_s25 }
 0x7c1   :  { %v7028_v16 = vpop.f32.mrf.mxu1 }
 0x7c2   :  { %v4907_v56 = vadd.f32 %v7028_v16, %v9658_v27  ;;  %4998 = vrot.lane.b32.xlu0 %v4892_v24, %s7104_s25  ;;  %v9774_v9 = vpop.permute.xlu1 %5324  ;;  %v9776_v24 = vpop.permute.xlu0 %5322 }
 0x7c3   :  { %v4901_v7 = vpop.f32.mrf.mxu1  ;;  %10428 = vst [vmem:[#allocation60_spill] sm:$0xff] %v9774_v9  ;;  %10429 = vst [vmem:[#allocation61_spill] sm:$0xff] %v9776_v24 }
 0x7c4   :  { %v4902_v45 = vadd.f32 %v9658_v27, %v4901_v7  ;;  %5004 = vrot.lane.b32.xlu1 %v4907_v56, %s7104_s25 }
 0x7c6   :  { %5002 = vrot.lane.b32.xlu0 %v4902_v45, %s7104_s25  ;;  %v9778_v62 = vpop.permute.xlu1 %5328  ;;  %v9780_v16 = vpop.permute.xlu0 %5326 }
 0x7c7   :  { %10430 = vst [vmem:[#allocation62_spill] sm:$0xff] %v9778_v62  ;;  %10431 = vst [vmem:[#allocation63_spill] sm:$0xff] %v9780_v16 }
 0x7c8   :  { %5356 = vrot.lane.b32.xlu1 %v8987_v0, %s7109_s14 }
 0x7ca   :  { %5354 = vrot.lane.b32.xlu0 %v8981_v55, %s7109_s14  ;;  %v9782_v56 = vpop.permute.xlu1 %5332  ;;  %v9784_v7 = vpop.permute.xlu0 %5330 }
 0x7cb   :  { %10432 = vst [vmem:[#allocation64_spill] sm:$0xff] %v9782_v56 }
 0x7ce   :  { %v9786_v45 = vpop.permute.xlu1 %5336  ;;  %v9788_v20 = vpop.permute.xlu0 %5334 }
 0x7cf   :  { %10433 = vst [vmem:[#allocation65_spill] sm:$0xff] %v9786_v45  ;;  %10434 = vst [vmem:[#allocation66_spill] sm:$0xff] %v9788_v20  ;;  %v4597_v45 = vadd.f32 %v9549_v13, %v9658_v27 }
 0x7d2   :  { %v9790_v0 = vpop.permute.xlu1 %5340  ;;  %v9792_v10 = vpop.permute.xlu0 %5338 }
 0x7d3   :  { %10435 = vst [vmem:[#allocation67_spill] sm:$0xff] %v9792_v10  ;;  %v4592_v10 = vadd.f32 %v9658_v27, %v9551_v26 }
 0x7d6   :  { %v9794_v55 = vpop.permute.xlu1 %5344  ;;  %v9796_v9 = vpop.permute.xlu0 %5342 }
 0x7d7   :  { %10436 = vst [vmem:[#allocation68_spill] sm:$0xff] %v9794_v55  ;;  %10437 = vst [vmem:[#allocation69_spill] sm:$0xff] %v9796_v9 }
 0x7da   :  { %v9798_v24 = vpop.permute.xlu1 %5348  ;;  %v9800_v62 = vpop.permute.xlu0 %5346 }
 0x7db   :  { %10438 = vst [vmem:[#allocation70_spill] sm:$0xff] %v9798_v24  ;;  %10439 = vst [vmem:[#allocation71_spill] sm:$0xff] %v9800_v62 }
 0x7de   :  { %v9802_v16 = vpop.permute.xlu1 %5352  ;;  %v9804_v56 = vpop.permute.xlu0 %5350 }
 0x7df   :  { %10440 = vst [vmem:[#allocation72_spill] sm:$0xff] %v9802_v16  ;;  %10441 = vst [vmem:[#allocation73_spill] sm:$0xff] %v9804_v56  ;;  %v4607_v16 = vadd.f32 %v9555_v25, %v9658_v27 }
 0x7fa   :  { %v4945_v20 = vpop.permute.xlu1 %4944 }
 0x7fb   :  { %v5391_v55 = vsel %vm257_vm1, %v4597_v45, %v4945_v20  ;;  %v4602_v45 = vadd.f32 %v9658_v27, %v9559_v54  ;;  %v4617_v54 = vadd.f32 %v9561_v48, %v9658_v27  ;;  %v4612_v48 = vadd.f32 %v9658_v27, %v9565_v30 }
 0x7fc   :  { %v5423_v24 = vsel %vm952_vm3, %v5391_v55, %v9451_v11  ;;  %v4943_v62 = vpop.permute.xlu0 %4942  ;;  %v4627_v30 = vadd.f32 %v9569_v46, %v9658_v27  ;;  %v4622_v46 = vadd.f32 %v9658_v27, %v9571_v8  ;;  %v4637_v8 = vadd.f32 %v9575_v36, %v9658_v27 }
 0x7fd   :  { %v5456_v56 = vsel %vm5454_vm5, %v5423_v24, %v9545_v1  ;;  %v5390_v13 = vsel %vm257_vm1, %v4592_v10, %v4943_v62  ;;  %v4632_v36 = vadd.f32 %v9658_v27, %v9579_v4  ;;  %v4647_v4 = vadd.f32 %v9581_v50, %v9658_v27 }
 0x7fe   :  { %v5489_v9 = vsel %vm5487_vm6, %v5456_v56, %v9705_v44  ;;  %v5422_v26 = vsel %vm952_vm3, %v5390_v13, %v9454_v60  ;;  %v4949_v20 = vpop.permute.xlu1 %4948  ;;  %v4642_v50 = vadd.f32 %v9658_v27, %v9585_v29  ;;  %v4657_v29 = vadd.f32 %v9589_v52, %v9658_v27 }
 0x7ff   :  { %v5522_v11 = vsel %vm5520_vm7, %v5489_v9, 0.0  ;;  %v5455_v25 = vsel %vm5454_vm5, %v5422_v26, %v9547_v40  ;;  %v5393_v55 = vsel %vm257_vm1, %v4607_v16, %v4949_v20  ;;  %v4652_v52 = vadd.f32 %v9658_v27, %v9591_v31 }
 0x800   :  { %5554 = vst [vmem:[%s10240_s20 + $0x8] sm:$0xff] %v5522_v11  ;;  %v5488_v1 = vsel %vm5487_vm6, %v5455_v25, %v9709_v38  ;;  %v5425_v60 = vsel %vm952_vm3, %v5393_v55, %v9460_v28  ;;  %v4947_v44 = vpop.permute.xlu0 %4946  ;;  %v4667_v31 = vadd.f32 %v9595_v17, %v9658_v27 }
 0x801   :  { %v5521_v10 = vsel %vm5520_vm7, %v5488_v1, 0.0  ;;  %v5458_v40 = vsel %vm5454_vm5, %v5425_v60, %v9553_v14  ;;  %v5392_v9 = vsel %vm257_vm1, %v4602_v45, %v4947_v44 }
 0x802   :  { %5553 = vst [vmem:[%s10240_s20] sm:$0xff] %v5521_v10  ;;  %v5491_v38 = vsel %vm5487_vm6, %v5458_v40, %v9715_v35  ;;  %v5424_v28 = vsel %vm952_vm3, %v5392_v9, %v9465_v5  ;;  %v4953_v24 = vpop.permute.xlu1 %4952 }
 0x803   :  { %v5524_v62 = vsel %vm5520_vm7, %v5491_v38, 0.0  ;;  %v5457_v14 = vsel %vm5454_vm5, %v5424_v28, %v9557_v51  ;;  %v5395_v16 = vsel %vm257_vm1, %v4617_v54, %v4953_v24 }
 0x804   :  { %5556 = vst [vmem:[%s10240_s20 + $0x18] sm:$0xff] %v5524_v62  ;;  %v5490_v35 = vsel %vm5487_vm6, %v5457_v14, %v9719_v43  ;;  %v5427_v5 = vsel %vm952_vm3, %v5395_v16, %v9471_v59  ;;  %v4951_v56 = vpop.permute.xlu0 %4950 }
 0x805   :  { %v5523_v13 = vsel %vm5520_vm7, %v5490_v35, 0.0  ;;  %v5460_v51 = vsel %vm5454_vm5, %v5427_v5, %v9563_v37  ;;  %v5394_v26 = vsel %vm257_vm1, %v4612_v48, %v4951_v56 }
 0x806   :  { %5555 = vst [vmem:[%s10240_s20 + $0x10] sm:$0xff] %v5523_v13  ;;  %v5493_v43 = vsel %vm5487_vm6, %v5460_v51, %v9725_v39  ;;  %v5426_v59 = vsel %vm952_vm3, %v5394_v26, %v9474_v6  ;;  %v4957_v20 = vpop.permute.xlu1 %4956  ;;  %v10442_v13 = vld [vmem:[#allocation22_spill] sm:$0xff] }
 0x807   :  { %v5526_v45 = vsel %vm5520_vm7, %v5493_v43, 0.0  ;;  %v5459_v37 = vsel %vm5454_vm5, %v5426_v59, %v9567_v32  ;;  %v5397_v11 = vsel %vm257_vm1, %v4627_v30, %v4957_v20  ;;  %v10443_v26 = vld [vmem:[#allocation58_spill] sm:$0xff]  ;;  %v10444_v43 = vld [vmem:[#allocation25_spill] sm:$0xff]  ;;  %v10445_v20 = vld [vmem:[#allocation23_spill] sm:$0xff] }
 0x808   :  { %5558 = vst [vmem:[%s10240_s20 + $0x28] sm:$0xff] %v5526_v45  ;;  %v5492_v39 = vsel %vm5487_vm6, %v5459_v37, %v9729_v18  ;;  %v5429_v6 = vsel %vm952_vm3, %v5397_v11, %v9480_v2  ;;  %v4955_v25 = vpop.permute.xlu0 %4954  ;;  %v4662_v17 = vadd.f32 %v9658_v27, %v10445_v20  ;;  %v10446_v45 = vld [vmem:[#allocation26_spill] sm:$0xff]  ;;  %v10467_v20 = vld [vmem:[#allocation64_spill] sm:$0xff] }
 0x809   :  { %v5525_v55 = vsel %vm5520_vm7, %v5492_v39, 0.0  ;;  %v5462_v32 = vsel %vm5454_vm5, %v5429_v6, %v9573_v57  ;;  %v5396_v1 = vsel %vm257_vm1, %v4622_v46, %v4955_v25  ;;  %v10447_v39 = vld [vmem:[#allocation59_spill] sm:$0xff]  ;;  %v10448_v25 = vld [vmem:[#allocation6_spill] sm:$0xff] }
 0x80a   :  { %5557 = vst [vmem:[%s10240_s20 + $0x20] sm:$0xff] %v5525_v55  ;;  %v5495_v18 = vsel %vm5487_vm6, %v5462_v32, %v9735_v58  ;;  %v5428_v2 = vsel %vm952_vm3, %v5396_v1, %v9485_v47  ;;  %v4961_v60 = vpop.permute.xlu1 %4960  ;;  %v10449_v32 = vld [vmem:[#allocation37_spill] sm:$0xff] }
 0x80b   :  { %v5528_v44 = vsel %vm5520_vm7, %v5495_v18, 0.0  ;;  %v5461_v57 = vsel %vm5454_vm5, %v5428_v2, %v9577_v21  ;;  %v5399_v54 = vsel %vm257_vm1, %v4637_v8, %v4961_v60  ;;  %v4677_v1 = vadd.f32 %v10449_v32, %v9658_v27  ;;  %v10450_v2 = vld [vmem:[#allocation2_spill] sm:$0xff] }
 0x80c   :  { %5560 = vst [vmem:[%s10240_s20 + $0x38] sm:$0xff] %v5528_v44  ;;  %v5494_v58 = vsel %vm5487_vm6, %v5461_v57, %v9739_v42  ;;  %v5431_v47 = vsel %vm952_vm3, %v5399_v54, %v9491_v19  ;;  %v4959_v10 = vpop.permute.xlu0 %4958  ;;  %v10451_v44 = vld [vmem:[#allocation60_spill] sm:$0xff]  ;;  %v10452_v54 = vld [vmem:[#allocation5_spill] sm:$0xff] }
 0x80d   :  { %v5527_v40 = vsel %vm5520_vm7, %v5494_v58, 0.0  ;;  %v5464_v21 = vsel %vm5454_vm5, %v5431_v47, %v9583_v41  ;;  %v5398_v9 = vsel %vm257_vm1, %v4632_v36, %v4959_v10  ;;  %v10453_v10 = vld [vmem:[#allocation3_spill] sm:$0xff] }
 0x80e   :  { %5559 = vst [vmem:[%s10240_s20 + $0x30] sm:$0xff] %v5527_v40  ;;  %v5497_v42 = vsel %vm5487_vm6, %v5464_v21, %v9745_v34  ;;  %v5430_v19 = vsel %vm952_vm3, %v5398_v9, %v9494_v3  ;;  %v4965_v38 = vpop.permute.xlu1 %4964  ;;  %v10454_v21 = vld [vmem:[#allocation27_spill] sm:$0xff] }
 0x80f   :  { %v5530_v28 = vsel %vm5520_vm7, %v5497_v42, 0.0  ;;  %v5463_v41 = vsel %vm5454_vm5, %v5430_v19, %v9587_v49  ;;  %v5401_v24 = vsel %vm257_vm1, %v4647_v4, %v4965_v38  ;;  %v4672_v4 = vadd.f32 %v9658_v27, %v10453_v10  ;;  %v10455_v19 = vld [vmem:[#allocation61_spill] sm:$0xff]  ;;  %v10475_v10 = vld [vmem:[#allocation11_spill] sm:$0xff] }
 0x810   :  { %5562 = vst [vmem:[%s10240_s20 + $0x48] sm:$0xff] %v5530_v28  ;;  %v5496_v34 = vsel %vm5487_vm6, %v5463_v41, %v9749_v63  ;;  %v5433_v3 = vsel %vm952_vm3, %v5401_v24, %v9499_v12  ;;  %v4963_v48 = vpop.permute.xlu0 %4962  ;;  %v10457_v24 = vld [vmem:[#allocation38_spill] sm:$0xff] }
 0x811   :  { %v5529_v62 = vsel %vm5520_vm7, %v5496_v34, 0.0  ;;  %v5466_v49 = vsel %vm5454_vm5, %v5433_v3, %v9593_v22  ;;  %v5400_v14 = vsel %vm257_vm1, %v4642_v50, %v4963_v48  ;;  %v10456_v50 = vld [vmem:[#allocation8_spill] sm:$0xff]  ;;  %v4687_v34 = vadd.f32 %v10457_v24, %v9658_v27  ;;  %v10479_v24 = vld [vmem:[#allocation14_spill] sm:$0xff] }
 0x812   :  { %5561 = vst [vmem:[%s10240_s20 + $0x40] sm:$0xff] %v5529_v62  ;;  %v5499_v63 = vsel %vm5487_vm6, %v5466_v49, %v9755_v61  ;;  %v5432_v12 = vsel %vm952_vm3, %v5400_v14, %v9503_v53  ;;  %v4969_v16 = vpop.permute.xlu1 %4968  ;;  %v10458_v48 = vld [vmem:[#allocation32_spill] sm:$0xff]  ;;  %v10459_v49 = vld [vmem:[#allocation62_spill] sm:$0xff] }
 0x813   :  { %v5532_v35 = vsel %vm5520_vm7, %v5499_v63, 0.0  ;;  %v5465_v22 = vsel %vm5454_vm5, %v5432_v12, %v9597_v15  ;;  %v5403_v5 = vsel %vm257_vm1, %v4657_v29, %v4969_v16  ;;  %v10460_v63 = vld [vmem:[#allocation7_spill] sm:$0xff] }
 0x814   :  { %5564 = vst [vmem:[%s10240_s20 + $0x58] sm:$0xff] %v5532_v35  ;;  %v5498_v61 = vsel %vm5487_vm6, %v5465_v22, %v9759_v23  ;;  %v5435_v53 = vsel %vm952_vm3, %v5403_v5, %v9505_v33  ;;  %v4967_v56 = vpop.permute.xlu0 %4966  ;;  %v10462_v5 = vld [vmem:[#allocation34_spill] sm:$0xff] }
 0x815   :  { %v5531_v30 = vsel %vm5520_vm7, %v5498_v61, 0.0  ;;  %v5468_v15 = vsel %vm5454_vm5, %v5435_v53, %v10442_v13  ;;  %v5402_v51 = vsel %vm257_vm1, %v4652_v52, %v4967_v56  ;;  %v10461_v52 = vld [vmem:[#allocation24_spill] sm:$0xff]  ;;  %v10463_v56 = vld [vmem:[#allocation63_spill] sm:$0xff] }
 0x816   :  { %5563 = vst [vmem:[%s10240_s20 + $0x50] sm:$0xff] %v5531_v30  ;;  %v5501_v23 = vsel %vm5487_vm6, %v5468_v15, %v10443_v26  ;;  %v5434_v33 = vsel %vm952_vm3, %v5402_v51, %v10444_v43  ;;  %v4973_v59 = vpop.permute.xlu1 %4972  ;;  %v4682_v35 = vadd.f32 %v9658_v27, %v10461_v52  ;;  %v10464_v30 = vld [vmem:[#allocation10_spill] sm:$0xff]  ;;  %v10465_v51 = vld [vmem:[#allocation28_spill] sm:$0xff]  ;;  %v10466_v43 = vld [vmem:[#allocation35_spill] sm:$0xff] }
 0x817   :  { %v5534_v46 = vsel %vm5520_vm7, %v5501_v23, 0.0  ;;  %v5467_v37 = vsel %vm5454_vm5, %v5434_v33, %v10446_v45  ;;  %v5405_v11 = vsel %vm257_vm1, %v4667_v31, %v4973_v59  ;;  %v4697_v26 = vadd.f32 %v10465_v51, %v9658_v27 }
 0x818   :  { %5566 = vst [vmem:[%s10240_s20 + $0x68] sm:$0xff] %v5534_v46  ;;  %v5500_v6 = vsel %vm5487_vm6, %v5467_v37, %v10447_v39  ;;  %v5437_v8 = vsel %vm952_vm3, %v5405_v11, %v10448_v25  ;;  %v4971_v55 = vpop.permute.xlu0 %4970  ;;  %v10468_v46 = vld [vmem:[#allocation9_spill] sm:$0xff]  ;;  %v10469_v11 = vld [vmem:[#allocation30_spill] sm:$0xff]  ;;  %v10470_v25 = vld [vmem:[#allocation40_spill] sm:$0xff] }
 0x819   :  { %v5533_v18 = vsel %vm5520_vm7, %v5500_v6, 0.0  ;;  %v5470_v60 = vsel %vm5454_vm5, %v5437_v8, %v10450_v2  ;;  %v5404_v36 = vsel %vm257_vm1, %v4662_v17, %v4971_v55  ;;  %v4692_v39 = vadd.f32 %v9658_v27, %v10469_v11 }
 0x81a   :  { %5565 = vst [vmem:[%s10240_s20 + $0x60] sm:$0xff] %v5533_v18  ;;  %v5503_v57 = vsel %vm5487_vm6, %v5470_v60, %v10451_v44  ;;  %v5436_v58 = vsel %vm952_vm3, %v5404_v36, %v10452_v54  ;;  %v4977_v47 = vpop.permute.xlu1 %4976  ;;  %v10472_v60 = vld [vmem:[#allocation29_spill] sm:$0xff] }
 0x81b   :  { %v5536_v40 = vsel %vm5520_vm7, %v5503_v57, 0.0  ;;  %v5469_v9 = vsel %vm5454_vm5, %v5436_v58, %v10454_v21  ;;  %v5407_v42 = vsel %vm257_vm1, %v4677_v1, %v4977_v47  ;;  %v10471_v1 = vld [vmem:[#allocation12_spill] sm:$0xff]  ;;  %v4707_v36 = vadd.f32 %v10472_v60, %v9658_v27  ;;  %v10473_v57 = vld [vmem:[#allocation43_spill] sm:$0xff]  ;;  %v10474_v47 = vld [vmem:[#allocation65_spill] sm:$0xff] }
 0x81c   :  { %5568 = vst [vmem:[%s10240_s20 + $0x78] sm:$0xff] %v5536_v40  ;;  %v5502_v38 = vsel %vm5487_vm6, %v5469_v9, %v10455_v19  ;;  %v5439_v28 = vsel %vm952_vm3, %v5407_v42, %v10456_v50  ;;  %v4975_v41 = vpop.permute.xlu0 %4974  ;;  %v10476_v21 = vld [vmem:[#allocation31_spill] sm:$0xff]  ;;  %v10477_v19 = vld [vmem:[#allocation45_spill] sm:$0xff] }
 0x81d   :  { %v5535_v3 = vsel %vm5520_vm7, %v5502_v38, 0.0  ;;  %v5472_v29 = vsel %vm5454_vm5, %v5439_v28, %v10458_v48  ;;  %v5406_v62 = vsel %vm257_vm1, %v4672_v4, %v4975_v41  ;;  %v4702_v9 = vadd.f32 %v9658_v27, %v10476_v21  ;;  %v10478_v28 = vld [vmem:[#allocation66_spill] sm:$0xff]  ;;  %v10480_v48 = vld [vmem:[#allocation33_spill] sm:$0xff] }
 0x81e   :  { %5567 = vst [vmem:[%s10240_s20 + $0x70] sm:$0xff] %v5535_v3  ;;  %v5505_v14 = vsel %vm5487_vm6, %v5472_v29, %v10459_v49  ;;  %v5438_v12 = vsel %vm952_vm3, %v5406_v62, %v10460_v63  ;;  %v4981_v16 = vpop.permute.xlu1 %4980  ;;  %v4717_v29 = vadd.f32 %v10480_v48, %v9658_v27  ;;  %v10481_v49 = vld [vmem:[#allocation48_spill] sm:$0xff] }
 0x81f   :  { %v5538_v22 = vsel %vm5520_vm7, %v5505_v14, 0.0  ;;  %v5471_v61 = vsel %vm5454_vm5, %v5438_v12, %v10462_v5  ;;  %v5409_v53 = vsel %vm257_vm1, %v4687_v34, %v4981_v16  ;;  %v10482_v16 = vld [vmem:[#allocation13_spill] sm:$0xff] }
 0x820   :  { %5570 = vst [vmem:[%s10240_s20 + $0x88] sm:$0xff] %v5538_v22  ;;  %v5504_v31 = vsel %vm5487_vm6, %v5471_v61, %v10463_v56  ;;  %v5441_v13 = vsel %vm952_vm3, %v5409_v53, %v10464_v30  ;;  %v4979_v15 = vpop.permute.xlu0 %4978  ;;  %v10483_v22 = vld [vmem:[#allocation36_spill] sm:$0xff]  ;;  %v10484_v53 = vld [vmem:[#allocation49_spill] sm:$0xff]  ;;  %v10485_v30 = vld [vmem:[#allocation67_spill] sm:$0xff] }
 0x821   :  { %v5537_v23 = vsel %vm5520_vm7, %v5504_v31, 0.0  ;;  %v5474_v33 = vsel %vm5454_vm5, %v5441_v13, %v10466_v43  ;;  %v5408_v59 = vsel %vm257_vm1, %v4682_v35, %v4979_v15  ;;  %v4712_v5 = vadd.f32 %v9658_v27, %v10483_v22  ;;  %v10486_v13 = vld [vmem:[#allocation16_spill] sm:$0xff]  ;;  %v10506_v22 = vld [vmem:[#allocation18_spill] sm:$0xff] }
 0x822   :  { %5569 = vst [vmem:[%s10240_s20 + $0x80] sm:$0xff] %v5537_v23  ;;  %v5507_v17 = vsel %vm5487_vm6, %v5474_v33, %v10467_v20  ;;  %v5440_v45 = vsel %vm952_vm3, %v5408_v59, %v10468_v46  ;;  %v4985_v37 = vpop.permute.xlu1 %4984  ;;  %v10488_v33 = vld [vmem:[#allocation50_spill] sm:$0xff] }
 0x823   :  { %v5540_v6 = vsel %vm5520_vm7, %v5507_v17, 0.0  ;;  %v5473_v8 = vsel %vm5454_vm5, %v5440_v45, %v10470_v25  ;;  %v5411_v55 = vsel %vm257_vm1, %v4697_v26, %v4985_v37  ;;  %v10487_v26 = vld [vmem:[#allocation39_spill] sm:$0xff]  ;;  %v10489_v17 = vld [vmem:[#allocation68_spill] sm:$0xff] }
 0x824   :  { %5572 = vst [vmem:[%s10240_s20 + $0x98] sm:$0xff] %v5540_v6  ;;  %v5506_v32 = vsel %vm5487_vm6, %v5473_v8, %v9784_v7  ;;  %v5443_v18 = vsel %vm952_vm3, %v5411_v55, %v10471_v1  ;;  %v4983_v2 = vpop.permute.xlu0 %4982  ;;  %v4727_v23 = vadd.f32 %v10487_v26, %v9658_v27  ;;  %v10490_v45 = vld [vmem:[#allocation15_spill] sm:$0xff]  ;;  %v10493_v1 = vld [vmem:[#allocation69_spill] sm:$0xff] }
 0x825   :  { %v5539_v44 = vsel %vm5520_vm7, %v5506_v32, 0.0  ;;  %v5476_v54 = vsel %vm5454_vm5, %v5443_v18, %v10473_v57  ;;  %v5410_v58 = vsel %vm257_vm1, %v4692_v39, %v4983_v2  ;;  %v10491_v39 = vld [vmem:[#allocation41_spill] sm:$0xff]  ;;  %v10492_v8 = vld [vmem:[#allocation51_spill] sm:$0xff] }
 0x826   :  { %5571 = vst [vmem:[%s10240_s20 + $0x90] sm:$0xff] %v5539_v44  ;;  %v5509_v7 = vsel %vm5487_vm6, %v5476_v54, %v10474_v47  ;;  %v5442_v4 = vsel %vm952_vm3, %v5410_v58, %v10475_v10  ;;  %v4989_v40 = vpop.permute.xlu1 %4988  ;;  %v4722_v6 = vadd.f32 %v9658_v27, %v10491_v39  ;;  %v10494_v2 = vld [vmem:[#allocation17_spill] sm:$0xff]  ;;  %v10495_v44 = vld [vmem:[#allocation42_spill] sm:$0xff]  ;;  %v10496_v58 = vld [vmem:[#allocation52_spill] sm:$0xff] }
 0x827   :  { %v5542_v42 = vsel %vm5520_vm7, %v5509_v7, 0.0  ;;  %v5475_v38 = vsel %vm5454_vm5, %v5442_v4, %v10477_v19  ;;  %v5413_v50 = vsel %vm257_vm1, %v4707_v36, %v4989_v40  ;;  %v4737_v57 = vadd.f32 %v10495_v44, %v9658_v27  ;;  %v10497_v10 = vld [vmem:[#allocation70_spill] sm:$0xff]  ;;  %v10498_v40 = vld [vmem:[#allocation4_spill] sm:$0xff]  ;;  %v10510_v26 = vld [vmem:[#allocation21_spill] sm:$0xff] }
 0x828   :  { %5574 = vst [vmem:[%s10240_s20 + $0xa8] sm:$0xff] %v5542_v42  ;;  %v5508_v41 = vsel %vm5487_vm6, %v5475_v38, %v10478_v28  ;;  %v5445_v34 = vsel %vm952_vm3, %v5413_v50, %v10479_v24  ;;  %v4987_v3 = vpop.permute.xlu0 %4986  ;;  %v10499_v42 = vld [vmem:[#allocation44_spill] sm:$0xff]  ;;  %v10500_v50 = vld [vmem:[#allocation53_spill] sm:$0xff]  ;;  %v10501_v24 = vld [vmem:[#allocation71_spill] sm:$0xff] }
 0x829   :  { %v5541_v62 = vsel %vm5520_vm7, %v5508_v41, 0.0  ;;  %v5478_v14 = vsel %vm5454_vm5, %v5445_v34, %v10481_v49  ;;  %v5412_v63 = vsel %vm257_vm1, %v4702_v9, %v4987_v3  ;;  %v4732_v19 = vadd.f32 %v9658_v27, %v10499_v42  ;;  %v10502_v3 = vld [vmem:[#allocation19_spill] sm:$0xff] }
 0x82a   :  { %5573 = vst [vmem:[%s10240_s20 + $0xa0] sm:$0xff] %v5541_v62  ;;  %v5511_v12 = vsel %vm5487_vm6, %v5478_v14, %v9790_v0  ;;  %v5444_v52 = vsel %vm952_vm3, %v5412_v63, %v10482_v16  ;;  %v4993_v35 = vpop.permute.xlu1 %4992  ;;  %v10503_v62 = vld [vmem:[#allocation46_spill] sm:$0xff] }
 0x82b   :  { %v5544_v61 = vsel %vm5520_vm7, %v5511_v12, 0.0  ;;  %v5477_v56 = vsel %vm5454_vm5, %v5444_v52, %v10484_v53  ;;  %v5415_v31 = vsel %vm257_vm1, %v4717_v29, %v4993_v35  ;;  %v4747_v49 = vadd.f32 %v10503_v62, %v9658_v27  ;;  %v10504_v63 = vld [vmem:[#allocation54_spill] sm:$0xff]  ;;  %v10505_v52 = vld [vmem:[#allocation72_spill] sm:$0xff]  ;;  %v10507_v53 = vld [vmem:[#allocation47_spill] sm:$0xff] }
 0x82c   :  { %5576 = vst [vmem:[%s10240_s20 + $0xb8] sm:$0xff] %v5544_v61  ;;  %v5510_v0 = vsel %vm5487_vm6, %v5477_v56, %v10485_v30  ;;  %v5447_v15 = vsel %vm952_vm3, %v5415_v31, %v10486_v13  ;;  %v4991_v51 = vpop.permute.xlu0 %4990  ;;  %v4742_v56 = vadd.f32 %v9658_v27, %v10507_v53  ;;  %v10508_v30 = vld [vmem:[#allocation55_spill] sm:$0xff] }
 0x82d   :  { %v5543_v43 = vsel %vm5520_vm7, %v5510_v0, 0.0  ;;  %v5480_v59 = vsel %vm5454_vm5, %v5447_v15, %v10488_v33  ;;  %v5414_v20 = vsel %vm257_vm1, %v4712_v5, %v4991_v51  ;;  %v10509_v15 = vld [vmem:[#allocation73_spill] sm:$0xff] }
 0x82e   :  { %5575 = vst [vmem:[%s10240_s20 + $0xb0] sm:$0xff] %v5543_v43  ;;  %v5513_v46 = vsel %vm5487_vm6, %v5480_v59, %v10489_v17  ;;  %v5446_v37 = vsel %vm952_vm3, %v5414_v20, %v10490_v45  ;;  %v4997_v11 = vpop.permute.xlu1 %4996  ;;  %v10511_v59 = vld [vmem:[#allocation56_spill] sm:$0xff] }
 0x82f   :  { %v5546_v25 = vsel %vm5520_vm7, %v5513_v46, 0.0  ;;  %v5479_v55 = vsel %vm5454_vm5, %v5446_v37, %v10492_v8  ;;  %v5417_v32 = vsel %vm257_vm1, %v4727_v23, %v4997_v11  ;;  %v10512_v17 = vld [vmem:[#allocation20_spill] sm:$0xff]  ;;  %v10513_v11 = vld [vmem:[#allocation57_spill] sm:$0xff] }
 0x830   :  { %5578 = vst [vmem:[%s10240_s20 + $0xc8] sm:$0xff] %v5546_v25  ;;  %v5512_v18 = vsel %vm5487_vm6, %v5479_v55, %v10493_v1  ;;  %v5449_v60 = vsel %vm952_vm3, %v5417_v32, %v10494_v2  ;;  %v4995_v36 = vpop.permute.xlu0 %4994 }
 0x831   :  { %v5545_v54 = vsel %vm5520_vm7, %v5512_v18, 0.0  ;;  %v5482_v47 = vsel %vm5454_vm5, %v5449_v60, %v10496_v58  ;;  %v5416_v7 = vsel %vm257_vm1, %v4722_v6, %v4995_v36 }
 0x832   :  { %5577 = vst [vmem:[%s10240_s20 + $0xc0] sm:$0xff] %v5545_v54  ;;  %v5515_v4 = vsel %vm5487_vm6, %v5482_v47, %v10497_v10  ;;  %v5448_v21 = vsel %vm952_vm3, %v5416_v7, %v10498_v40  ;;  %v5001_v9 = vpop.permute.xlu1 %5000 }
 0x833   :  { %v5548_v38 = vsel %vm5520_vm7, %v5515_v4, 0.0  ;;  %v5481_v28 = vsel %vm5454_vm5, %v5448_v21, %v10500_v50  ;;  %v5419_v41 = vsel %vm257_vm1, %v4737_v57, %v5001_v9 }
 0x834   :  { %5580 = vst [vmem:[%s10240_s20 + $0xd8] sm:$0xff] %v5548_v38  ;;  %v5514_v34 = vsel %vm5487_vm6, %v5481_v28, %v10501_v24  ;;  %v5451_v48 = vsel %vm952_vm3, %v5419_v41, %v10502_v3  ;;  %v4999_v29 = vpop.permute.xlu0 %4998 }
 0x835   :  { %v5547_v14 = vsel %vm5520_vm7, %v5514_v34, 0.0  ;;  %v5484_v12 = vsel %vm5454_vm5, %v5451_v48, %v10504_v63  ;;  %v5418_v16 = vsel %vm257_vm1, %v4732_v19, %v4999_v29 }
 0x836   :  { %5579 = vst [vmem:[%s10240_s20 + $0xd0] sm:$0xff] %v5547_v14  ;;  %v5517_v35 = vsel %vm5487_vm6, %v5484_v12, %v10505_v52  ;;  %v5450_v5 = vsel %vm952_vm3, %v5418_v16, %v10506_v22  ;;  %v5005_v61 = vpop.permute.xlu1 %5004 }
 0x837   :  { %v5550_v31 = vsel %vm5520_vm7, %v5517_v35, 0.0  ;;  %v5483_v0 = vsel %vm5454_vm5, %v5450_v5, %v10508_v30  ;;  %v5421_v13 = vsel %vm257_vm1, %v4747_v49, %v5005_v61 }
 0x838   :  { %5582 = vst [vmem:[%s10240_s20 + $0xe8] sm:$0xff] %v5550_v31  ;;  %v5516_v51 = vsel %vm5487_vm6, %v5483_v0, %v10509_v15  ;;  %v5453_v23 = vsel %vm952_vm3, %v5421_v13, %v10510_v26  ;;  %v5003_v43 = vpop.permute.xlu0 %5002 }
 0x839   :  { %v5549_v27 = vsel %vm5520_vm7, %v5516_v51, 0.0  ;;  %v5420_v33 = vsel %vm257_vm1, %v4742_v56, %v5003_v43  ;;  %v5486_v20 = vsel %vm5454_vm5, %v5453_v23, %v10511_v59 }
 0x83a   :  { %5581 = vst [vmem:[%s10240_s20 + $0xe0] sm:$0xff] %v5549_v27  ;;  %v5452_v46 = vsel %vm952_vm3, %v5420_v33, %v10512_v17  ;;  %v5357_v45 = vpop.permute.xlu1 %5356 }
 0x83b   :  { %v5519_v37 = vsel %vm5487_vm6, %v5486_v20, %v5357_v45  ;;  %v5485_v39 = vsel %vm5454_vm5, %v5452_v46, %v10513_v11 }
 0x83c   :  { %v5552_v6 = vsel %vm5520_vm7, %v5519_v37, 0.0  ;;  %v5355_v25 = vpop.permute.xlu0 %5354 }
 0x83d   :  { %5584 = vst [vmem:[%s10240_s20 + $0xf8] sm:$0xff] %v5552_v6  ;;  %v5518_v8 = vsel %vm5487_vm6, %v5485_v39, %v5355_v25 }
 0x83e   :  { %v5551_v55 = vsel %vm5520_vm7, %v5518_v8, 0.0 }
 0x83f   :  { %5583 = vst [vmem:[%s10240_s20 + $0xf0] sm:$0xff] %v5551_v55 }

</bundles_post_ra>
